<compile_context>
chip_gen: v7x
topology: tpu7x:2x2x1
jax: 0.10.0
libtpu: 0.0.40
codegen_flags: <defaults>
</compile_context>

<pallas_src>
import functools

import jax
import jax.numpy as jnp
from jax.experimental import pallas as pl
from jax.experimental.pallas import tpu as pltpu

NEWS_DIM = 400          # news_dim in the module
QUERY_DIM = 200         # user_query_vector_dim in the module


def _round_up(x, m):
    return ((x + m - 1) // m) * m


def _user_encoder_kernel(news_ref, mask_ref, pad_ref, w1_ref, padw1_ref,
                         padw1b1_ref, w2t_ref, b2_ref, out_ref, *, ew_dtype):
    # news_ref:    (tb*H, D)  f32/bf16  (host-flattened news_vecs tile)
    # mask_ref:    (tb*H, 1)  f32       (host-flattened log_mask column)
    # pad_ref:     (1, D)     f32
    # w1_ref:      (D, Q)     f32/bf16
    # padw1_ref:   (1, Q)     f32       (= pad_doc @ W1)
    # padw1b1_ref: (1, Q)     f32       (= pad_doc @ W1 + b1)
    # w2t_ref:     (1, Q)     f32       (= W2^T)
    # b2_ref:      (1, 1)     f32
    # out_ref:     (tb, D)    f32
    rows, d = news_ref.shape
    tb = out_ref.shape[0]
    hlen = rows // tb                                   # static history length

    news = news_ref[...]                                # (tb*H, D) compute dtype
    m_col = mask_ref[...]                               # (tb*H, 1) f32

    # MXU: tall (tb*H, D) @ (D, Q), f32 accumulation.
    h = jnp.dot(news, w1_ref[...], preferred_element_type=jnp.float32)   # (tb*H, Q) f32

    # tanh(x @ W1 + b1) with x = m*news + (1-m)*pad, folded via linearity (exact for any
    # real mask). Optionally run this elementwise block in bf16 (bf16 VPU/EUP on v6e/v7x).
    ew = ew_dtype
    e = jnp.tanh(m_col.astype(ew) * (h.astype(ew) - padw1_ref[...].astype(ew))
                 + padw1b1_ref[...].astype(ew))                           # (tb*H, Q)

    # e @ W2 + b2 on the VPU/XLU; the f32 w2t promotes the product so the lane reduction
    # always accumulates in f32.
    score = jnp.sum(e * w2t_ref[...], axis=-1, keepdims=True) + b2_ref[...]  # (tb*H, 1)

    # Attention weights normalized over the history axis, per batch row.
    # NOTE: exp() without max-subtraction matches the PyTorch reference exactly; it is safe
    # under the module's init, but heavily trained W2/b2 could overflow in both.
    # NOTE: on a non-divisible last batch tile the padded rows compute on garbage (tanh/exp
    # may transiently give Inf/NaN there); rows are independent and OOB stores are dropped,
    # so real outputs are unaffected. Do not add cross-row reductions here.
    alpha3 = jnp.exp(score).reshape(tb, hlen, 1)                 # layout-preserving (f32)
    inv = 1.0 / (jnp.sum(alpha3, axis=1, keepdims=True) + 1e-8)  # (tb, 1, 1)
    alpha3 = alpha3 * inv

    # user = sum_h alpha*x = sum_h (alpha*m)*news + (sum_h alpha*(1-m)) * pad
    m3 = m_col.reshape(tb, hlen, 1)                              # layout-preserving (f32)
    w_news3 = alpha3 * m3                                        # (tb, H, 1)
    w_pad = jnp.sum(alpha3 - w_news3, axis=1)                    # (tb, 1) = sum alpha*(1-m)

    # Multiply the (possibly bf16) news tile by the f32 weight column directly (per-vreg
    # promotion, no separate f32 copy of news); reshape the f32 product, not the bf16 tile.
    weighted = news * w_news3.reshape(rows, 1)                   # (tb*H, D) f32
    user = jnp.sum(weighted.reshape(tb, hlen, d), axis=1)        # (tb, D) f32
    out_ref[...] = (user + w_pad * pad_ref[...]).astype(out_ref.dtype)


def _vmem_budget_bytes(tb, hlen, d, q, news_itemsize):
    """Conservative per-grid-step VMEM footprint (double-buffered I/O + f32 temporaries)."""
    dpad, qpad = _round_up(d, 128), _round_up(q, 128)
    rows = tb * hlen
    news = rows * dpad * news_itemsize * 2            # news tile, double-buffered
    mask = rows * 128 * 4 * 2                         # (rows, 1) f32 column, lane-padded
    out = tb * dpad * 4 * 2                           # (tb, D) f32 output
    w1 = _round_up(d, 16) * qpad * news_itemsize * 2  # att_fc1 weight
    wide = 2 * rows * qpad * 4                        # h / e intermediates
    prod = rows * dpad * 4                            # weighted news product (f32)
    cols = 4 * rows * 128 * 4                         # score/alpha/weight column temps
    consts = 8 * 8 * dpad * 4                         # small broadcast constants
    return news + mask + out + w1 + wide + prod + cols + consts


def user_encoder(news_vecs, log_mask, params, *, block_batch=384,
                 compute_dtype=jnp.bfloat16, ew_dtype=jnp.float32,
                 vmem_limit_bytes=None, min_grid_steps=2):
    """Pallas UserEncoder forward.

    compute_dtype: dtype of the streamed news tile and W1. bf16 (default) halves HBM
        traffic of this bandwidth-bound kernel; the MXU still accumulates in f32.
    ew_dtype: dtype of the (tb*H, Q) elementwise fold + tanh. jnp.bfloat16 is recommended
        on v6e/v7x (bf16-native VPU/EUP); keep the f32 default on v5e.
    block_batch: max batch rows per grid step (384 fits v7x's 64 MiB VMEM with headroom;
        512 is fine on v5e/v6e's 128 MiB).
    """
    B, H, D = news_vecs.shape
    w1, b1, w2, b2 = params["w1"], params["b1"], params["w2"], params["b2"]
    pad = params["pad_doc"].astype(jnp.float32)                    # (1, D)
    Q = w1.shape[1]

    # Batch tile: multiple of 16 (keeps the (tb*H, D) / (tb, D) blocks sublane-aligned for
    # both f32 and bf16, for any H), capped by block_batch, and small enough that the grid
    # has >= min_grid_steps steps so both v7x TensorCores get work under "parallel".
    align = 16
    cap = max(align, (block_batch // align) * align)
    want = max(align, _round_up(pl.cdiv(B, min_grid_steps), align))
    tb = min(cap, want)
    grid = (pl.cdiv(B, tb),)

    # Host-side layout prep: flatten news to (B*H, D) so the kernel block is dense for both
    # dtypes and feeds the MXU without any in-kernel repack; flatten the mask to a column.
    news_in = news_vecs.reshape(B * H, D).astype(compute_dtype)
    mask_col = log_mask.astype(jnp.float32).reshape(B * H, 1)
    w1_in = w1.astype(compute_dtype)

    # Tiny host-side precompute at full f32 precision.
    pad_w1 = jnp.dot(pad, w1.astype(jnp.float32),
                     precision=jax.lax.Precision.HIGHEST)          # (1, Q)
    pad_w1b1 = pad_w1 + b1.astype(jnp.float32).reshape(1, Q)       # (1, Q)
    w2t = w2.astype(jnp.float32).reshape(1, Q)                     # (1, Q)
    b2r = b2.astype(jnp.float32).reshape(1, 1)                     # (1, 1)

    if vmem_limit_bytes is None:
        budget = _vmem_budget_bytes(tb, H, D, Q, jnp.dtype(compute_dtype).itemsize)
        vmem_limit_bytes = int(min(100 * 1024 * 1024,
                                   max(8 * 1024 * 1024, 1.3 * budget)))

    kernel = functools.partial(_user_encoder_kernel, ew_dtype=ew_dtype)
    return pl.pallas_call(
        kernel,
        out_shape=jax.ShapeDtypeStruct((B, D), jnp.float32),
        grid_spec=pltpu.PrefetchScalarGridSpec(
            num_scalar_prefetch=0,
            grid=grid,
            in_specs=[
                pl.BlockSpec((tb * H, D), lambda b: (b, 0)),   # flattened news tile
                pl.BlockSpec((tb * H, 1), lambda b: (b, 0)),   # flattened mask column
                pl.BlockSpec((1, D), lambda b: (0, 0)),        # pad_doc
                pl.BlockSpec((D, Q), lambda b: (0, 0)),        # att_fc1 weight
                pl.BlockSpec((1, Q), lambda b: (0, 0)),        # pad_doc @ W1
                pl.BlockSpec((1, Q), lambda b: (0, 0)),        # pad_doc @ W1 + b1
                pl.BlockSpec((1, Q), lambda b: (0, 0)),        # att_fc2 weight (transposed)
                pl.BlockSpec((1, 1), lambda b: (0, 0)),        # att_fc2 bias
            ],
            out_specs=pl.BlockSpec((tb, D), lambda b: (b, 0)),
        ),
        compiler_params=pltpu.CompilerParams(
            dimension_semantics=("parallel",),       # batch tiles shard across megacore TCs
            vmem_limit_bytes=vmem_limit_bytes,       # sized from footprint, fits v7x 64 MiB
        ),
    )(news_in, mask_col, pad, w1_in, pad_w1, pad_w1b1, w2t, b2r)


def init_params(key, news_dim=NEWS_DIM, query_dim=QUERY_DIM):
    k_pad, k_w1, k_b1, k_w2, k_b2 = jax.random.split(key, 5)
    # pad_doc ~ U(-1, 1), shape (1, news_dim) — as in nn.Parameter(...).uniform_(-1, 1)
    pad_doc = jax.random.uniform(k_pad, (1, news_dim), jnp.float32, -1.0, 1.0)
    # nn.Linear default init: U(-1/sqrt(fan_in), 1/sqrt(fan_in))
    lim1 = 1.0 / jnp.sqrt(news_dim)
    w1 = jax.random.uniform(k_w1, (news_dim, query_dim), jnp.float32, -lim1, lim1)
    b1 = jax.random.uniform(k_b1, (1, query_dim), jnp.float32, -lim1, lim1)
    lim2 = 1.0 / jnp.sqrt(query_dim)
    w2 = jax.random.uniform(k_w2, (query_dim, 1), jnp.float32, -lim2, lim2)
    b2 = jax.random.uniform(k_b2, (1, 1), jnp.float32, -lim2, lim2)
    return {"pad_doc": pad_doc, "w1": w1, "b1": b1, "w2": w2, "b2": b2}


def user_encoder_reference(news_vecs, log_mask, params):
    """Pure-JAX reference mirroring the PyTorch forward."""
    m = log_mask.astype(jnp.float32)[..., None]                    # (B, H, 1)
    x = news_vecs * m + params["pad_doc"][None, :, :] * (1.0 - m)  # (B, H, D)
    e = jnp.tanh(jnp.einsum("bhd,dq->bhq", x, params["w1"]) + params["b1"])
    alpha = jnp.exp(jnp.einsum("bhq,qo->bho", e, params["w2"]) + params["b2"])
    alpha = alpha / (jnp.sum(alpha, axis=1, keepdims=True) + 1e-8)
    return jnp.sum(x * alpha, axis=1)                              # (B, D)


if __name__ == "__main__":
    key = jax.random.PRNGKey(0)
    k_params, k_news, k_mask = jax.random.split(key, 3)

    B = 24           # small demo batch
    H = 8            # cfg.his_size (user_log_length)
    D = NEWS_DIM     # 400, fixed by the module
    params = init_params(k_params)

    news_vecs = jax.random.normal(k_news, (B, H, D), jnp.float32)
    # Binary history mask (1 = real clicked news, 0 = padding slot).
    log_mask = (jax.random.uniform(k_mask, (B, H)) > 0.3).astype(jnp.float32)

    ref = user_encoder_reference(news_vecs, log_mask, params)

    # Default path: bf16 news/W1, >=2 grid steps (megacore), partial last batch tile.
    out_bf16 = jax.block_until_ready(user_encoder(news_vecs, log_mask, params))
    assert out_bf16.shape == (B, D)
    assert bool(jnp.allclose(out_bf16, ref, atol=5e-2, rtol=5e-2)), "bf16 kernel mismatch"

    # f32 input path with a small batch tile: exercises a multi-step grid explicitly.
    out_f32 = jax.block_until_ready(
        user_encoder(news_vecs, log_mask, params, block_batch=16,
                     compute_dtype=jnp.float32))
    assert out_f32.shape == (B, D)
    assert bool(jnp.allclose(out_f32, ref, atol=2e-2, rtol=2e-2)), "f32 kernel mismatch"

    print("KERNEL_OK")
</pallas_src>

<mosaic_0001>
module attributes {stable_mosaic.version = 11 : i64} {
  func.func @_user_encoder_kernel(%arg0: i32, %arg1: memref<128x400xbf16, #tpu.memory_space<vmem>>, %arg2: memref<128x1xf32, #tpu.memory_space<vmem>>, %arg3: memref<1x400xf32, #tpu.memory_space<vmem>>, %arg4: memref<400x200xbf16, #tpu.memory_space<vmem>>, %arg5: memref<1x200xf32, #tpu.memory_space<vmem>>, %arg6: memref<1x200xf32, #tpu.memory_space<vmem>>, %arg7: memref<1x200xf32, #tpu.memory_space<vmem>>, %arg8: memref<1x1xf32, #tpu.memory_space<vmem>>, %arg9: memref<16x400xf32, #tpu.memory_space<vmem>>) attributes {dimension_semantics = [#tpu.dimension_semantics<parallel>], iteration_bounds = array<i64: 2>, scalar_prefetch = 0 : i64, scratch_operands = 0 : i64, tpu.core_type = #tpu.core_type<tc>, window_params = [{transform_indices = @transform_0, window_bounds = array<i64: 128, 400>}, {transform_indices = @transform_1, window_bounds = array<i64: 128, 1>}, {pipeline_mode = #tpu.pipeline_mode<synchronous>, transform_indices = @transform_2, window_bounds = array<i64: 1, 400>}, {pipeline_mode = #tpu.pipeline_mode<synchronous>, transform_indices = @transform_3, window_bounds = array<i64: 400, 200>}, {pipeline_mode = #tpu.pipeline_mode<synchronous>, transform_indices = @transform_4, window_bounds = array<i64: 1, 200>}, {pipeline_mode = #tpu.pipeline_mode<synchronous>, transform_indices = @transform_5, window_bounds = array<i64: 1, 200>}, {pipeline_mode = #tpu.pipeline_mode<synchronous>, transform_indices = @transform_6, window_bounds = array<i64: 1, 200>}, {pipeline_mode = #tpu.pipeline_mode<synchronous>, transform_indices = @transform_7, window_bounds = array<i64: 1, 1>}, {transform_indices = @transform_8, window_bounds = array<i64: 16, 400>}]} {
    %c0 = arith.constant 0 : index
    %c0_0 = arith.constant 0 : index
    %0 = vector.load %arg1[%c0, %c0_0] : memref<128x400xbf16, #tpu.memory_space<vmem>>, vector<128x400xbf16>
    %c0_1 = arith.constant 0 : index
    %c0_2 = arith.constant 0 : index
    %1 = vector.load %arg2[%c0_1, %c0_2] : memref<128x1xf32, #tpu.memory_space<vmem>>, vector<128x1xf32>
    %c0_3 = arith.constant 0 : index
    %c0_4 = arith.constant 0 : index
    %2 = vector.load %arg4[%c0_3, %c0_4] : memref<400x200xbf16, #tpu.memory_space<vmem>>, vector<400x200xbf16>
    %cst = arith.constant dense<0.000000e+00> : vector<128x200xf32>
    %3 = tpu.matmul %0, %2, %cst {dimension_numbers = #tpu.dot_dimension_numbers<[1], [0], [0], [1], [0, 0, 1, 1], [], []>} : vector<128x400xbf16>, vector<400x200xbf16>, vector<128x200xf32> -> vector<128x200xf32>
    %c0_5 = arith.constant 0 : index
    %c0_6 = arith.constant 0 : index
    %4 = vector.load %arg5[%c0_5, %c0_6] : memref<1x200xf32, #tpu.memory_space<vmem>>, vector<1x200xf32>
    %5 = vector.broadcast %4 : vector<1x200xf32> to vector<128x200xf32>
    %6 = arith.subf %3, %5 : vector<128x200xf32>
    %7 = vector.broadcast %1 : vector<128x1xf32> to vector<128x200xf32>
    %8 = arith.mulf %7, %6 : vector<128x200xf32>
    %c0_7 = arith.constant 0 : index
    %c0_8 = arith.constant 0 : index
    %9 = vector.load %arg6[%c0_7, %c0_8] : memref<1x200xf32, #tpu.memory_space<vmem>>, vector<1x200xf32>
    %10 = vector.broadcast %9 : vector<1x200xf32> to vector<128x200xf32>
    %11 = arith.addf %8, %10 : vector<128x200xf32>
    %12 = math.tanh %11 : vector<128x200xf32>
    %c0_9 = arith.constant 0 : index
    %c0_10 = arith.constant 0 : index
    %13 = vector.load %arg7[%c0_9, %c0_10] : memref<1x200xf32, #tpu.memory_space<vmem>>, vector<1x200xf32>
    %14 = vector.broadcast %13 : vector<1x200xf32> to vector<128x200xf32>
    %15 = arith.mulf %12, %14 : vector<128x200xf32>
    %cst_11 = arith.constant dense<0.000000e+00> : vector<128xf32>
    %16 = vector.multi_reduction <add>, %15, %cst_11 [1] : vector<128x200xf32> to vector<128xf32>
    %17 = vector.shape_cast %16 : vector<128xf32> to vector<128x1xf32>
    %c0_12 = arith.constant 0 : index
    %c0_13 = arith.constant 0 : index
    %18 = vector.load %arg8[%c0_12, %c0_13] : memref<1x1xf32, #tpu.memory_space<vmem>>, vector<1x1xf32>
    %19 = vector.broadcast %18 : vector<1x1xf32> to vector<128x1xf32>
    %20 = arith.addf %17, %19 : vector<128x1xf32>
    %21 = math.exp %20 : vector<128x1xf32>
    %22 = vector.shape_cast %21 : vector<128x1xf32> to vector<16x8x1xf32>
    %cst_14 = arith.constant dense<0.000000e+00> : vector<16x1xf32>
    %23 = vector.multi_reduction <add>, %22, %cst_14 [1] : vector<16x8x1xf32> to vector<16x1xf32>
    %24 = vector.shape_cast %23 : vector<16x1xf32> to vector<16x1x1xf32>
    %cst_15 = arith.constant 9.99999993E-9 : f32
    %25 = vector.broadcast %cst_15 : f32 to vector<16x1x1xf32>
    %26 = arith.addf %24, %25 : vector<16x1x1xf32>
    %cst_16 = arith.constant 1.000000e+00 : f32
    %27 = vector.broadcast %cst_16 : f32 to vector<16x1x1xf32>
    %28 = arith.divf %27, %26 : vector<16x1x1xf32>
    %29 = vector.broadcast %28 : vector<16x1x1xf32> to vector<16x8x1xf32>
    %30 = arith.mulf %22, %29 : vector<16x8x1xf32>
    %31 = vector.shape_cast %1 : vector<128x1xf32> to vector<16x8x1xf32>
    %32 = arith.mulf %30, %31 : vector<16x8x1xf32>
    %33 = arith.subf %30, %32 : vector<16x8x1xf32>
    %cst_17 = arith.constant dense<0.000000e+00> : vector<16x1xf32>
    %34 = vector.multi_reduction <add>, %33, %cst_17 [1] : vector<16x8x1xf32> to vector<16x1xf32>
    %35 = vector.shape_cast %32 : vector<16x8x1xf32> to vector<128x1xf32>
    %36 = arith.extf %0 : vector<128x400xbf16> to vector<128x400xf32>
    %37 = vector.broadcast %35 : vector<128x1xf32> to vector<128x400xf32>
    %38 = arith.mulf %36, %37 : vector<128x400xf32>
    %39 = vector.shape_cast %38 : vector<128x400xf32> to vector<16x8x400xf32>
    %cst_18 = arith.constant dense<0.000000e+00> : vector<16x400xf32>
    %40 = vector.multi_reduction <add>, %39, %cst_18 [1] : vector<16x8x400xf32> to vector<16x400xf32>
    %c0_19 = arith.constant 0 : index
    %c0_20 = arith.constant 0 : index
    %41 = vector.load %arg3[%c0_19, %c0_20] : memref<1x400xf32, #tpu.memory_space<vmem>>, vector<1x400xf32>
    %42 = vector.broadcast %34 : vector<16x1xf32> to vector<16x400xf32>
    %43 = vector.broadcast %41 : vector<1x400xf32> to vector<16x400xf32>
    %44 = arith.mulf %42, %43 : vector<16x400xf32>
    %45 = arith.addf %40, %44 : vector<16x400xf32>
    %c0_21 = arith.constant 0 : index
    %c0_22 = arith.constant 0 : index
    %46 = vector.load %arg9[%c0_21, %c0_22] : memref<16x400xf32, #tpu.memory_space<vmem>>, vector<16x400xf32>
    tpu.vector_store %arg9[%c0_21, %c0_22], %45 {strides = array<i32>} : memref<16x400xf32, #tpu.memory_space<vmem>>, vector<16x400xf32>,
    return
  }
  func.func @transform_0(%arg0: i32) -> (i32, i32) {
    %c0_i32 = arith.constant 0 : i32
    %c0_i32_0 = arith.constant 0 : i32
    return %arg0, %c0_i32 : i32, i32
  }
  func.func @transform_1(%arg0: i32) -> (i32, i32) {
    %c0_i32 = arith.constant 0 : i32
    %c0_i32_0 = arith.constant 0 : i32
    return %arg0, %c0_i32 : i32, i32
  }
  func.func @transform_2(%arg0: i32) -> (i32, i32) {
    %c0_i32 = arith.constant 0 : i32
    %c0_i32_0 = arith.constant 0 : i32
    %c0_i32_1 = arith.constant 0 : i32
    return %c0_i32, %c0_i32_0 : i32, i32
  }
  func.func @transform_3(%arg0: i32) -> (i32, i32) {
    %c0_i32 = arith.constant 0 : i32
    %c0_i32_0 = arith.constant 0 : i32
    %c0_i32_1 = arith.constant 0 : i32
    return %c0_i32, %c0_i32_0 : i32, i32
  }
  func.func @transform_4(%arg0: i32) -> (i32, i32) {
    %c0_i32 = arith.constant 0 : i32
    %c0_i32_0 = arith.constant 0 : i32
    %c0_i32_1 = arith.constant 0 : i32
    return %c0_i32, %c0_i32_0 : i32, i32
  }
  func.func @transform_5(%arg0: i32) -> (i32, i32) {
    %c0_i32 = arith.constant 0 : i32
    %c0_i32_0 = arith.constant 0 : i32
    %c0_i32_1 = arith.constant 0 : i32
    return %c0_i32, %c0_i32_0 : i32, i32
  }
  func.func @transform_6(%arg0: i32) -> (i32, i32) {
    %c0_i32 = arith.constant 0 : i32
    %c0_i32_0 = arith.constant 0 : i32
    %c0_i32_1 = arith.constant 0 : i32
    return %c0_i32, %c0_i32_0 : i32, i32
  }
  func.func @transform_7(%arg0: i32) -> (i32, i32) {
    %c0_i32 = arith.constant 0 : i32
    %c0_i32_0 = arith.constant 0 : i32
    %c0_i32_1 = arith.constant 0 : i32
    return %c0_i32, %c0_i32_0 : i32, i32
  }
  func.func @transform_8(%arg0: i32) -> (i32, i32) {
    %c0_i32 = arith.constant 0 : i32
    %c0_i32_0 = arith.constant 0 : i32
    return %arg0, %c0_i32 : i32, i32
  }
}

</mosaic_0001>

<bundles_post_ra>
// kernel: tpu_custom_call.1
= control target key start
LH: loop header
LB: loop body
LE: loop exit
PB: predicated region body
PF: predicated region fallthrough
CT: control target
= control target key end

     0   :  { %s5167_s0 = inlined_call_operand.hbm [shape: bf16[192,400], index: 0, kind: input, shape index: {}]   ;;  %s5168_s1 = inlined_call_operand.vmem [shape: f32[192,1], index: 1, kind: input, shape index: {}]   ;;  %s5169_s2 = inlined_call_operand.vmem [shape: f32[1,400], index: 2, kind: input, shape index: {}]   ;;  %s5170_s3 = inlined_call_operand.hbm [shape: bf16[400,200], index: 3, kind: input, shape index: {}]   ;;  %s5171_s4 = inlined_call_operand.vmem [shape: f32[1,200], index: 4, kind: input, shape index: {}]   ;;  %s5172_s5 = inlined_call_operand.vmem [shape: f32[1,200], index: 5, kind: input, shape index: {}]   ;;  %s5173_s6 = inlined_call_operand.vmem [shape: f32[1,200], index: 6, kind: input, shape index: {}]   ;;  %s5174_s7 = inlined_call_operand.<no memory space> [shape: f32[1,1], index: 7, kind: input, shape index: {}]   ;;  %s5175_s8 = inlined_call_operand.hbm [shape: f32[24,400], index: 8, kind: output, shape index: {}]  }
   0x1   :  { %5217 = sst [smem:[#allocation34_spill]] %s5170_s3  ;;  %v13_v0 = vstv %s5174_s7 }
   0x2   :  { %14 = vst [vmem:[#allocation2] sm:$0x1] %v13_v0 }
   0x3   :  { %15 = vsyncpa [#allocation4], 0 }
   0x4   :  { %17 = vsyncpa [#allocation4 + $0x1], 0 }
   0x5   :  { %18 = vsyncpa [#allocation7], 0 }
   0x6   :  { %19 = vsyncpa [#allocation5], 0 }
   0x7   :  { %21 = vsyncpa [#allocation5 + $0x1], 0  ;;  %s3713_s29 = smov 0   ;;  %s3715_s30 = smov 0  }
   0x8   :  { %s3717_s9 = smov 0   ;;  %s3719_s10 = smov 0  }
   0x9 LB: > { %s3734_s7 = sadd.s32 4294967295, %s3653_s10   ;;  %s3026_s11 = sadd.s32 4294967294, %s3653_s10   ;;  %s3653_s10 = sphi %s3719_s10, %s5340_s10   ;;  %s3649_s9 = sphi %s3717_s9, %s5339_s9   ;;  %s3645_s30 = sphi %s3715_s30, %s5338_s30   ;;  %s3641_s29 = sphi %s3713_s29, %s5337_s29  }
   0xa   : > { %s3738_s12 = sadd.s32 1, %s3653_s10   ;;  %s34_s13 = sadd.s32 1, %s3649_s9 }
   0xb   : > { %s31_s14 = ssub.s32 %s3653_s10, %s3738_s12  ;;  %p41_p0 = scmp.ne.s32.totalorder %s3649_s9, %s3645_s30 }
   0xc   : > { %p32_p1 = scmp.eq.s32.totalorder %s31_s14, 0  ;;  %p42_p2 = scmp.eq.s32.totalorder %s3653_s10, 0 }
   0xd   : > { %p47_p3 = scmp.ne.s32.totalorder %s3645_s30, %s3641_s29  ;;  %p5176_p4 = scmp.eq.s32.totalorder %s3734_s7, 0 }
   0xe   : > { %s3750_s15 = scalar_select %p32_p1, %s3649_s9, %s34_s13  }
   0xf   : > { %p3752_p5 = por %p42_p2, %p41_p0  ;;  %p3758_p6 = por %p5176_p4, %p47_p3 }
  0x10   : > { %p223_p7 = scmp.eq.s32.totalorder %s3734_s7, 1  ;;  %p229_p8 = scmp.eq.s32.totalorder %s3026_s11, 1 }
  0x11   : > { %s5218_s16 = scalar_select %p3752_p5, 1, 0 }
  0x12   : > { %s5219_s17 = scalar_select %p3758_p6, 1, 0 }
  0x13   : > { %p3027_p9 = scmp.ge.s32.totalorder %s3653_s10, 1  ;;  %p236_p10 = scmp.lt.s32.totalorder %s3653_s10, 3 }
  0x14   : > { %p3765_p11 = por %p223_p7, %p41_p0  ;;  %p3769_p12 = por %p229_p8, %p47_p3 }
  0x15   : > { %p3773_p13 = pnand %p3027_p9, %p236_p10  ;;  %s3655_s21 = smov [#allocation6]  }
  0x16   : > { %s5220_s18 = scalar_select %p3765_p11, 1, 0 }
  0x17   : > { %s5221_s19 = scalar_select %p3769_p12, 1, 0 }
  0x18   : > { %s5222_s20 = scalar_select %p3773_p13, 1, 0 }
  0x19   : > { %p3191_p1 = pneg %p3773_p13  ;;  %s251_s22 = sshll.u32 %s3655_s21, 4  ;;  %s252_s22 = int_to_ptr.vmem [resolvable:$true] %s251_s22 }
  0x1a   : > { %s5224_s3 = sld [smem:[#allocation34_spill]] }
  0x1b   : > { %p3781_p2 = pnand %p3191_p1, %p5176_p4 }
  0x1d   : > { %p3529_p3 = pneg %p3781_p2 }
  0x20   : > { %s3527_s26 = scalar_lea.hbm %s5224_s3, 6400 }
  0x21   : > { %p3528_p0 = scmp.ne.s32.totalorder %s5224_s3, %s3527_s26  ;;  %p3534_p9 = scmp.lt.u32.totalorder %s3527_s26, %s5224_s3 }
  0x23   : > { %p3530_p7 = pnand %p3529_p3, %p3528_p0 }
  0x25   : > { %p3531_p8 = pneg %p3530_p7 }
  0x27   : > { %p3536_p10 = pnand %p3534_p9, %p3531_p8 }
  0x29   : > { %3539 = shalt.err (!%p3536_p10)
}
  0x2a   : > { %s3540_s14 = scalar_lea.vmem %s252_s22, 6400  ;;  %p3548_p11 = scmp.lt.s32.totalorder %s252_s22, %s252_s22 }
  0x2b   : > { %p3541_p1 = scmp.ne.s32.totalorder %s252_s22, %s3540_s14  ;;  %p3549_p6 = scmp.lt.s32.totalorder %s3540_s14, %s3540_s14 }
  0x2d   : > { %p3543_p4 = pnand %p3541_p1, %p3529_p3  ;;  %p3550_p13 = por %p3549_p6, %p3548_p11 }
  0x2f   : > { %p3544_p12 = pneg %p3543_p4 }
  0x31   : > { %p3551_p5 = pnand %p3550_p13, %p3544_p12 }
  0x33   : > { %3554 = shalt.err (!%p3551_p5)
}
  0x34   : > { %s3656_s21 = smov 128   ;;  %s3657_s24 = smov 8  }
  0x35   : > { %3194 = dma.hbm_to_vmem [thread:$0]  (!%p3781_p2), %s5224_s3, 6400, %s252_s22, [#allocation7], %s3656_s21, %s3656_s21, %s3657_s24  }
  0x36   : > { %p3029_p0 = scmp.ge.s32.totalorder %s3653_s10, 2 }
  0x37   : > { %p5225_p4 = scmp.ne.s32.totalorder (!%p3029_p0), %s5218_s16, 0 }
  0x38   : > { %273 = sbr.rel (%p3029_p0) target bundleno = 98 (0x62), region = 40 }
  0x3f   : > { %276 = sbr.rel (!%p5225_p4) target bundleno = 98 (0x62), region = 44  ;;  %s277_s26 = sand.u32 (%p5225_p4), 1, %s3649_s9  }
  0x40   : > { %s3031_s28 = sshll.u32 (%p5225_p4), %s3653_s10, 4  ;;  %s3030_s11 = sshll.u32 (%p5225_p4), %s277_s26, 8 }
  0x41   : > { %s283_s13 = ssub.s32 (%p5225_p4), 24, %s3031_s28  ;;  %s3811_s14 = scalar_lea.sflag (%p5225_p4), [#allocation4], %s277_s26 }
  0x42   : > { %p284_p5 = scmp.lt.s32.totalorder (%p5225_p4), %s283_s13, 16  ;;  %s281_s21 = scalar_lea.vmem (%p5225_p4), [#allocation3], %s3030_s11 }
  0x46   : > { %s5342_s13 = smov (!%p284_p5, %s283_s13), 16 }
  0x47   : > { %s3808_s23 = sshll.u32 %s5342_s13, 8 }
  0x48   : > { %s289_s22 = ssub.s32 4096, %s3808_s23 }
  0x49   : > { %290 = vsyncadd %s3811_s14, %s289_s22  ;;  %p3034_p6 = scmp.ne.s32.totalorder %s3808_s23, 0  ;;  %s3149_s16 = sshll.u32 %s3653_s10, 12 }
  0x4a   : > { %s3819_s27 = scalar_lea.hbm %s5167_s0, %s3149_s16  ;;  %s296_s26 = sshll.u32 %s281_s21, 4  ;;  %s3821_s26 = int_to_ptr.vmem [resolvable:$true] %s296_s26 }
  0x4b   : > { %s3555_s28 = scalar_lea.hbm %s3819_s27, %s3808_s23  ;;  %s3559_s22 = scalar_lea.hbm %s5167_s0, 6144 }
  0x4c   : > { %p3556_p11 = scmp.ne.s32.totalorder %s3819_s27, %s3555_s28  ;;  %p3560_p2 = scmp.lt.u32.totalorder %s3819_s27, %s5167_s0 }
  0x4d   : > { %p3561_p3 = scmp.lt.u32.totalorder %s3559_s22, %s3555_s28  ;;  %p3563_p8 = scmp.lt.u32.totalorder %s3555_s28, %s3819_s27 }
  0x4e   : > { %p3557_p12 = pnand %p3556_p11, %p3034_p6 }
  0x4f   : > { %p3562_p7 = por %p3561_p3, %p3560_p2 }
  0x50   : > { %p3558_p13 = pneg %p3557_p12 }
  0x51   : > { %p3564_p9 = por %p3563_p8, %p3562_p7 }
  0x53   : > { %p3565_p10 = pnand %p3564_p9, %p3558_p13 }
  0x55   : > { %3568 = shalt.err (!%p3565_p10)
}
  0x56   : > { %s3569_s21 = scalar_lea.vmem %s3821_s26, %s3808_s23  ;;  %s3658_s16 = smov [#allocation3]  }
  0x57   : > { %p3570_p1 = scmp.ne.s32.totalorder %s3821_s26, %s3569_s21  ;;  %s3573_s25 = sshll.u32 %s3658_s16, 4  ;;  %s3574_s25 = int_to_ptr.vmem [resolvable:$false] %s3573_s25 }
  0x58   : > { %s3575_s3 = scalar_lea.vmem %s3574_s25, 8192  ;;  %p3576_p11 = scmp.lt.s32.totalorder %s3821_s26, %s3574_s25 }
  0x59   : > { %p3571_p4 = pnand %p3570_p1, %p3034_p6  ;;  %p3577_p12 = scmp.lt.s32.totalorder %s3575_s3, %s3569_s21 }
  0x5b   : > { %p3572_p5 = pneg %p3571_p4  ;;  %p3578_p2 = por %p3577_p12, %p3576_p11 }
  0x5d   : > { %p3579_p3 = pnand %p3578_p2, %p3572_p5 }
  0x5f   : > { %3582 = shalt.err (!%p3579_p3)
}
  0x60   : > { %s3659_s28 = smov 256   ;;  %s3660_s11 = smov 16  }
  0x61   : > { %302 = dma.hbm_to_vmem [thread:$0]  (%p3034_p6), %s3819_s27, %s3808_s23, %s3821_s26, %s3811_s14, %s3659_s28, %s3659_s28, %s3660_s11  }
  0x62 PF: > { %p5226_p13 = scmp.ne.s32.totalorder %s5222_s20, 0 }
  0x64   : > { %325 = sbr.rel (%p5226_p13) target bundleno = 952 (0x3b8), region = 52 }
  0x6b   : > { %s3851_s13 = sand.u32 1, %s3645_s30   ;;  %p5227_p7 = scmp.ne.s32.totalorder %s5219_s17, 0 }
  0x6c   : > { %s3040_s22 = sshll.u32 %s3851_s13, 8  ;;  %s328_s24 = scalar_lea.sflag [#allocation4], %s3851_s13 }
  0x6d   : > { %s3855_s21 = scalar_lea.vmem [#allocation3], %s3040_s22 }
  0x6e   : > { %3628 = dma.done.wait (%p5227_p7), %s328_s24, 4096  }
  0x6f   : > { %3630 = vsyncadd (%p5227_p7), %s328_s24, 4294963200  ;;  %p5228_p6 = scmp.eq.s32.totalorder %s3734_s7, 0 }
  0x71   : > { %3632 = dma.done.wait (%p5228_p6), [#allocation7], 6400   ;;  %p5229_p8 = pmov %p5228_p6 }
  0x72   : > { %v3661_v1 = vmov 0   ;;  %v3244_v2 = vld [vmem:[#allocation6 + $0x4] ss:$8 sps:$4 sm:$0xff]   ;;  %v3246_v3 = vld [vmem:[#allocation6] ss:$8 sps:$4 sm:$0xff]   ;;  %s3043_s17 = sshll.u32 %s3734_s7, 4 }
  0x73   : > { %3634 = vsyncadd (%p5229_p8), [#allocation7], 4294960896  ;;  %3242 = vset.pattern.permute.xlu0 %v3661_v1  ;;  %3243 = vset.pattern.permute.xlu1 %v3661_v1  ;;  %v3247_v4 = vld [vmem:[#allocation6 + $0x14] ss:$8 sps:$4 sm:$0xff]   ;;  %v3249_v5 = vld [vmem:[#allocation6 + $0x10] ss:$8 sps:$4 sm:$0xff]  }
  0x74   : > { %929 = vmatprep.subr.bf16.mxu1 %v3244_v2  ;;  %v3250_v6 = vld [vmem:[#allocation6 + $0x24] ss:$8 sps:$4 sm:$0xff]   ;;  %v3252_v7 = vld [vmem:[#allocation6 + $0x20] ss:$8 sps:$4 sm:$0xff]   ;;  %v3253_v8 = vld [vmem:[#allocation6 + $0x34] ss:$8 sps:$4 sm:$0xff]  }
  0x75   : > { %930 = vmatpush1.bf16.msra.mxu1 %v3246_v3  ;;  %v3265_v9 = vld [vmem:[#allocation6 + $0x104] ss:$8 sps:$4 sm:$0xff]   ;;  %v3267_v10 = vld [vmem:[#allocation6 + $0x100] ss:$8 sps:$4 sm:$0xff]   ;;  %v3255_v11 = vld [vmem:[#allocation6 + $0x30] ss:$8 sps:$4 sm:$0xff]  }
  0x76   : > { %931 = vmatprep.subr.bf16.mxu1 %v3247_v4  ;;  %v3256_v12 = vld [vmem:[#allocation6 + $0x44] ss:$8 sps:$4 sm:$0xff]   ;;  %1042 = vmatprep.subr.bf16.mxu0 %v3265_v9  ;;  %v3271_v13 = vld [vmem:[#allocation6 + $0x114] ss:$8 sps:$4 sm:$0xff]   ;;  %v3273_v14 = vld [vmem:[#allocation6 + $0x110] ss:$8 sps:$4 sm:$0xff]  }
  0x77   : > { %1043 = vmatpush1.bf16.msra.mxu0 %v3267_v10  ;;  %v3258_v15 = vld [vmem:[#allocation6 + $0x40] ss:$8 sps:$4 sm:$0xff]   ;;  %v3277_v16 = vld [vmem:[#allocation6 + $0x124] ss:$8 sps:$4 sm:$0xff]   ;;  %v3259_v17 = vld [vmem:[#allocation6 + $0x54] ss:$8 sps:$4 sm:$0xff]  }
  0x78   : > { %1044 = vmatprep.subr.bf16.mxu0 %v3271_v13  ;;  %v3279_v18 = vld [vmem:[#allocation6 + $0x120] ss:$8 sps:$4 sm:$0xff]   ;;  %v3283_v19 = vld [vmem:[#allocation6 + $0x134] ss:$8 sps:$4 sm:$0xff]   ;;  %v3261_v20 = vld [vmem:[#allocation6 + $0x50] ss:$8 sps:$4 sm:$0xff]  }
  0x79   : > { %932 = vmatpush1.bf16.msra.mxu1 %v3249_v5  ;;  %v3262_v21 = vld [vmem:[#allocation6 + $0x64] ss:$8 sps:$4 sm:$0xff]   ;;  %v3285_v22 = vld [vmem:[#allocation6 + $0x130] ss:$8 sps:$4 sm:$0xff]   ;;  %v3264_v24 = vld [vmem:[#allocation6 + $0x60] ss:$8 sps:$4 sm:$0xff]  }
  0x7a   : > { %933 = vmatprep.subr.bf16.mxu1 %v3250_v6  ;;  %v3289_v23 = vld [vmem:[#allocation6 + $0x144] ss:$8 sps:$4 sm:$0xff]   ;;  %v3268_v25 = vld [vmem:[#allocation6 + $0x74] ss:$8 sps:$4 sm:$0xff]   ;;  %v3291_v26 = vld [vmem:[#allocation6 + $0x140] ss:$8 sps:$4 sm:$0xff]  }
  0x7b   : > { %1045 = vmatpush1.bf16.msra.mxu0 %v3273_v14  ;;  %v3295_v27 = vld [vmem:[#allocation6 + $0x154] ss:$8 sps:$4 sm:$0xff]   ;;  %v3270_v28 = vld [vmem:[#allocation6 + $0x70] ss:$8 sps:$4 sm:$0xff]   ;;  %v3274_v29 = vld [vmem:[#allocation6 + $0x84] ss:$8 sps:$4 sm:$0xff]  }
  0x7c   : > { %1046 = vmatprep.subr.bf16.mxu0 %v3277_v16  ;;  %v3297_v30 = vld [vmem:[#allocation6 + $0x150] ss:$8 sps:$4 sm:$0xff]   ;;  %v3301_v31 = vld [vmem:[#allocation6 + $0x164] ss:$8 sps:$4 sm:$0xff]   ;;  %p3866_p9 = scmp.lt.s32.totalorder %s3043_s17, 23  ;;  %vm904_vm0 = vcmask 130048  }
  0x7d   : > { %934 = vmatpush1.bf16.msra.mxu1 %v3252_v7  ;;  %v3276_v32 = vld [vmem:[#allocation6 + $0x80] ss:$8 sps:$4 sm:$0xff]   ;;  %v3280_v33 = vld [vmem:[#allocation6 + $0x94] ss:$8 sps:$4 sm:$0xff]   ;;  %v3282_v41 = vld [vmem:[#allocation6 + $0x90] ss:$8 sps:$4 sm:$0xff]  }
  0x7e   : > { %935 = vmatprep.subr.bf16.mxu1 %v3253_v8  ;;  %v3303_v34 = vld [vmem:[#allocation6 + $0x160] ss:$8 sps:$4 sm:$0xff]   ;;  %v407_v36 = vld [vmem:[%s3855_s21 + $0x18] sm:$0xff]  ;;  %v3876_v40 = vld [vmem:[%s3855_s21 + $0x10] sm:$0xff]  ;;  %s5344_s17 = smov (!%p3866_p9, %s3043_s17), 23  ;;  %vm1431_vm1 = vcmask 588800  }
  0x7f   : > { %1047 = vmatpush1.bf16.msra.mxu0 %v3279_v18  ;;  %v405_v35 = vld [vmem:[%s3855_s21 + $0x8] sm:$0xff]  ;;  %v3307_v37 = vld [vmem:[#allocation6 + $0x174] ss:$8 sps:$4 sm:$0xff]   ;;  %v3873_v39 = vld [vmem:[%s3855_s21] sm:$0xff]  ;;  %s3044_s23 = sshll.u32 %s5344_s17, 3  ;;  %vm1551_vm2 = vcmask 7168  }
  0x80   : > { %1048 = vmatprep.subr.bf16.mxu0 %v3283_v19  ;;  %v3048_v38 = vcombine.high %v405_v35, %v407_v36  ;;  %v3046_v42 = vcombine.high %v3873_v39, %v3876_v40  ;;  %v3286_v43 = vld [vmem:[#allocation6 + $0xa4] ss:$8 sps:$4 sm:$0xff]   ;;  %v3309_v44 = vld [vmem:[#allocation6 + $0x170] ss:$8 sps:$4 sm:$0xff]   ;;  %v3288_v46 = vld [vmem:[#allocation6 + $0xa0] ss:$8 sps:$4 sm:$0xff]   ;;  %s3886_s26 = scalar_lea.vmem %s5168_s1, %s3044_s23  ;;  %v3047_v53 = vcombine.low %v405_v35, %v407_v36  ;;  %v3045_v18 = vcombine.low %v3873_v39, %v3876_v40 }
  0x81   : > { %936 = vmatpush1.bf16.msra.mxu1 %v3255_v11  ;;  %v3313_v45 = vld [vmem:[#allocation6 + $0x184] ss:$8 sps:$4 sm:$0xff]   ;;  %v3292_v47 = vld [vmem:[#allocation6 + $0xb4] ss:$8 sps:$4 sm:$0xff]   ;;  %v3315_v48 = vld [vmem:[#allocation6 + $0x180] ss:$8 sps:$4 sm:$0xff]  }
  0x82   : > { %937 = vmatprep.subr.bf16.mxu1 %v3256_v12  ;;  %3127 = vmatprep.mubr.msk.bf16.mxu0 %vm904_vm0, %v3048_v38  ;;  %v409_v49 = vld [vmem:[%s3855_s21 + $0x28] sm:$0xff]  ;;  %v411_v50 = vld [vmem:[%s3855_s21 + $0x38] sm:$0xff]  ;;  %v408_v14 = vld [vmem:[%s3855_s21 + $0x20] sm:$0xff]  ;;  %vm2775_vm3 = vcmask 1041409   ;;  %vm2778_vm4 = vcmask 1042434   ;;  %vm2781_vm5 = vcmask 1043459  }
  0x83   : > { %1049 = vmatpush1.bf16.msra.mxu0 %v3285_v22  ;;  %961 = vmatprep.mubr.bf16.mxu1 %v3046_v42  ;;  %v3294_v51 = vld [vmem:[#allocation6 + $0xb0] ss:$8 sps:$4 sm:$0xff]   ;;  %v3298_v52 = vld [vmem:[#allocation6 + $0xc4] ss:$8 sps:$4 sm:$0xff]   ;;  %v3052_v55 = vcombine.high %v409_v49, %v411_v50  ;;  %v3300_v58 = vld [vmem:[#allocation6 + $0xc0] ss:$8 sps:$4 sm:$0xff]   ;;  %v3051_v3 = vcombine.low %v409_v49, %v411_v50 }
  0x84   : > { %1050 = vmatprep.subr.bf16.mxu0 %v3289_v23  ;;  %v437_v54 = vld [vmem:[%s3886_s26 + $0x8] sm:$0xff]  ;;  %v438_v56 = vld [vmem:[%s3886_s26 + $0x10] sm:$0xff]  ;;  %v415_v62 = vld [vmem:[%s3855_s21 + $0x58] sm:$0xff]  ;;  %vm2784_vm6 = vcmask 1044484   ;;  %vm2787_vm7 = vcmask 1045509   ;;  %vm2790_vm8 = vcmask 1046534  }
  0x85   : > { %938 = vmatpush1.bf16.msra.mxu1 %v3258_v15  ;;  %1206 = vperm.xlu0 %3242, %v437_v54   ;;  %v445_v57 = vld [vmem:[%s3886_s26 + $0x48] sm:$0xff]  ;;  %v446_v59 = vld [vmem:[%s3886_s26 + $0x50] sm:$0xff]  ;;  %v436_v63 = vld [vmem:[%s3886_s26] sm:$0xff]  ;;  %vm2793_vm9 = vcmask 1047559   ;;  %s2910_s23 = scalar_lea.sflag [#allocation5], %s3851_s13  ;;  %p5335_p10 = scmp.ne.s32.totalorder %s5220_s18, 0 }
  0x86   : > { %939 = vmatprep.subr.bf16.mxu1 %v3259_v17  ;;  %1211 = vperm.xlu1 %3243, %v438_v56   ;;  %v3304_v60 = vld [vmem:[#allocation6 + $0xd4] ss:$8 sps:$4 sm:$0xff]   ;;  %v413_v61 = vld [vmem:[%s3855_s21 + $0x48] sm:$0xff]  ;;  %v3306_v0 = vld [vmem:[#allocation6 + $0xd0] ss:$8 sps:$4 sm:$0xff]   ;;  %s3137_s14 = sshll.u32 (%p5335_p10), %s3734_s7, 1 }
  0x87   : > { %1051 = vmatpush1.bf16.msra.mxu0 %v3291_v26  ;;  %v439_v1 = vld [vmem:[%s3886_s26 + $0x18] sm:$0xff]  ;;  %v3310_v2 = vld [vmem:[#allocation6 + $0xe4] ss:$8 sps:$4 sm:$0xff]   ;;  %v3056_v4 = vcombine.high %v413_v61, %v415_v62  ;;  %v3312_v6 = vld [vmem:[#allocation6 + $0xe0] ss:$8 sps:$4 sm:$0xff]   ;;  %v3055_v16 = vcombine.low %v413_v61, %v415_v62  ;;  %s2918_s27 = ssub.s32 (%p5335_p10), 3, %s3137_s14 }
  0x88   : > { %1052 = vmatprep.subr.bf16.mxu0 %v3295_v27  ;;  %v444_v5 = vld [vmem:[%s3886_s26 + $0x40] sm:$0xff]  ;;  %v447_v7 = vld [vmem:[%s3886_s26 + $0x58] sm:$0xff]  ;;  %v417_v9 = vld [vmem:[%s3855_s21 + $0x68] sm:$0xff]  ;;  %p2919_p1 = scmp.lt.s32.totalorder (%p5335_p10), %s2918_s27, 2 }
  0x89   : > { %940 = vmatpush1.bf16.msra.mxu1 %v3261_v20  ;;  %1246 = vperm.xlu0 %3242, %v445_v57   ;;  %v3316_v8 = vld [vmem:[#allocation6 + $0xf4] ss:$8 sps:$4 sm:$0xff]   ;;  %v3319_v12 = vld [vmem:[#allocation6 + $0xf0] ss:$8 sps:$4 sm:$0xff]   ;;  %v441_v19 = vld [vmem:[%s3886_s26 + $0x28] sm:$0xff] }
  0x8a   : > { %941 = vmatprep.subr.bf16.mxu1 %v3262_v21  ;;  %1251 = vperm.xlu1 %3243, %v446_v59   ;;  %v419_v10 = vld [vmem:[%s3855_s21 + $0x78] sm:$0xff]  ;;  %v410_v15 = vld [vmem:[%s3855_s21 + $0x30] sm:$0xff]  ;;  %v449_v21 = vld [vmem:[%s3886_s26 + $0x68] sm:$0xff] }
  0x8b   : > { %1053 = vmatpush1.bf16.msra.mxu0 %v3297_v30  ;;  %v440_v11 = vld [vmem:[%s3886_s26 + $0x20] sm:$0xff]  ;;  %v3060_v17 = vcombine.high %v417_v9, %v419_v10  ;;  %v3050_v20 = vcombine.high %v408_v14, %v410_v15  ;;  %v421_v22 = vld [vmem:[%s3855_s21 + $0x88] sm:$0xff]  ;;  %v414_v27 = vld [vmem:[%s3855_s21 + $0x50] sm:$0xff]  ;;  %v3049_v30 = vcombine.low %v408_v14, %v410_v15 }
  0x8c   : > { %1054 = vmatprep.subr.bf16.mxu0 %v3301_v31  ;;  %v448_v13 = vld [vmem:[%s3886_s26 + $0x60] sm:$0xff]  ;;  %v443_v31 = vld [vmem:[%s3886_s26 + $0x38] sm:$0xff]  ;;  %v429_v42 = vld [vmem:[%s3855_s21 + $0xc8] sm:$0xff] }
  0x8d   : > { %942 = vmatpush1.bf16.msra.mxu1 %v3264_v24  ;;  %1201 = vperm.xlu0 %3242, %v436_v63   ;;  %v423_v23 = vld [vmem:[%s3855_s21 + $0x98] sm:$0xff]  ;;  %v442_v24 = vld [vmem:[%s3886_s26 + $0x30] sm:$0xff]  ;;  %v412_v26 = vld [vmem:[%s3855_s21 + $0x40] sm:$0xff] }
  0x8e   : > { %943 = vmatprep.subr.bf16.mxu1 %v3268_v25  ;;  %1216 = vperm.xlu1 %3243, %v439_v1   ;;  %v450_v25 = vld [vmem:[%s3886_s26 + $0x70] sm:$0xff]  ;;  %v427_v35 = vld [vmem:[%s3855_s21 + $0xb8] sm:$0xff]  ;;  %v416_v36 = vld [vmem:[%s3855_s21 + $0x60] sm:$0xff]  ;;  %v3063_v38 = vcombine.low %v421_v22, %v423_v23  ;;  %v3053_v40 = vcombine.low %v412_v26, %v414_v27 }
  0x8f   : > { %1055 = vmatpush1.bf16.msra.mxu0 %v3303_v34  ;;  %v425_v34 = vld [vmem:[%s3855_s21 + $0xa8] sm:$0xff]  ;;  %v430_v59 = vld [vmem:[%s3855_s21 + $0xd0] sm:$0xff]  ;;  %v432_v63 = vld [vmem:[%s3855_s21 + $0xe0] sm:$0xff] }
  0x90   : > { %1056 = vmatprep.subr.bf16.mxu0 %v3307_v37  ;;  %v418_v37 = vld [vmem:[%s3855_s21 + $0x70] sm:$0xff]  ;;  %v3068_v39 = vcombine.high %v425_v34, %v427_v35  ;;  %v433_v50 = vld [vmem:[%s3855_s21 + $0xe8] sm:$0xff] }
  0x91   : > { %944 = vmatpush1.bf16.msra.mxu1 %v3270_v28  ;;  %1241 = vperm.xlu0 %3242, %v444_v5   ;;  %v3059_v28 = vcombine.low %v417_v9, %v419_v10  ;;  %v1157_v10 = vlaneseq }
  0x92   : > { %945 = vmatprep.subr.bf16.mxu1 %v3274_v29  ;;  %1256 = vperm.xlu1 %3243, %v447_v7   ;;  %v3064_v29 = vcombine.high %v421_v22, %v423_v23 }
  0x93   : > { %1057 = vmatpush1.bf16.msra.mxu0 %v3309_v44  ;;  %v420_v44 = vld [vmem:[%s3855_s21 + $0x80] sm:$0xff] }
  0x94   : > { %1058 = vmatprep.subr.bf16.mxu0 %v3313_v45  ;;  %v422_v45 = vld [vmem:[%s3855_s21 + $0x90] sm:$0xff] }
  0x95   : > { %946 = vmatpush1.bf16.msra.mxu1 %v3276_v32  ;;  %1221 = vperm.xlu0 %3242, %v440_v11   ;;  %v3054_v32 = vcombine.high %v412_v26, %v414_v27  ;;  %v3062_v49 = vcombine.high %v420_v44, %v422_v45  ;;  %v3061_v56 = vcombine.low %v420_v44, %v422_v45  ;;  %v1311_v26 = vld [vmem:[%s5172_s5] sm:$0x3] }
  0x96   : > { %947 = vmatprep.subr.bf16.mxu1 %v3280_v33  ;;  %1261 = vperm.xlu1 %3243, %v448_v13   ;;  %v451_v33 = vld [vmem:[%s3886_s26 + $0x78] sm:$0xff] }
  0x97   : > { %1059 = vmatpush1.bf16.msra.mxu0 %v3315_v48  ;;  %v3057_v48 = vcombine.low %v416_v36, %v418_v37 }
  0x99   : > { %948 = vmatpush1.bf16.msra.mxu1 %v3282_v41  ;;  %1226 = vperm.xlu0 %3242, %v441_v19   ;;  %v3058_v41 = vcombine.high %v416_v36, %v418_v37 }
  0x9a   : > { %949 = vmatprep.subr.bf16.mxu1 %v3286_v43  ;;  %1075 = vmatmul.mubr.bf16.vlgmr.msra.gmra.mrb[0].mxu0 %v3047_v53  ;;  %v431_v43 = vld [vmem:[%s3855_s21 + $0xd8] sm:$0xff]  ;;  %v426_v53 = vld [vmem:[%s3855_s21 + $0xb0] sm:$0xff] }
  0x9b   : > { %3128 = vmatprep.mubr.msk.bf16.mxu0 %vm904_vm0, %v3052_v55  ;;  %1266 = vperm.xlu1 %3243, %v449_v21   ;;  %v3071_v54 = vcombine.low %v429_v42, %v431_v43 }
  0x9d   : > { %950 = vmatpush1.bf16.msra.mxu1 %v3288_v46  ;;  %1231 = vperm.xlu0 %3242, %v442_v24   ;;  %v3067_v46 = vcombine.low %v425_v34, %v427_v35 }
  0x9e   : > { %951 = vmatprep.subr.bf16.mxu1 %v3292_v47  ;;  %v3072_v47 = vcombine.high %v429_v42, %v431_v43 }
  0x9f   : > { %1271 = vperm.xlu1 %3243, %v450_v25  }
  0xa1   : > { %952 = vmatpush1.bf16.msra.mxu1 %v3294_v51  ;;  %1236 = vperm.xlu0 %3242, %v443_v31   ;;  %v435_v51 = vld [vmem:[%s3855_s21 + $0xf8] sm:$0xff] }
  0xa2   : > { %953 = vmatprep.subr.bf16.mxu1 %v3298_v52  ;;  %1085 = vmatmul.mubr.bf16.gmra.mrb[4].mxu0 %v3051_v3  ;;  %v424_v52 = vld [vmem:[%s3855_s21 + $0xa0] sm:$0xff]  ;;  %v3076_v55 = vcombine.high %v433_v50, %v435_v51 }
  0xa3   : > { %3129 = vmatprep.mubr.msk.bf16.mxu0 %vm904_vm0, %v3056_v4  ;;  %1276 = vperm.xlu1 %3243, %v451_v33   ;;  %v3066_v57 = vcombine.high %v424_v52, %v426_v53  ;;  %v3065_v61 = vcombine.low %v424_v52, %v426_v53 }
  0xa5   : > { %954 = vmatpush1.bf16.msra.mxu1 %v3300_v58  ;;  %v428_v58 = vld [vmem:[%s3855_s21 + $0xc0] sm:$0xff] }
  0xa6   : > { %955 = vmatprep.subr.bf16.mxu1 %v3304_v60  ;;  %v3075_v60 = vcombine.low %v433_v50, %v435_v51  ;;  %v3070_v62 = vcombine.high %v428_v58, %v430_v59  ;;  %v3069_v1 = vcombine.low %v428_v58, %v430_v59 }
  0xa9   : > { %956 = vmatpush1.bf16.msra.mxu1 %v3306_v0  ;;  %v434_v0 = vld [vmem:[%s3855_s21 + $0xf0] sm:$0xff] }
  0xaa   : > { %957 = vmatprep.subr.bf16.mxu1 %v3310_v2  ;;  %1095 = vmatmul.mubr.bf16.gmra.mrb[8].mxu0 %v3055_v16  ;;  %v3074_v2 = vcombine.high %v432_v63, %v434_v0  ;;  %v3073_v3 = vcombine.low %v432_v63, %v434_v0 }
  0xab   : > { %3130 = vmatprep.mubr.msk.bf16.mxu0 %vm904_vm0, %v3060_v17 }
  0xad   : > { %958 = vmatpush1.bf16.msra.mxu1 %v3312_v6 }
  0xae   : > { %959 = vmatprep.subr.bf16.mxu1 %v3316_v8 }
  0xb1   : > { %960 = vmatpush1.bf16.msra.mxu1 %v3319_v12  ;;  %v3943_v12 = vshrl.u32 %v1157_v10, 7 }
  0xb2   : > { %1105 = vmatmul.mubr.bf16.gmra.mrb[12].mxu0 %v3059_v28 }
  0xb3   : > { %3131 = vmatprep.mubr.msk.bf16.mxu0 %vm904_vm0, %v3064_v29  ;;  %v3946_v17 = vsub.s32 0, %v3943_v12  ;;  %v3952_v19 = vsub.s32 1, %v3943_v12 }
  0xb4   : > { %962 = vmatmul.mubr.bf16.vlgmr.msra.gmra.mrb[0].mxu1 %v3045_v18  ;;  %v1155_v18 = vld [vmem:[%s5171_s4] sm:$0x3] }
  0xb5   : > { %971 = vmatprep.mubr.bf16.mxu1 %v3050_v20  ;;  %v3959_v23 = vrot.slane %v1155_v18, %v3946_v17  ;;  %v3967_v27 = vrot.slane %v1155_v18, %v3952_v19  ;;  %v3975_v35 = vrot.slane %v1311_v26, %v3946_v17 }
  0xba   : > { %1115 = vmatmul.mubr.bf16.gmra.mrb[16].mxu0 %v3063_v38 }
  0xbb   : > { %3132 = vmatprep.mubr.msk.bf16.mxu0 %vm904_vm0, %v3068_v39  ;;  %v3979_v39 = vrot.slane %v1311_v26, %v3952_v19 }
  0xbc   : > { %972 = vmatmul.mubr.bf16.gmra.mrb[4].mxu1 %v3049_v30 }
  0xbd   : > { %981 = vmatprep.mubr.bf16.mxu1 %v3054_v32 }
  0xc2   : > { %1125 = vmatmul.mubr.bf16.gmra.mrb[20].mxu0 %v3067_v46 }
  0xc3   : > { %3133 = vmatprep.mubr.msk.bf16.mxu0 %vm904_vm0, %v3072_v47 }
  0xc4   : > { %982 = vmatmul.mubr.bf16.gmra.mrb[8].mxu1 %v3053_v40 }
  0xc5   : > { %991 = vmatprep.mubr.bf16.mxu1 %v3058_v41 }
  0xca   : > { %1135 = vmatmul.mubr.bf16.gmra.mrb[24].mxu0 %v3071_v54 }
  0xcb   : > { %3134 = vmatprep.mubr.msk.bf16.mxu0 %vm904_vm0, %v3076_v55 }
  0xcc   : > { %992 = vmatmul.mubr.bf16.gmra.mrb[12].mxu1 %v3057_v48 }
  0xcd   : > { %1001 = vmatprep.mubr.bf16.mxu1 %v3062_v49 }
  0xd2   : > { %1145 = vmatmul.mubr.bf16.gmra.mrb[28].mxu0 %v3075_v60 }
  0xd4   : > { %1002 = vmatmul.mubr.bf16.gmra.mrb[16].mxu1 %v3061_v56 }
  0xd5   : > { %1011 = vmatprep.mubr.bf16.mxu1 %v3066_v57 }
  0xdc   : > { %1012 = vmatmul.mubr.bf16.gmra.mrb[20].mxu1 %v3065_v61 }
  0xdd   : > { %1021 = vmatprep.mubr.bf16.mxu1 %v3070_v62 }
  0xe4   : > { %1022 = vmatmul.mubr.bf16.gmra.mrb[24].mxu1 %v3069_v1 }
  0xe5   : > { %1031 = vmatprep.mubr.bf16.mxu1 %v3074_v2 }
  0xec   : > { %1032 = vmatmul.mubr.bf16.gmra.mrb[28].mxu1 %v3073_v3 }
 0x104   : > { %v1207_v4 = vpop.permute.xlu0 %1206 }
 0x105   : > { %v1212_v20 = vpop.permute.xlu1 %1211 }
 0x108   : > { %v3941_v9 = vpop.permute.xlu0 %1246 }
 0x109   : > { %v3982_v43 = vpop.permute.xlu1 %1251 }
 0x10c   : > { %v1202_v15 = vpop.permute.xlu0 %1201 }
 0x110   : > { %v3956_v22 = vpop.permute.xlu0 %1241 }
 0x114   : > { %v3988_v48 = vpop.permute.xlu0 %1221 }
 0x16d   : > { %v1076_v5 = vpop.f32.mrb[0].mxu0 }
 0x16e   : > { %v1078_v6 = vpop.f32.mrb[1].mxu0 }
 0x16f   : > { %v1080_v7 = vpop.f32.mrb[2].mxu0 }
 0x170   : > { %v1082_v8 = vpop.f32.mrb[3].mxu0 }
 0x175   : > { %v1086_v11 = vpop.f32.mrb[4].mxu0 }
 0x176   : > { %v1088_v13 = vpop.f32.mrb[5].mxu0 }
 0x177   : > { %v1090_v14 = vpop.f32.mrb[6].mxu0 }
 0x178   : > { %v1092_v16 = vpop.f32.mrb[7].mxu0 }
 0x17d   : > { %v3954_v21 = vpop.f32.mrb[8].mxu0 }
 0x17e   : > { %v3961_v24 = vpop.f32.mrb[9].mxu0 }
 0x17f   : > { %v3969_v28 = vpop.f32.mrb[10].mxu0 }
 0x180   : > { %v3971_v31 = vpop.f32.mrb[11].mxu0 }
 0x185   : > { %v3985_v46 = vpop.f32.mrb[12].mxu0 }
 0x186   : > { %v3990_v50 = vpop.f32.mrb[13].mxu0 }
 0x187   : > { %v963_v25 = vpop.f32.mrb[0].mxu1  ;;  %v3993_v54 = vpop.f32.mrb[14].mxu0 }
 0x188   : > { %v1077_v29 = vadd.f32 %v1076_v5, %v963_v25  ;;  %v965_v30 = vpop.f32.mrb[1].mxu1  ;;  %v3996_v58 = vpop.f32.mrb[15].mxu0 }
 0x189   : > { %v1079_v32 = vadd.f32 %v1078_v6, %v965_v30  ;;  %v967_v33 = vpop.f32.mrb[2].mxu1  ;;  %v1217_v5 = vpop.permute.xlu1 %1216 }
 0x18a   : > { %v1167_v34 = vsub.f32 %v1077_v29, %v3959_v23  ;;  %v1081_v36 = vadd.f32 %v1080_v7, %v967_v33  ;;  %v969_v37 = vpop.f32.mrb[3].mxu1 }
 0x18b   : > { %v1168_v38 = vsub.f32 %v1079_v32, %v3967_v27  ;;  %v1083_v40 = vadd.f32 %v1082_v8, %v969_v37  ;;  %v1387_v8 = vld [vmem:[%s5173_s6] sm:$0x3] }
 0x18c   : > { %v1279_v41 = vmul.f32 %v1202_v15, %v1167_v34  ;;  %v1169_v42 = vsub.f32 %v1081_v36, %v3959_v23  ;;  %v4017_v32 = vrot.slane %v1387_v8, %v3952_v19 }
 0x18d   : > { %v1280_v44 = vmul.f32 %v1202_v15, %v1168_v38  ;;  %v1170_v45 = vsub.f32 %v1083_v40, %v3967_v27  ;;  %v4006_v10 = vpop.f32.mrb[16].mxu0  ;;  %v4024_v38 = vrot.slane %v1387_v8, %v3946_v17 }
 0x18e   : > { %v1323_v47 = vadd.f32 %v3975_v35, %v1279_v41  ;;  %v1281_v49 = vmul.f32 %v1207_v4, %v1169_v42  ;;  %v4009_v15 = vpop.f32.mrb[17].mxu0 }
 0x18f   : > { %v1324_v51 = vadd.f32 %v3979_v39, %v1280_v44  ;;  %v1282_v52 = vmul.f32 %v1207_v4, %v1170_v45  ;;  %v973_v53 = vpop.f32.mrb[4].mxu1  ;;  %v4012_v26 = vpop.f32.mrb[18].mxu0 }
 0x190   : > { %3351 = vtanh.f32 %v1323_v47  ;;  %v1325_v55 = vadd.f32 %v3975_v35, %v1281_v49  ;;  %v1087_v56 = vadd.f32 %v1086_v11, %v973_v53  ;;  %v975_v57 = vpop.f32.mrb[5].mxu1  ;;  %v1227_v11 = vpop.permute.xlu0 %1226 }
 0x191   : > { %3353 = vtanh.f32 %v1324_v51  ;;  %v1326_v59 = vadd.f32 %v3979_v39, %v1282_v52  ;;  %v1089_v60 = vadd.f32 %v1088_v13, %v975_v57  ;;  %v977_v61 = vpop.f32.mrb[6].mxu1  ;;  %v4019_v33 = vpop.f32.mrb[19].mxu0 }
 0x192   : > { %3355 = vtanh.f32 %v1325_v55  ;;  %v1171_v62 = vsub.f32 %v1087_v56, %v3959_v23  ;;  %v1091_v63 = vadd.f32 %v1090_v14, %v977_v61  ;;  %v979_v0 = vpop.f32.mrb[7].mxu1 }
 0x193   : > { %3357 = vtanh.f32 %v1326_v59  ;;  %v1172_v1 = vsub.f32 %v1089_v60, %v3967_v27  ;;  %v1093_v2 = vadd.f32 %v1092_v16, %v979_v0 }
 0x194   : > { %v1283_v3 = vmul.f32 %v1212_v20, %v1171_v62  ;;  %v1173_v4 = vsub.f32 %v1091_v63, %v3959_v23  ;;  %v1232_v59 = vpop.permute.xlu0 %1231 }
 0x195   : > { %v1284_v6 = vmul.f32 %v1212_v20, %v1172_v1  ;;  %v1174_v7 = vsub.f32 %v1093_v2, %v3967_v27  ;;  %v4036_v57 = vpop.f32.mrb[20].mxu0 }
 0x196   : > { %v1327_v13 = vadd.f32 %v3975_v35, %v1283_v3  ;;  %v1285_v14 = vmul.f32 %v1217_v5, %v1173_v4  ;;  %v4041_v63 = vpop.f32.mrb[21].mxu0 }
 0x197   : > { %v1328_v16 = vadd.f32 %v3979_v39, %v1284_v6  ;;  %v1286_v18 = vmul.f32 %v1217_v5, %v1174_v7  ;;  %v983_v25 = vpop.f32.mrb[8].mxu1  ;;  %v4045_v4 = vpop.f32.mrb[22].mxu0 }
 0x198   : > { %3359 = vtanh.f32 %v1327_v13  ;;  %v1329_v20 = vadd.f32 %v3975_v35, %v1285_v14  ;;  %v1097_v29 = vadd.f32 %v3954_v21, %v983_v25  ;;  %v985_v30 = vpop.f32.mrb[9].mxu1  ;;  %v4050_v13 = vpop.f32.mrb[23].mxu0 }
 0x199   : > { %3361 = vtanh.f32 %v1328_v16  ;;  %v1330_v34 = vadd.f32 %v3979_v39, %v1286_v18  ;;  %v1099_v36 = vadd.f32 %v3961_v24, %v985_v30  ;;  %v987_v37 = vpop.f32.mrb[10].mxu1 }
 0x19a   : > { %v3352_v40 = vpop.eup %3351  ;;  %3363 = vtanh.f32 %v1329_v20  ;;  %v1175_v41 = vsub.f32 %v1097_v29, %v3959_v23  ;;  %v1101_v21 = vadd.f32 %v3969_v28, %v987_v37  ;;  %v989_v42 = vpop.f32.mrb[11].mxu1 }
 0x19b   : > { %v3354_v44 = vpop.eup %3353  ;;  %3365 = vtanh.f32 %v1330_v34  ;;  %v1176_v45 = vsub.f32 %v1099_v36, %v3967_v27  ;;  %v1103_v47 = vadd.f32 %v3971_v31, %v989_v42  ;;  %v1399_v56 = vmul.f32 %v3352_v40, %v4024_v38  ;;  %v1237_v42 = vpop.permute.xlu0 %1236 }
 0x19c   : > { %v3356_v49 = vpop.eup %3355  ;;  %v1287_v24 = vmul.f32 %v3988_v48, %v1175_v41  ;;  %v1177_v51 = vsub.f32 %v1101_v21, %v3959_v23  ;;  %v1400_v52 = vmul.f32 %v3354_v44, %v4017_v32 }
 0x19d   : > { %v3358_v53 = vpop.eup %3357  ;;  %v1288_v55 = vmul.f32 %v3988_v48, %v1176_v45  ;;  %v1178_v28 = vsub.f32 %v1103_v47, %v3967_v27  ;;  %v1401_v3 = vmul.f32 %v3356_v49, %v4024_v38  ;;  %v4062_v47 = vpop.f32.mrb[24].mxu0 }
 0x19e   : > { %v1331_v31 = vadd.f32 %v3975_v35, %v1287_v24  ;;  %v1289_v60 = vmul.f32 %v1227_v11, %v1177_v51  ;;  %v1432_v61 = vsel %vm1431_vm1, %v1400_v52, 0.0  ;;  %v1402_v62 = vmul.f32 %v3358_v53, %v4017_v32  ;;  %v4067_v52 = vpop.f32.mrb[25].mxu0 }
 0x19f   : > { %v1332_v0 = vadd.f32 %v3979_v39, %v1288_v55  ;;  %v1290_v1 = vmul.f32 %v1227_v11, %v1178_v28  ;;  %v993_v48 = vpop.f32.mrb[12].mxu1  ;;  %v1433_v2 = vadd.f32 %v1432_v61, %v1399_v56 }
 0x1a0   : > { %3367 = vtanh.f32 %v1331_v31  ;;  %v1333_v5 = vadd.f32 %v3975_v35, %v1289_v60  ;;  %v1107_v6 = vadd.f32 %v3985_v46, %v993_v48  ;;  %v995_v7 = vpop.f32.mrb[13].mxu1  ;;  %v1436_v8 = vsel %vm1431_vm1, %v1402_v62, 0.0  ;;  %v4071_v31 = vpop.f32.mrb[26].mxu0 }
 0x1a1   : > { %3369 = vtanh.f32 %v1332_v0  ;;  %v1334_v14 = vadd.f32 %v3979_v39, %v1290_v1  ;;  %v1109_v11 = vadd.f32 %v3990_v50, %v995_v7  ;;  %1434 = vadd.xlane.f32.xlu1 %v1433_v2  ;;  %v997_v16 = vpop.f32.mrb[14].mxu1  ;;  %v1437_v18 = vadd.f32 %v1436_v8, %v1401_v3  ;;  %v4076_v1 = vpop.f32.mrb[27].mxu0 }
 0x1a2   : > { %v3360_v25 = vpop.eup %3359  ;;  %3371 = vtanh.f32 %v1333_v5  ;;  %v1179_v20 = vsub.f32 %v1107_v6, %v3959_v23  ;;  %v1111_v29 = vadd.f32 %v3993_v54, %v997_v16  ;;  %v999_v46 = vpop.f32.mrb[15].mxu1 }
 0x1a3   : > { %v3362_v30 = vpop.eup %3361  ;;  %3373 = vtanh.f32 %v1334_v14  ;;  %v1180_v34 = vsub.f32 %v1109_v11, %v3967_v27  ;;  %v1113_v36 = vadd.f32 %v3996_v58, %v999_v46  ;;  %1438 = vadd.xlane.f32.xlu0 %v1437_v18  ;;  %v1403_v54 = vmul.f32 %v3360_v25, %v4024_v38  ;;  %v1257_v46 = vpop.permute.xlu1 %1256 }
 0x1a4   : > { %v3364_v37 = vpop.eup %3363  ;;  %v1291_v40 = vmul.f32 %v1232_v59, %v1179_v20  ;;  %v1181_v50 = vsub.f32 %v1111_v29, %v3959_v23  ;;  %v1404_v41 = vmul.f32 %v3362_v30, %v4017_v32 }
 0x1a5   : > { %v3366_v21 = vpop.eup %3365  ;;  %v1292_v44 = vmul.f32 %v1232_v59, %v1180_v34  ;;  %v1182_v45 = vsub.f32 %v1113_v36, %v3967_v27  ;;  %v1405_v59 = vmul.f32 %v3364_v37, %v4024_v38  ;;  %v4090_v36 = vpop.f32.mrb[28].mxu0 }
 0x1a6   : > { %v1335_v49 = vadd.f32 %v3975_v35, %v1291_v40  ;;  %v1293_v24 = vmul.f32 %v1237_v42, %v1181_v50  ;;  %v1440_v58 = vsel %vm1431_vm1, %v1404_v41, 0.0  ;;  %v1406_v51 = vmul.f32 %v3366_v21, %v4017_v32  ;;  %v4096_v41 = vpop.f32.mrb[29].mxu0 }
 0x1a7   : > { %v1336_v53 = vadd.f32 %v3979_v39, %v1292_v44  ;;  %v1294_v55 = vmul.f32 %v1237_v42, %v1182_v45  ;;  %v1003_v28 = vpop.f32.mrb[16].mxu1  ;;  %v1441_v56 = vadd.f32 %v1440_v58, %v1403_v54  ;;  %v4101_v54 = vpop.f32.mrb[30].mxu0 }
 0x1a8   : > { %3375 = vtanh.f32 %v1335_v49  ;;  %v1337_v60 = vadd.f32 %v3975_v35, %v1293_v24  ;;  %v1117_v61 = vadd.f32 %v4006_v10, %v1003_v28  ;;  %v1005_v62 = vpop.f32.mrb[17].mxu1  ;;  %v1444_v0 = vsel %vm1431_vm1, %v1406_v51, 0.0 }
 0x1a9   : > { %3377 = vtanh.f32 %v1336_v53  ;;  %v1338_v48 = vadd.f32 %v3979_v39, %v1294_v55  ;;  %v1119_v2 = vadd.f32 %v4009_v15, %v1005_v62  ;;  %1442 = vadd.xlane.f32.xlu0 %v1441_v56  ;;  %v1007_v3 = vpop.f32.mrb[18].mxu1  ;;  %v1445_v5 = vadd.f32 %v1444_v0, %v1405_v59  ;;  %v4106_v53 = vpop.f32.mrb[31].mxu0 }
 0x1aa   : > { %v3368_v6 = vpop.eup %3367  ;;  %3379 = vtanh.f32 %v1337_v60  ;;  %v1183_v7 = vsub.f32 %v1117_v61, %v3959_v23  ;;  %v1121_v8 = vadd.f32 %v4012_v26, %v1007_v3  ;;  %v1009_v10 = vpop.f32.mrb[19].mxu1 }
 0x1ab   : > { %v3370_v14 = vpop.eup %3369  ;;  %3381 = vtanh.f32 %v1338_v48  ;;  %v1184_v11 = vsub.f32 %v1119_v2, %v3967_v27  ;;  %v1123_v16 = vadd.f32 %v4019_v33, %v1009_v10  ;;  %v1407_v34 = vmul.f32 %v3368_v6, %v4024_v38  ;;  %v1262_v0 = vpop.permute.xlu1 %1261 }
 0x1ac   : > { %v3372_v18 = vpop.eup %3371  ;;  %v1295_v25 = vmul.f32 %v3956_v22, %v1183_v7  ;;  %v1185_v15 = vsub.f32 %v1121_v8, %v3959_v23  ;;  %v1408_v20 = vmul.f32 %v3370_v14, %v4017_v32 }
 0x1ad   : > { %v3374_v29 = vpop.eup %3373  ;;  %v1296_v30 = vmul.f32 %v3956_v22, %v1184_v11  ;;  %v1186_v26 = vsub.f32 %v1123_v16, %v3967_v27  ;;  %1446 = vadd.xlane.f32.xlu0 %v1445_v5  ;;  %v1409_v45 = vmul.f32 %v3372_v18, %v4024_v38 }
 0x1ae   : > { %v1339_v33 = vadd.f32 %v3975_v35, %v1295_v25  ;;  %v1297_v37 = vmul.f32 %v3941_v9, %v1185_v15  ;;  %v1448_v40 = vsel %vm1431_vm1, %v1408_v20, 0.0  ;;  %v1410_v50 = vmul.f32 %v3374_v29, %v4017_v32 }
 0x1af   : > { %v1340_v21 = vadd.f32 %v3979_v39, %v1296_v30  ;;  %v1298_v22 = vmul.f32 %v3941_v9, %v1186_v26  ;;  %v1013_v42 = vpop.f32.mrb[20].mxu1  ;;  %v1449_v44 = vadd.f32 %v1448_v40, %v1407_v34 }
 0x1b0   : > { %3383 = vtanh.f32 %v1339_v33  ;;  %v1341_v49 = vadd.f32 %v3975_v35, %v1297_v37  ;;  %v1127_v24 = vadd.f32 %v4036_v57, %v1013_v42  ;;  %v1015_v58 = vpop.f32.mrb[21].mxu1  ;;  %v1452_v51 = vsel %vm1431_vm1, %v1410_v50, 0.0  ;;  %v1267_v33 = vpop.permute.xlu1 %1266 }
 0x1b1   : > { %3385 = vtanh.f32 %v1340_v21  ;;  %v1342_v55 = vadd.f32 %v3979_v39, %v1298_v22  ;;  %v1129_v9 = vadd.f32 %v4041_v63, %v1015_v58  ;;  %1450 = vadd.xlane.f32.xlu1 %v1449_v44  ;;  %v1017_v28 = vpop.f32.mrb[22].mxu1  ;;  %v1453_v56 = vadd.f32 %v1452_v51, %v1409_v45 }
 0x1b2   : > { %v3376_v59 = vpop.eup %3375  ;;  %3387 = vtanh.f32 %v1341_v49  ;;  %v1187_v60 = vsub.f32 %v1127_v24, %v3959_v23  ;;  %v1131_v61 = vadd.f32 %v4045_v4, %v1017_v28  ;;  %v1019_v57 = vpop.f32.mrb[23].mxu1 }
 0x1b3   : > { %v3378_v62 = vpop.eup %3377  ;;  %3389 = vtanh.f32 %v1342_v55  ;;  %v1188_v48 = vsub.f32 %v1129_v9, %v3967_v27  ;;  %v1133_v2 = vadd.f32 %v4050_v13, %v1019_v57  ;;  %v1411_v10 = vmul.f32 %v3376_v59, %v4024_v38 }
 0x1b4   : > { %v3380_v3 = vpop.eup %3379  ;;  %v1299_v63 = vmul.f32 %v3982_v43, %v1187_v60  ;;  %v1189_v5 = vsub.f32 %v1131_v61, %v3959_v23  ;;  %v1412_v6 = vmul.f32 %v3378_v62, %v4017_v32 }
 0x1b5   : > { %v3382_v7 = vpop.eup %3381  ;;  %v1300_v8 = vmul.f32 %v3982_v43, %v1188_v48  ;;  %v1190_v4 = vsub.f32 %v1133_v2, %v3967_v27  ;;  %1454 = vadd.xlane.f32.xlu1 %v1453_v56  ;;  %v1413_v43 = vmul.f32 %v3380_v3, %v4024_v38 }
 0x1b6   : > { %v1343_v14 = vadd.f32 %v3975_v35, %v1299_v63  ;;  %v1301_v11 = vmul.f32 %v1257_v46, %v1189_v5  ;;  %v1456_v13 = vsel %vm1431_vm1, %v1412_v6, 0.0  ;;  %v1414_v16 = vmul.f32 %v3382_v7, %v4017_v32 }
 0x1b7   : > { %v1344_v18 = vadd.f32 %v3979_v39, %v1300_v8  ;;  %v1302_v25 = vmul.f32 %v1257_v46, %v1190_v4  ;;  %v1023_v15 = vpop.f32.mrb[24].mxu1  ;;  %v4124_v20 = vadd.f32 %v1456_v13, %v1411_v10 }
 0x1b8   : > { %3391 = vtanh.f32 %v1343_v14  ;;  %v1345_v29 = vadd.f32 %v3975_v35, %v1301_v11  ;;  %v1137_v30 = vadd.f32 %v4062_v47, %v1023_v15  ;;  %v1025_v26 = vpop.f32.mrb[25].mxu1  ;;  %v1460_v34 = vsel %vm1431_vm1, %v1414_v16, 0.0 }
 0x1b9   : > { %3393 = vtanh.f32 %v1344_v18  ;;  %v1346_v37 = vadd.f32 %v3979_v39, %v1302_v25  ;;  %v1139_v40 = vadd.f32 %v4067_v52, %v1025_v26  ;;  %v1027_v46 = vpop.f32.mrb[26].mxu1  ;;  %v4132_v50 = vadd.f32 %v1460_v34, %v1413_v43 }
 0x1ba   : > { %v3384_v21 = vpop.eup %3383  ;;  %3395 = vtanh.f32 %v1345_v29  ;;  %v1191_v22 = vsub.f32 %v1137_v30, %v3959_v23  ;;  %v1141_v42 = vadd.f32 %v4071_v31, %v1027_v46  ;;  %v1029_v44 = vpop.f32.mrb[27].mxu1 }
 0x1bb   : > { %v3386_v47 = vpop.eup %3385  ;;  %3397 = vtanh.f32 %v1346_v37  ;;  %v1192_v45 = vsub.f32 %v1139_v40, %v3967_v27  ;;  %v1143_v49 = vadd.f32 %v4076_v1, %v1029_v44  ;;  %v1415_v56 = vmul.f32 %v3384_v21, %v4024_v38  ;;  %v1272_v1 = vpop.permute.xlu1 %1271 }
 0x1bc   : > { %v3388_v24 = vpop.eup %3387  ;;  %v1303_v58 = vmul.f32 %v1262_v0, %v1191_v22  ;;  %v1193_v52 = vsub.f32 %v1141_v42, %v3959_v23  ;;  %v1416_v51 = vmul.f32 %v3386_v47, %v4017_v32 }
 0x1bd   : > { %v3390_v55 = vpop.eup %3389  ;;  %v1304_v9 = vmul.f32 %v1262_v0, %v1192_v45  ;;  %v1194_v28 = vsub.f32 %v1143_v49, %v3967_v27  ;;  %v1417_v3 = vmul.f32 %v3388_v24, %v4024_v38 }
 0x1be   : > { %v1347_v31 = vadd.f32 %v3975_v35, %v1303_v58  ;;  %v1305_v59 = vmul.f32 %v1267_v33, %v1193_v52  ;;  %v1464_v60 = vsel %vm1431_vm1, %v1416_v51, 0.0  ;;  %v1418_v61 = vmul.f32 %v3390_v55, %v4017_v32 }
 0x1bf   : > { %v1348_v57 = vadd.f32 %v3979_v39, %v1304_v9  ;;  %v1306_v62 = vmul.f32 %v1267_v33, %v1194_v28  ;;  %v1033_v48 = vpop.f32.mrb[28].mxu1  ;;  %v1465_v2 = vadd.f32 %v1464_v60, %v1415_v56  ;;  %v1277_v26 = vpop.permute.xlu1 %1276 }
 0x1c0   : > { %3399 = vtanh.f32 %v1347_v31  ;;  %v1349_v0 = vadd.f32 %v3975_v35, %v1305_v59  ;;  %v1147_v63 = vadd.f32 %v4090_v36, %v1033_v48  ;;  %v1035_v5 = vpop.f32.mrb[29].mxu1  ;;  %v1468_v6 = vsel %vm1431_vm1, %v1418_v61, 0.0 }
 0x1c1   : > { %3401 = vtanh.f32 %v1348_v57  ;;  %v1350_v7 = vadd.f32 %v3979_v39, %v1306_v62  ;;  %v1149_v8 = vadd.f32 %v4096_v41, %v1035_v5  ;;  %1466 = vadd.xlane.f32.xlu1 %v1465_v2  ;;  %v1037_v4 = vpop.f32.mrb[30].mxu1  ;;  %v1469_v10 = vadd.f32 %v1468_v6, %v1417_v3 }
 0x1c2   : > { %v3392_v14 = vpop.eup %3391  ;;  %3403 = vtanh.f32 %v1349_v0  ;;  %v1195_v11 = vsub.f32 %v1147_v63, %v3959_v23  ;;  %v1151_v13 = vadd.f32 %v4101_v54, %v1037_v4  ;;  %v1039_v16 = vpop.f32.mrb[31].mxu1  ;;  %v4182_v63 = vld [vmem:[#allocation2] ss:$0 sm:$0xff] }
 0x1c3   : > { %v3394_v18 = vpop.eup %3393  ;;  %3405 = vtanh.f32 %v1350_v7  ;;  %v1196_v36 = vsub.f32 %v1149_v8, %v3967_v27  ;;  %v1153_v25 = vadd.f32 %v4106_v53, %v1039_v16  ;;  %v1419_v54 = vmul.f32 %v3392_v14, %v4024_v38 }
 0x1c4   : > { %v3396_v15 = vpop.eup %3395  ;;  %v1307_v43 = vmul.f32 %v1272_v1, %v1195_v11  ;;  %v1197_v41 = vsub.f32 %v1151_v13, %v3959_v23  ;;  %v1420_v29 = vmul.f32 %v3394_v18, %v4017_v32 }
 0x1c5   : > { %v3398_v30 = vpop.eup %3397  ;;  %v1308_v34 = vmul.f32 %v1272_v1, %v1196_v36  ;;  %v1198_v33 = vsub.f32 %v1153_v25, %v3967_v27  ;;  %1470 = vadd.xlane.f32.xlu1 %v1469_v10  ;;  %v1421_v42 = vmul.f32 %v3396_v15, %v4024_v38 }
 0x1c6   : > { %v1351_v37 = vadd.f32 %v3975_v35, %v1307_v43  ;;  %v1309_v40 = vmul.f32 %v1277_v26, %v1197_v41  ;;  %v1472_v46 = vsel %vm1431_vm1, %v1420_v29, 0.0  ;;  %v1422_v53 = vmul.f32 %v3398_v30, %v4017_v32 }
 0x1c7   : > { %v1352_v21 = vadd.f32 %v3979_v39, %v1308_v34  ;;  %v1310_v23 = vmul.f32 %v1277_v26, %v1198_v33  ;;  %v1473_v22 = vadd.f32 %v1472_v46, %v1419_v54 }
 0x1c8   : > { %3407 = vtanh.f32 %v1351_v37  ;;  %v1353_v44 = vadd.f32 %v3975_v35, %v1309_v40  ;;  %v1476_v27 = vsel %vm1431_vm1, %v1422_v53, 0.0 }
 0x1c9   : > { %3409 = vtanh.f32 %v1352_v21  ;;  %v1354_v47 = vadd.f32 %v3979_v39, %v1310_v23  ;;  %1458 = vadd.xlane.f32.xlu1 %v4124_v20  ;;  %1474 = vadd.xlane.f32.xlu0 %v1473_v22  ;;  %v1477_v45 = vadd.f32 %v1476_v27, %v1421_v42 }
 0x1ca   : > { %v3400_v49 = vpop.eup %3399  ;;  %3411 = vtanh.f32 %v1353_v44 }
 0x1cb   : > { %v3402_v24 = vpop.eup %3401  ;;  %3413 = vtanh.f32 %v1354_v47  ;;  %v1423_v35 = vmul.f32 %v3400_v49, %v4024_v38 }
 0x1cc   : > { %v3404_v58 = vpop.eup %3403  ;;  %v1424_v52 = vmul.f32 %v3402_v24, %v4017_v32 }
 0x1cd   : > { %v3406_v51 = vpop.eup %3405  ;;  %1462 = vadd.xlane.f32.xlu1 %v4132_v50  ;;  %1478 = vadd.xlane.f32.xlu0 %v1477_v45  ;;  %v1425_v9 = vmul.f32 %v3404_v58, %v4024_v38 }
 0x1ce   : > { %v1480_v55 = vsel %vm1431_vm1, %v1424_v52, 0.0  ;;  %v1426_v39 = vmul.f32 %v3406_v51, %v4017_v32 }
 0x1cf   : > { %v1481_v20 = vadd.f32 %v1480_v55, %v1423_v35 }
 0x1d0   : > { %v1484_v28 = vsel %vm1431_vm1, %v1426_v39, 0.0 }
 0x1d1   : > { %1482 = vadd.xlane.f32.xlu0 %v1481_v20  ;;  %v1485_v56 = vadd.f32 %v1484_v28, %v1425_v9 }
 0x1d2   : > { %v3408_v31 = vpop.eup %3407 }
 0x1d3   : > { %v3410_v59 = vpop.eup %3409  ;;  %v1427_v1 = vmul.f32 %v3408_v31, %v4024_v38 }
 0x1d4   : > { %v3412_v60 = vpop.eup %3411  ;;  %v1428_v61 = vmul.f32 %v3410_v59, %v4017_v32 }
 0x1d5   : > { %v3414_v50 = vpop.eup %3413  ;;  %1486 = vadd.xlane.f32.xlu0 %v1485_v56  ;;  %v1429_v2 = vmul.f32 %v3412_v60, %v4024_v38 }
 0x1d6   : > { %v1488_v57 = vsel %vm1431_vm1, %v1428_v61, 0.0  ;;  %v1430_v62 = vmul.f32 %v3414_v50, %v4017_v32 }
 0x1d7   : > { %v1489_v48 = vadd.f32 %v1488_v57, %v1427_v1 }
 0x1d8   : > { %v1492_v3 = vsel %vm1431_vm1, %v1430_v62, 0.0 }
 0x1d9   : > { %1490 = vadd.xlane.f32.xlu0 %v1489_v48  ;;  %v1493_v0 = vadd.f32 %v1492_v3, %v1429_v2 }
 0x1dd   : > { %1494 = vadd.xlane.f32.xlu0 %v1493_v0 }
 0x22e   : > { %v1435_v5 = vpop.xlane.xlu1 %1434 }
 0x22f   : > { %v1503_v6 = vadd.f32 %v4182_v63, %v1435_v5 }
 0x230   : > { %v1439_v7 = vpop.xlane.xlu0 %1438 }
 0x231   : > { %v1519_v8 = vmul.f32 1.442695, %v1503_v6  ;;  %v1504_v4 = vadd.f32 %v4182_v63, %v1439_v7 }
 0x233   : > { %3415 = vpow2.f32 %v1519_v8  ;;  %v1521_v10 = vmul.f32 1.442695, %v1504_v4 }
 0x235   : > { %3417 = vpow2.f32 %v1521_v10 }
 0x236   : > { %v1443_v32 = vpop.xlane.xlu0 %1442 }
 0x237   : > { %v1505_v38 = vadd.f32 %v4182_v63, %v1443_v32 }
 0x239   : > { %v1523_v14 = vmul.f32 1.442695, %v1505_v38 }
 0x23a   : > { %v1447_v11 = vpop.xlane.xlu0 %1446 }
 0x23b   : > { %3419 = vpow2.f32 %v1523_v14  ;;  %v1506_v13 = vadd.f32 %v4182_v63, %v1447_v11 }
 0x23d   : > { %v4188_v16 = vpop.eup %3415  ;;  %v1525_v18 = vmul.f32 1.442695, %v1506_v13 }
 0x23e   : > { %v1552_v36 = vsel %vm1551_vm2, %v4188_v16, 0.0  ;;  %v1451_v25 = vpop.xlane.xlu1 %1450 }
 0x23f   : > { %v4192_v15 = vpop.eup %3417  ;;  %v1553_v43 = vrot.slane %v1552_v36, 4  ;;  %3421 = vpow2.f32 %v1525_v18  ;;  %v1507_v41 = vadd.f32 %v4182_v63, %v1451_v25 }
 0x240   : > { %v1559_v29 = vsel %vm1551_vm2, %v4192_v15, 0.0 }
 0x241   : > { %v1554_v30 = vadd.f32 %v1553_v43, %v1552_v36  ;;  %v1560_v26 = vrot.slane %v1559_v29, 4  ;;  %v1527_v34 = vmul.f32 1.442695, %v1507_v41 }
 0x242   : > { %v1455_v33 = vpop.xlane.xlu1 %1454 }
 0x243   : > { %v1555_v54 = vrot.slane %v1554_v30, 2  ;;  %v1561_v37 = vadd.f32 %v1560_v26, %v1559_v29  ;;  %3423 = vpow2.f32 %v1527_v34  ;;  %v1508_v40 = vadd.f32 %v4182_v63, %v1455_v33 }
 0x245   : > { %v4198_v46 = vpop.eup %3419  ;;  %v1556_v53 = vadd.f32 %v1555_v54, %v1554_v30  ;;  %v1562_v21 = vrot.slane %v1561_v37, 2  ;;  %v1529_v23 = vmul.f32 1.442695, %v1508_v40 }
 0x246   : > { %v1566_v22 = vsel %vm1551_vm2, %v4198_v46, 0.0 }
 0x247   : > { %v1557_v42 = vrot.slane %v1556_v53, 1  ;;  %v1563_v44 = vadd.f32 %v1562_v21, %v1561_v37  ;;  %v1567_v27 = vrot.slane %v1566_v22, 4  ;;  %3425 = vpow2.f32 %v1529_v23 }
 0x249   : > { %v4202_v47 = vpop.eup %3421  ;;  %v1558_v45 = vadd.f32 %v1557_v42, %v1556_v53  ;;  %v1564_v49 = vrot.slane %v1563_v44, 1  ;;  %v1568_v24 = vadd.f32 %v1567_v27, %v1566_v22  ;;  %v3479_v53 = vld [vmem:[%s3886_s26] sm:$0xff] }
 0x24a   : > { %v1573_v58 = vsel %vm1551_vm2, %v4202_v47, 0.0 }
 0x24b   : > { %v1565_v52 = vadd.f32 %v1564_v49, %v1563_v44  ;;  %v1569_v51 = vrot.slane %v1568_v24, 2  ;;  %v1574_v35 = vrot.slane %v1573_v58, 4  ;;  %v1664_v55 = vadd.f32 1e-08, %v1558_v45 }
 0x24d   : > { %v4206_v39 = vpop.eup %3423  ;;  %v1570_v20 = vadd.f32 %v1569_v51, %v1568_v24  ;;  %v1575_v9 = vadd.f32 %v1574_v35, %v1573_v58  ;;  %3427 = vrcp.f32 %v1664_v55  ;;  %v1665_v28 = vadd.f32 1e-08, %v1565_v52  ;;  %v3480_v35 = vld [vmem:[%s3886_s26 + $0x8] sm:$0xff] }
 0x24e   : > { %v1580_v56 = vsel %vm1551_vm2, %v4206_v39, 0.0  ;;  %v1467_v31 = vpop.xlane.xlu1 %1466 }
 0x24f   : > { %v1571_v59 = vrot.slane %v1570_v20, 1  ;;  %v1576_v60 = vrot.slane %v1575_v9, 2  ;;  %v1581_v61 = vrot.slane %v1580_v56, 4  ;;  %v1511_v50 = vadd.f32 %v4182_v63, %v1467_v31 }
 0x250   : > { %3429 = vrcp.f32 %v1665_v28 }
 0x251   : > { %v4211_v1 = vpop.eup %3425  ;;  %v1572_v57 = vadd.f32 %v1571_v59, %v1570_v20  ;;  %v1577_v62 = vadd.f32 %v1576_v60, %v1575_v9  ;;  %v1582_v48 = vadd.f32 %v1581_v61, %v1580_v56  ;;  %v1535_v2 = vmul.f32 1.442695, %v1511_v50 }
 0x252   : > { %v1587_v3 = vsel %vm1551_vm2, %v4211_v1, 0.0  ;;  %v1471_v0 = vpop.xlane.xlu1 %1470 }
 0x253   : > { %v1578_v5 = vrot.slane %v1577_v62, 1  ;;  %v1583_v6 = vrot.slane %v1582_v48, 2  ;;  %v1588_v7 = vrot.slane %v1587_v3, 4  ;;  %3431 = vpow2.f32 %v1535_v2 }
 0x254   : > { %v1512_v8 = vadd.f32 %v4182_v63, %v1471_v0  ;;  %v1666_v4 = vadd.f32 1e-08, %v1572_v57 }
 0x255   : > { %v1579_v10 = vadd.f32 %v1578_v5, %v1577_v62  ;;  %v1584_v32 = vadd.f32 %v1583_v6, %v1582_v48  ;;  %v1589_v38 = vadd.f32 %v1588_v7, %v1587_v3  ;;  %v3481_v7 = vld [vmem:[%s3886_s26 + $0x10] sm:$0xff] }
 0x256   : > { %v1537_v14 = vmul.f32 1.442695, %v1512_v8  ;;  %v1459_v11 = vpop.xlane.xlu1 %1458  ;;  %v1475_v13 = vpop.xlane.xlu0 %1474  ;;  %3433 = vrcp.f32 %v1666_v4 }
 0x257   : > { %v3428_v18 = vpop.eup %3427  ;;  %v1590_v36 = vrot.slane %v1589_v38, 2  ;;  %v1509_v25 = vadd.f32 %v4182_v63, %v1459_v11  ;;  %v1513_v43 = vadd.f32 %v4182_v63, %v1475_v13  ;;  %v1585_v41 = vrot.slane %v1584_v32, 1 }
 0x258   : > { %3435 = vpow2.f32 %v1537_v14  ;;  %v1712_v29 = vmul.f32 %v3428_v18, %v4188_v16  ;;  %v1667_v30 = vadd.f32 1e-08, %v1579_v10 }
 0x259   : > { %v1591_v26 = vadd.f32 %v1590_v36, %v1589_v38  ;;  %v1531_v34 = vmul.f32 1.442695, %v1509_v25  ;;  %v1539_v33 = vmul.f32 1.442695, %v1513_v43  ;;  %v1586_v44 = vadd.f32 %v1585_v41, %v1584_v32 }
 0x25a   : > { %v3430_v54 = vpop.eup %3429  ;;  %v1463_v37 = vpop.xlane.xlu1 %1462  ;;  %v1728_v21 = vmul.f32 %v3479_v53, %v1712_v29  ;;  %3437 = vrcp.f32 %v1667_v30 }
 0x25b   : > { %v1479_v40 = vpop.xlane.xlu0 %1478  ;;  %v1592_v23 = vrot.slane %v1591_v26, 1  ;;  %3439 = vpow2.f32 %v1531_v34  ;;  %v1510_v22 = vadd.f32 %v4182_v63, %v1463_v37  ;;  %v1713_v27 = vmul.f32 %v3430_v54, %v4192_v15 }
 0x25c   : > { %v1514_v42 = vadd.f32 %v4182_v63, %v1479_v40  ;;  %3441 = vpow2.f32 %v1539_v33  ;;  %v1744_v16 = vsub.f32 %v1712_v29, %v1728_v21  ;;  %1938 = vperm.xlu1 %3243, %v1728_v21   ;;  %v1668_v31 = vadd.f32 1e-08, %v1586_v44 }
 0x25d   : > { %v4223_v45 = vpop.eup %3431  ;;  %v1533_v49 = vmul.f32 1.442695, %v1510_v22  ;;  %v1729_v55 = vmul.f32 %v3480_v35, %v1713_v27  ;;  %v1593_v20 = vadd.f32 %v1592_v23, %v1591_v26  ;;  %v3482_v22 = vld [vmem:[%s3886_s26 + $0x18] sm:$0xff] }
 0x25e   : > { %v1541_v24 = vmul.f32 1.442695, %v1514_v42  ;;  %v1608_v58 = vsel %vm1551_vm2, %v4223_v45, 0.0  ;;  %v1760_v52 = vsel %vm1551_vm2, %v1744_v16, 0.0 }
 0x25f   : > { %v1483_v51 = vpop.xlane.xlu0 %1482  ;;  %v1609_v9 = vrot.slane %v1608_v58, 4  ;;  %3443 = vpow2.f32 %v1533_v49  ;;  %v1761_v15 = vrot.slane %v1760_v52, 4  ;;  %1943 = vperm.xlu0 %3242, %v1729_v55   ;;  %v1745_v61 = vsub.f32 %v1713_v27, %v1729_v55 }
 0x260   : > { %v1515_v28 = vadd.f32 %v4182_v63, %v1483_v51  ;;  %v3434_v56 = vpop.eup %3433  ;;  %3445 = vpow2.f32 %v1541_v24  ;;  %v1669_v3 = vadd.f32 1e-08, %v1593_v20 }
 0x261   : > { %v1610_v59 = vadd.f32 %v1609_v9, %v1608_v58  ;;  %v1714_v50 = vmul.f32 %v3434_v56, %v4198_v46  ;;  %v1762_v4 = vadd.f32 %v1761_v15, %v1760_v52  ;;  %v1767_v46 = vsel %vm1551_vm2, %v1745_v61, 0.0 }
 0x262   : > { %v1543_v60 = vmul.f32 1.442695, %v1515_v28  ;;  %v4231_v57 = vpop.eup %3435  ;;  %v1768_v30 = vrot.slane %v1767_v46, 4 }
 0x263   : > { %v1487_v62 = vpop.xlane.xlu0 %1486  ;;  %v1611_v48 = vrot.slane %v1610_v59, 2  ;;  %v1615_v2 = vsel %vm1551_vm2, %v4231_v57, 0.0  ;;  %v1730_v8 = vmul.f32 %v3481_v7, %v1714_v50  ;;  %v1763_v26 = vrot.slane %v1762_v4, 2 }
 0x264   : > { %3447 = vpow2.f32 %v1543_v60  ;;  %v3438_v0 = vpop.eup %3437  ;;  %v1616_v5 = vrot.slane %v1615_v2, 4  ;;  %v1516_v6 = vadd.f32 %v4182_v63, %v1487_v62  ;;  %v1769_v51 = vadd.f32 %v1768_v30, %v1767_v46 }
 0x265   : > { %v4237_v10 = vpop.eup %3439  ;;  %v1612_v32 = vadd.f32 %v1611_v48, %v1610_v59  ;;  %3449 = vrcp.f32 %v1668_v31  ;;  %1948 = vperm.xlu1 %3243, %v1730_v8   ;;  %v1715_v36 = vmul.f32 %v3438_v0, %v4202_v47  ;;  %v1746_v37 = vsub.f32 %v1714_v50, %v1730_v8 }
 0x266   : > { %v4240_v38 = vpop.eup %3441  ;;  %v1617_v14 = vadd.f32 %v1616_v5, %v1615_v2  ;;  %v1594_v11 = vsel %vm1551_vm2, %v4237_v10, 0.0  ;;  %v1545_v13 = vmul.f32 1.442695, %v1516_v6  ;;  %3451 = vrcp.f32 %v1669_v3 }
 0x267   : > { %v1491_v18 = vpop.xlane.xlu0 %1490  ;;  %v1595_v25 = vrot.slane %v1594_v11, 4  ;;  %v1622_v43 = vsel %vm1551_vm2, %v4240_v38, 0.0  ;;  %v1613_v33 = vrot.slane %v1612_v32, 1  ;;  %v1731_v42 = vmul.f32 %v3482_v22, %v1715_v36 }
 0x268   : > { %v1517_v41 = vadd.f32 %v4182_v63, %v1491_v18  ;;  %v1623_v29 = vrot.slane %v1622_v43, 4  ;;  %3453 = vpow2.f32 %v1545_v13  ;;  %v1618_v47 = vrot.slane %v1617_v14, 2 }
 0x269   : > { %v4248_v34 = vpop.eup %3443  ;;  %v1596_v54 = vadd.f32 %v1595_v25, %v1594_v11  ;;  %v1747_v52 = vsub.f32 %v1715_v36, %v1731_v42  ;;  %1953 = vperm.xlu1 %3243, %v1731_v42   ;;  %v1764_v28 = vadd.f32 %v1763_v26, %v1762_v4  ;;  %v4260_v56 = vadd.f32 %v1613_v33, %v1612_v32 }
 0x26a   : > { %v1547_v40 = vmul.f32 1.442695, %v1517_v41  ;;  %v4250_v53 = vpop.eup %3445  ;;  %v1624_v21 = vadd.f32 %v1623_v29, %v1622_v43  ;;  %v1601_v23 = vsel %vm1551_vm2, %v4248_v34, 0.0  ;;  %v1774_v59 = vsel %vm1551_vm2, %v1746_v37, 0.0 }
 0x26b   : > { %v1495_v44 = vpop.xlane.xlu0 %1494  ;;  %v1597_v16 = vrot.slane %v1596_v54, 2  ;;  %v1602_v27 = vrot.slane %v1601_v23, 4  ;;  %v1629_v49 = vsel %vm1551_vm2, %v4250_v53, 0.0  ;;  %v1619_v61 = vadd.f32 %v1618_v47, %v1617_v14 }
 0x26c   : > { %3455 = vpow2.f32 %v1547_v40  ;;  %v1625_v24 = vrot.slane %v1624_v21, 2  ;;  %v1630_v58 = vrot.slane %v1629_v49, 4  ;;  %v1518_v9 = vadd.f32 %v4182_v63, %v1495_v44 }
 0x26d   : > { %v1598_v55 = vadd.f32 %v1597_v16, %v1596_v54  ;;  %v1603_v20 = vadd.f32 %v1602_v27, %v1601_v23  ;;  %v1781_v48 = vsel %vm1551_vm2, %v1747_v52, 0.0  ;;  %v1765_v4 = vrot.slane %v1764_v28, 1  ;;  %v3483_v23 = vld [vmem:[%s3886_s26 + $0x20] sm:$0xff] }
 0x26e   : > { %v4257_v35 = vpop.eup %3447  ;;  %v1631_v15 = vadd.f32 %v1630_v58, %v1629_v49  ;;  %v1626_v3 = vadd.f32 %v1625_v24, %v1624_v21  ;;  %v1549_v5 = vmul.f32 1.442695, %v1518_v9  ;;  %v1782_v8 = vrot.slane %v1781_v48, 4 }
 0x26f   : > { %v1636_v31 = vsel %vm1551_vm2, %v4257_v35, 0.0  ;;  %v3450_v60 = vpop.eup %3449  ;;  %v1604_v50 = vrot.slane %v1603_v20, 2  ;;  %v1599_v2 = vrot.slane %v1598_v55, 1  ;;  %v1775_v11 = vrot.slane %v1774_v59, 4 }
 0x270   : > { %v1637_v62 = vrot.slane %v1636_v31, 4  ;;  %v1632_v0 = vrot.slane %v1631_v15, 2  ;;  %v3452_v63 = vpop.eup %3451  ;;  %3457 = vpow2.f32 %v1549_v5  ;;  %v4269_v14 = vmul.f32 %v3450_v60, %v4206_v39 }
 0x271   : > { %v1605_v6 = vadd.f32 %v1604_v50, %v1603_v20  ;;  %v1766_v25 = vadd.f32 %v1765_v4, %v1764_v28  ;;  %v1620_v43 = vrot.slane %v1619_v61, 1  ;;  %v1627_v41 = vrot.slane %v1626_v3, 1 }
 0x272   : > { %v1638_v7 = vadd.f32 %v1637_v62, %v1636_v31  ;;  %v4266_v32 = vpop.eup %3453  ;;  %v1633_v46 = vadd.f32 %v1632_v0, %v1631_v15  ;;  %v4274_v30 = vmul.f32 %v3452_v63, %v4211_v1  ;;  %v1600_v33 = vadd.f32 %v1599_v2, %v1598_v55  ;;  %v3484_v1 = vld [vmem:[%s3886_s26 + $0x28] sm:$0xff] }
 0x273   : > { %v1606_v13 = vrot.slane %v1605_v6, 1  ;;  %v1643_v36 = vsel %vm1551_vm2, %v4266_v32, 0.0  ;;  %2483 = vperm.xlu0 %3242, %v1766_v25   ;;  %v1770_v39 = vrot.slane %v1769_v51, 2  ;;  %v1783_v37 = vadd.f32 %v1782_v8, %v1781_v48 }
 0x274   : > { %v1639_v18 = vrot.slane %v1638_v7, 2  ;;  %v1644_v29 = vrot.slane %v1643_v36, 4  ;;  %v1634_v40 = vrot.slane %v1633_v46, 1  ;;  %v4282_v22 = vmul.f32 %v3483_v23, %v4269_v14 }
 0x275   : > { %v1607_v42 = vadd.f32 %v1606_v13, %v1605_v6  ;;  %v4286_v16 = vmul.f32 %v3484_v1, %v4274_v30  ;;  %v1771_v27 = vadd.f32 %v1770_v39, %v1769_v51  ;;  %v1784_v58 = vrot.slane %v1783_v37, 2  ;;  %v3485_v1 = vld [vmem:[%s3886_s26 + $0x30] sm:$0xff] }
 0x276   : > { %v4276_v26 = vpop.eup %3455  ;;  %v1640_v54 = vadd.f32 %v1639_v18, %v1638_v7  ;;  %v1645_v47 = vadd.f32 %v1644_v29, %v1643_v36  ;;  %v1776_v52 = vadd.f32 %v1775_v11, %v1774_v59  ;;  %v1621_v55 = vadd.f32 %v1620_v43, %v1619_v61 }
 0x277   : > { %v1650_v21 = vsel %vm1551_vm2, %v4276_v26, 0.0  ;;  %v1628_v20 = vadd.f32 %v1627_v41, %v1626_v3  ;;  %1958 = vperm.xlu0 %3242, %v4282_v22   ;;  %1963 = vperm.xlu1 %3243, %v4286_v16   ;;  %v1772_v15 = vrot.slane %v1771_v27, 1  ;;  %v1785_v31 = vadd.f32 %v1784_v58, %v1783_v37  ;;  %v3486_v58 = vld [vmem:[%s3886_s26 + $0x38] sm:$0xff] }
 0x278   : > { %v1651_v44 = vrot.slane %v1650_v21, 4  ;;  %v1641_v49 = vrot.slane %v1640_v54, 1  ;;  %v1646_v24 = vrot.slane %v1645_v47, 2  ;;  %v1777_v60 = vrot.slane %v1776_v52, 2 }
 0x279   : > { %v1635_v50 = vadd.f32 %v1634_v40, %v1633_v46  ;;  %v1670_v48 = vadd.f32 1e-08, %v1600_v33  ;;  %v1671_v2 = vadd.f32 1e-08, %v1607_v42  ;;  %v1773_v59 = vadd.f32 %v1772_v15, %v1771_v27  ;;  %v3487_v15 = vld [vmem:[%s3886_s26 + $0x40] sm:$0xff] }
 0x27a   : > { %v1652_v9 = vadd.f32 %v1651_v44, %v1650_v21  ;;  %v1647_v28 = vadd.f32 %v1646_v24, %v1645_v47  ;;  %v4290_v51 = vpop.eup %3457  ;;  %v1642_v0 = vadd.f32 %v1641_v49, %v1640_v54  ;;  %v1786_v61 = vrot.slane %v1785_v31, 1 }
 0x27b   : > { %v1657_v63 = vsel %vm1551_vm2, %v4290_v51, 0.0  ;;  %v1778_v6 = vadd.f32 %v1777_v60, %v1776_v52  ;;  %3459 = vrcp.f32 %v1670_v48  ;;  %2488 = vperm.xlu0 %3242, %v1773_v59   ;;  %v1672_v13 = vadd.f32 1e-08, %v4260_v56 }
 0x27c   : > { %v1653_v62 = vrot.slane %v1652_v9, 2  ;;  %v1648_v5 = vrot.slane %v1647_v28, 1  ;;  %v1658_v8 = vrot.slane %v1657_v63, 4  ;;  %v1787_v4 = vadd.f32 %v1786_v61, %v1785_v31  ;;  %v3490_v61 = vld [vmem:[%s3886_s26 + $0x58] sm:$0xff] }
 0x27d   : > { %3461 = vrcp.f32 %v1671_v2  ;;  %v1779_v11 = vrot.slane %v1778_v6, 1  ;;  %v1673_v18 = vadd.f32 1e-08, %v1621_v55  ;;  %v1674_v25 = vadd.f32 1e-08, %v1628_v20 }
 0x27e   : > { %v1654_v3 = vadd.f32 %v1653_v62, %v1652_v9  ;;  %v1649_v7 = vadd.f32 %v1648_v5, %v1647_v28  ;;  %v1659_v36 = vadd.f32 %v1658_v8, %v1657_v63  ;;  %2498 = vperm.xlu1 %3243, %v1787_v4   ;;  %v1675_v43 = vadd.f32 1e-08, %v1635_v50  ;;  %v3488_v62 = vld [vmem:[%s3886_s26 + $0x48] sm:$0xff] }
 0x27f   : > { %v1780_v41 = vadd.f32 %v1779_v11, %v1778_v6  ;;  %3463 = vrcp.f32 %v1672_v13  ;;  %v1676_v29 = vadd.f32 1e-08, %v1642_v0  ;;  %v1748_v20 = vsub.f32 %v4269_v14, %v4282_v22 }
 0x280   : > { %v1655_v46 = vrot.slane %v1654_v3, 1  ;;  %v1660_v54 = vrot.slane %v1659_v36, 2  ;;  %3465 = vrcp.f32 %v1673_v18  ;;  %v1677_v39 = vadd.f32 1e-08, %v1649_v7 }
 0x281   : > { %2493 = vperm.xlu0 %3242, %v1780_v41   ;;  %3467 = vrcp.f32 %v1674_v25  ;;  %v1749_v14 = vsub.f32 %v4274_v30, %v4286_v16 }
 0x282   : > { %v1656_v33 = vadd.f32 %v1655_v46, %v1654_v3  ;;  %v1661_v37 = vadd.f32 %v1660_v54, %v1659_v36  ;;  %3469 = vrcp.f32 %v1675_v43 }
 0x283   : > { %3471 = vrcp.f32 %v1676_v29  ;;  %v1795_v11 = vsel %vm1551_vm2, %v1749_v14, 0.0 }
 0x284   : > { %v1662_v56 = vrot.slane %v1661_v37, 1  ;;  %3473 = vrcp.f32 %v1677_v39  ;;  %v1678_v40 = vadd.f32 1e-08, %v1656_v33  ;;  %v3492_v39 = vld [vmem:[%s3886_s26 + $0x68] sm:$0xff] }
 0x285   : > { %v3460_v47 = vpop.eup %3459 }
 0x286   : > { %v1663_v23 = vadd.f32 %v1662_v56, %v1661_v37  ;;  %v4296_v42 = vmul.f32 %v3460_v47, %v4237_v10  ;;  %3475 = vrcp.f32 %v1678_v40 }
 0x287   : > { %v3462_v21 = vpop.eup %3461 }
 0x288   : > { %v4299_v44 = vmul.f32 %v3462_v21, %v4248_v34  ;;  %v4303_v27 = vmul.f32 %v3485_v1, %v4296_v42  ;;  %v1679_v49 = vadd.f32 1e-08, %v1663_v23  ;;  %v1796_v21 = vrot.slane %v1795_v11, 4 }
 0x289   : > { %v3464_v24 = vpop.eup %3463 }
 0x28a   : > { %v4307_v52 = vmul.f32 %v3486_v58, %v4299_v44  ;;  %v3466_v55 = vpop.eup %3465  ;;  %1968 = vperm.xlu0 %3242, %v4303_v27   ;;  %v1720_v10 = vmul.f32 %v3464_v24, %v4223_v45  ;;  %3477 = vrcp.f32 %v1679_v49  ;;  %v1750_v36 = vsub.f32 %v4296_v42, %v4303_v27 }
 0x28b   : > { %v3468_v34 = vpop.eup %3467  ;;  %v1721_v9 = vmul.f32 %v3466_v55, %v4231_v57  ;;  %v3489_v57 = vld [vmem:[%s3886_s26 + $0x50] sm:$0xff] }
 0x28c   : > { %1973 = vperm.xlu1 %3243, %v4307_v52   ;;  %v3470_v28 = vpop.eup %3469  ;;  %v1736_v31 = vmul.f32 %v3487_v15, %v1720_v10  ;;  %v1722_v60 = vmul.f32 %v3468_v34, %v4240_v38  ;;  %v1788_v38 = vsel %vm1551_vm2, %v1748_v20, 0.0  ;;  %v1802_v42 = vsel %vm1551_vm2, %v1750_v36, 0.0 }
 0x28d   : > { %v3472_v50 = vpop.eup %3471  ;;  %v1737_v48 = vmul.f32 %v3488_v62, %v1721_v9  ;;  %v1723_v45 = vmul.f32 %v3470_v28, %v4250_v53  ;;  %v3491_v53 = vld [vmem:[%s3886_s26 + $0x60] sm:$0xff]  ;;  %v1789_v46 = vrot.slane %v1788_v38, 4  ;;  %v1751_v1 = vsub.f32 %v4299_v44, %v4307_v52 }
 0x28e   : > { %v3474_v2 = vpop.eup %3473  ;;  %v1752_v22 = vsub.f32 %v1720_v10, %v1736_v31  ;;  %1978 = vperm.xlu0 %3242, %v1736_v31   ;;  %v1738_v0 = vmul.f32 %v3489_v57, %v1722_v60  ;;  %v1724_v5 = vmul.f32 %v3472_v50, %v4257_v35  ;;  %v1797_v31 = vadd.f32 %v1796_v21, %v1795_v11  ;;  %v3494_v57 = vld [vmem:[%s3886_s26 + $0x78] sm:$0xff] }
 0x28f   : > { %v1753_v59 = vsub.f32 %v1721_v9, %v1737_v48  ;;  %v1739_v3 = vmul.f32 %v3490_v61, %v1723_v45  ;;  %v1725_v4 = vmul.f32 %v3474_v2, %v4266_v32  ;;  %v1790_v49 = vadd.f32 %v1789_v46, %v1788_v38  ;;  %v3493_v9 = vld [vmem:[%s3886_s26 + $0x70] sm:$0xff] }
 0x290   : > { %1983 = vperm.xlu1 %3243, %v1737_v48   ;;  %v1816_v63 = vsel %vm1551_vm2, %v1752_v22, 0.0  ;;  %v1754_v6 = vsub.f32 %v1722_v60, %v1738_v0  ;;  %v4327_v7 = vmul.f32 %v3491_v53, %v1724_v5  ;;  %v3476_v35 = vpop.eup %3475  ;;  %v1803_v60 = vrot.slane %v1802_v42, 4 }
 0x291   : > { %v1817_v8 = vrot.slane %v1816_v63, 4  ;;  %v1823_v30 = vsel %vm1551_vm2, %v1753_v59, 0.0  ;;  %v1755_v16 = vsub.f32 %v1723_v45, %v1739_v3  ;;  %v1741_v37 = vmul.f32 %v3492_v39, %v1725_v4 }
 0x292   : > { %v1824_v13 = vrot.slane %v1823_v30, 4  ;;  %v1830_v18 = vsel %vm1551_vm2, %v1754_v6, 0.0  ;;  %1988 = vperm.xlu0 %3242, %v1738_v0   ;;  %v1756_v32 = vsub.f32 %v1724_v5, %v4327_v7  ;;  %v1726_v56 = vmul.f32 %v3476_v35, %v4276_v26 }
 0x293   : > { %v1831_v25 = vrot.slane %v1830_v18, 4  ;;  %v1837_v43 = vsel %vm1551_vm2, %v1755_v16, 0.0  ;;  %v1818_v41 = vadd.f32 %v1817_v8, %v1816_v63  ;;  %v1757_v20 = vsub.f32 %v1725_v4, %v1741_v37 }
 0x294   : > { %1993 = vperm.xlu1 %3243, %v1739_v3   ;;  %v1838_v29 = vrot.slane %v1837_v43, 4  ;;  %v1825_v33 = vadd.f32 %v1824_v13, %v1823_v30  ;;  %v3478_v47 = vpop.eup %3477  ;;  %v1844_v58 = vsel %vm1551_vm2, %v1756_v32, 0.0  ;;  %v1742_v26 = vmul.f32 %v3493_v9, %v1726_v56 }
 0x295   : > { %v1819_v54 = vrot.slane %v1818_v41, 2  ;;  %v1832_v40 = vadd.f32 %v1831_v25, %v1830_v18  ;;  %v1727_v28 = vmul.f32 %v3478_v47, %v4290_v51  ;;  %v1845_v62 = vrot.slane %v1844_v58, 4 }
 0x296   : > { %v1826_v23 = vrot.slane %v1825_v33, 2  ;;  %v1839_v10 = vadd.f32 %v1838_v29, %v1837_v43  ;;  %v1791_v44 = vrot.slane %v1790_v49, 2  ;;  %v1809_v52 = vsel %vm1551_vm2, %v1751_v1, 0.0 }
 0x297   : > { %v1820_v27 = vadd.f32 %v1819_v54, %v1818_v41  ;;  %v1833_v55 = vrot.slane %v1832_v40, 2  ;;  %v1851_v14 = vsel %vm1551_vm2, %v1757_v20, 0.0  ;;  %v1758_v22 = vsub.f32 %v1726_v56, %v1742_v26 }
 0x298   : > { %v1827_v24 = vadd.f32 %v1826_v23, %v1825_v33  ;;  %v1840_v2 = vrot.slane %v1839_v10, 2  ;;  %v1743_v0 = vmul.f32 %v3494_v57, %v1727_v28  ;;  %v1798_v5 = vrot.slane %v1797_v31, 2 }
 0x299   : > { %v1821_v34 = vrot.slane %v1820_v27, 1  ;;  %v1834_v45 = vadd.f32 %v1833_v55, %v1832_v40  ;;  %v1810_v51 = vrot.slane %v1809_v52, 4  ;;  %v1792_v38 = vadd.f32 %v1791_v44, %v1790_v49  ;;  %v4357_v44 = vld [vmem:[%s3855_s21 + $0x8] sm:$0xff] }
 0x29a   : > { %v1828_v15 = vrot.slane %v1827_v24, 1  ;;  %v1804_v59 = vadd.f32 %v1803_v60, %v1802_v42  ;;  %v1846_v61 = vadd.f32 %v1845_v62, %v1844_v58  ;;  %v1852_v3 = vrot.slane %v1851_v14, 4  ;;  %v4352_v60 = vld [vmem:[%s3855_s21] sm:$0xff] }
 0x29b   : > { %v1822_v50 = vadd.f32 %v1821_v34, %v1820_v27  ;;  %v1835_v63 = vrot.slane %v1834_v45, 1  ;;  %v1841_v6 = vadd.f32 %v1840_v2, %v1839_v10  ;;  %v1858_v53 = vsel %vm1551_vm2, %v1758_v22, 0.0 }
 0x29c   : > { %v1829_v48 = vadd.f32 %v1828_v15, %v1827_v24  ;;  %v1759_v8 = vsub.f32 %v1727_v28, %v1743_v0  ;;  %v1799_v30 = vadd.f32 %v1798_v5, %v1797_v31  ;;  %v1793_v16 = vrot.slane %v1792_v38, 1  ;;  %v4372_v5 = vld [vmem:[%s3855_s21 + $0x18] sm:$0xff] }
 0x29d   : > { %2523 = vperm.xlu0 %3242, %v1822_v50   ;;  %v1805_v4 = vrot.slane %v1804_v59, 2  ;;  %v1811_v35 = vadd.f32 %v1810_v51, %v1809_v52  ;;  %v1847_v46 = vrot.slane %v1846_v61, 2  ;;  %v1859_v11 = vrot.slane %v1858_v53, 4 }
 0x29e   : > { %2528 = vperm.xlu1 %3243, %v1829_v48   ;;  %v1836_v13 = vadd.f32 %v1835_v63, %v1834_v45  ;;  %v1842_v18 = vrot.slane %v1841_v6, 1  ;;  %v1853_v36 = vadd.f32 %v1852_v3, %v1851_v14  ;;  %v1865_v25 = vsel %vm1551_vm2, %v1759_v8, 0.0  ;;  %v4362_v45 = vld [vmem:[%s3855_s21 + $0x10] sm:$0xff]  ;;  %v2480_v14 = vld [vmem:[%s5169_s2] sm:$0xf]  ;;  %v4382_v63 = vld [vmem:[%s3855_s21 + $0x28] sm:$0xff] }
 0x29f   : > { %v1800_v43 = vrot.slane %v1799_v30, 1  ;;  %v1794_v41 = vadd.f32 %v1793_v16, %v1792_v38  ;;  %v1812_v29 = vrot.slane %v1811_v35, 2  ;;  %v1848_v33 = vadd.f32 %v1847_v46, %v1846_v61  ;;  %v4392_v16 = vld [vmem:[%s3855_s21 + $0x38] sm:$0xff] }
 0x2a0   : > { %v1843_v32 = vadd.f32 %v1842_v18, %v1841_v6  ;;  %v1866_v54 = vrot.slane %v1865_v25, 4  ;;  %v1854_v39 = vrot.slane %v1853_v36, 2  ;;  %v1872_v50 = vunpack.c.l.bf16 %v4352_v60 }
 0x2a1   : > { %1998 = vperm.xlu0 %3242, %v4327_v7   ;;  %v1806_v7 = vadd.f32 %v1805_v4, %v1804_v59  ;;  %v1801_v56 = vadd.f32 %v1800_v43, %v1799_v30  ;;  %v1813_v47 = vadd.f32 %v1812_v29, %v1811_v35  ;;  %v1849_v21 = vrot.slane %v1848_v33, 1  ;;  %v4377_v59 = vld [vmem:[%s3855_s21 + $0x20] sm:$0xff]  ;;  %v4514_v29 = vld [vmem:[%s3855_s21 + $0xd0] sm:$0xff] }
 0x2a2   : > { %2003 = vperm.xlu1 %3243, %v1741_v37   ;;  %v1860_v37 = vadd.f32 %v1859_v11, %v1858_v53  ;;  %v1855_v23 = vadd.f32 %v1854_v39, %v1853_v36  ;;  %v1867_v1 = vadd.f32 %v1866_v54, %v1865_v25  ;;  %v1873_v62 = vunpack.c.h.bf16 %v4352_v60  ;;  %v4387_v53 = vld [vmem:[%s3855_s21 + $0x30] sm:$0xff]  ;;  %v4407_v36 = vld [vmem:[%s3855_s21 + $0x40] sm:$0xff]  ;;  %5237 = vst [vmem:[#allocation18_spill] sm:$0xff] %v4514_v29  ;;  %v4539_v25 = vld [vmem:[%s3855_s21 + $0xe8] sm:$0xff] }
 0x2a3   : > { %v1807_v40 = vrot.slane %v1806_v7, 1  ;;  %v1814_v49 = vrot.slane %v1813_v47, 1  ;;  %v1850_v24 = vadd.f32 %v1849_v21, %v1848_v33  ;;  %v1874_v52 = vunpack.c.l.bf16 %v4357_v44  ;;  %5240 = vst [vmem:[#allocation21_spill] sm:$0xff] %v4539_v25 }
 0x2a4   : > { %v1861_v42 = vrot.slane %v1860_v37, 2  ;;  %v1856_v58 = vrot.slane %v1855_v23, 1  ;;  %v1868_v10 = vrot.slane %v1867_v1, 2  ;;  %v1875_v48 = vunpack.c.h.bf16 %v4357_v44 }
 0x2a5   : > { %2008 = vperm.xlu0 %3242, %v1742_v26   ;;  %v1808_v27 = vadd.f32 %v1807_v40, %v1806_v7  ;;  %v1815_v34 = vadd.f32 %v1814_v49, %v1813_v47  ;;  %v1876_v2 = vunpack.c.l.bf16 %v4362_v45  ;;  %v2572_v22 = vsub.s32 2, %v3943_v12  ;;  %v4432_v47 = vld [vmem:[%s3855_s21 + $0x68] sm:$0xff]  ;;  %v4442_v49 = vld [vmem:[%s3855_s21 + $0x78] sm:$0xff] }
 0x2a6   : > { %2533 = vperm.xlu1 %3243, %v1836_v13   ;;  %v1862_v55 = vadd.f32 %v1861_v42, %v1860_v37  ;;  %v1857_v20 = vadd.f32 %v1856_v58, %v1855_v23  ;;  %v1869_v26 = vadd.f32 %v1868_v10, %v1867_v1  ;;  %v2576_v57 = vsub.s32 3, %v3943_v12  ;;  %v4427_v37 = vld [vmem:[%s3855_s21 + $0x60] sm:$0xff]  ;;  %v4437_v42 = vld [vmem:[%s3855_s21 + $0x70] sm:$0xff]  ;;  %v4472_v58 = vld [vmem:[%s3855_s21 + $0xa8] sm:$0xff] }
 0x2a7   : > { %v1878_v51 = vunpack.c.l.bf16 %v4372_v5  ;;  %v1879_v38 = vunpack.c.h.bf16 %v4372_v5  ;;  %v1880_v61 = vunpack.c.l.bf16 %v4377_v59  ;;  %v1881_v3 = vunpack.c.h.bf16 %v4377_v59  ;;  %5232 = vst [vmem:[#allocation13_spill] sm:$0xff] %v4472_v58  ;;  %v4495_v23 = vld [vmem:[%s3855_s21 + $0xc0] sm:$0xff] }
 0x2a8   : > { %v1863_v9 = vrot.slane %v1862_v55, 1  ;;  %v1870_v15 = vrot.slane %v1869_v26, 1  ;;  %v1882_v12 = vunpack.c.l.bf16 %v4382_v63  ;;  %v1883_v6 = vunpack.c.h.bf16 %v4382_v63  ;;  %5235 = vst [vmem:[#allocation16_spill] sm:$0xff] %v4495_v23 }
 0x2a9   : > { %2503 = vperm.xlu0 %3242, %v1794_v41   ;;  %v4397_v46 = vrot.slane %v2480_v14, %v3946_v17  ;;  %v4400_v11 = vrot.slane %v2480_v14, %v3952_v19  ;;  %v4402_v13 = vrot.slane %v2480_v14, %v2572_v22  ;;  %v4404_v18 = vrot.slane %v2480_v14, %v2576_v57  ;;  %v4412_v41 = vld [vmem:[%s3855_s21 + $0x48] sm:$0xff]  ;;  %v4417_v19 = vld [vmem:[%s3855_s21 + $0x50] sm:$0xff]  ;;  %v4462_v14 = vld [vmem:[%s3855_s21 + $0x98] sm:$0xff] }
 0x2aa   : > { %2538 = vperm.xlu1 %3243, %v1843_v32   ;;  %v1864_v28 = vadd.f32 %v1863_v9, %v1862_v55  ;;  %v1871_v31 = vadd.f32 %v1870_v15, %v1869_v26  ;;  %v4422_v32 = vld [vmem:[%s3855_s21 + $0x58] sm:$0xff]  ;;  %v4447_v55 = vld [vmem:[%s3855_s21 + $0x80] sm:$0xff]  ;;  %v4501_v15 = vld [vmem:[%s3855_s21 + $0xc8] sm:$0xff]  ;;  %v5242_v59 = vunpack.c.h.bf16 %v4387_v53 }
 0x2ab   : > { %5236 = vst [vmem:[#allocation17_spill] sm:$0xff] %v4501_v15 }
 0x2ad   : > { %2508 = vperm.xlu0 %3242, %v1801_v56  }
 0x2ae   : > { %2013 = vperm.xlu1 %3243, %v1743_v0   ;;  %v1877_v0 = vunpack.c.h.bf16 %v4362_v45 }
 0x2b1   : > { %2513 = vperm.xlu0 %3242, %v1808_v27  }
 0x2b2   : > { %2543 = vperm.xlu1 %3243, %v1850_v24   ;;  %v4477_v24 = vld [vmem:[%s3855_s21 + $0xb0] sm:$0xff] }
 0x2b3   : > { %5233 = vst [vmem:[#allocation14_spill] sm:$0xff] %v4477_v24 }
 0x2b5   : > { %2518 = vperm.xlu0 %3242, %v1815_v34   ;;  %v4467_v34 = vld [vmem:[%s3855_s21 + $0xa0] sm:$0xff] }
 0x2b6   : > { %2548 = vperm.xlu1 %3243, %v1857_v20   ;;  %v4452_v20 = vld [vmem:[%s3855_s21 + $0x88] sm:$0xff]  ;;  %5231 = vst [vmem:[#allocation12_spill] sm:$0xff] %v4467_v34 }
 0x2ba   : > { %2553 = vperm.xlu1 %3243, %v1864_v28   ;;  %v4457_v28 = vld [vmem:[%s3855_s21 + $0x90] sm:$0xff] }
 0x2be   : > { %2558 = vperm.xlu1 %3243, %v1871_v31   ;;  %v4490_v31 = vld [vmem:[%s3855_s21 + $0xb8] sm:$0xff] }
 0x2bf   : > { %5234 = vst [vmem:[#allocation15_spill] sm:$0xff] %v4490_v31 }
 0x2db   : > { %v1939_v9 = vpop.permute.xlu1 %1938 }
 0x2dc   : > { %v2016_v57 = vmul.f32 %v1939_v9, %v1872_v50  ;;  %v2017_v10 = vmul.f32 %v1939_v9, %v1873_v62  ;;  %v2018_v26 = vmul.f32 %v1939_v9, %v1874_v52  ;;  %v2019_v27 = vmul.f32 %v1939_v9, %v1875_v48 }
 0x2de   : > { %v2080_v50 = vrot.slane %v2016_v57, 4  ;;  %v2086_v62 = vrot.slane %v2017_v10, 4  ;;  %v2092_v21 = vrot.slane %v2018_v26, 4  ;;  %v2098_v52 = vsel %vm904_vm0, %v2019_v27, 0.0  ;;  %v1944_v48 = vpop.permute.xlu0 %1943 }
 0x2df   : > { %v2099_v44 = vrot.slane %v2098_v52, 4  ;;  %v2020_v39 = vmul.f32 %v1944_v48, %v1876_v2  ;;  %v2021_v27 = vmul.f32 %v1944_v48, %v1877_v0  ;;  %v2022_v9 = vmul.f32 %v1944_v48, %v1878_v51 }
 0x2e0   : > { %v2081_v40 = vadd.f32 %v2080_v50, %v2016_v57  ;;  %v2087_v56 = vadd.f32 %v2086_v62, %v2017_v10  ;;  %v2093_v60 = vadd.f32 %v2092_v21, %v2018_v26  ;;  %v2023_v33 = vmul.f32 %v1944_v48, %v1879_v38  ;;  %v4519_v26 = vld [vmem:[%s3855_s21 + $0xd8] sm:$0xff]  ;;  %v4525_v62 = vld [vmem:[%s3855_s21 + $0xe0] sm:$0xff] }
 0x2e1   : > { %v2100_v54 = vadd.f32 %v2099_v44, %v2098_v52  ;;  %v2105_v1 = vrot.slane %v2020_v39, 4  ;;  %5238 = vst [vmem:[#allocation19_spill] sm:$0xff] %v4519_v26  ;;  %v2111_v45 = vrot.slane %v2021_v27, 4  ;;  %v2117_v0 = vrot.slane %v2022_v9, 4  ;;  %5239 = vst [vmem:[#allocation20_spill] sm:$0xff] %v4525_v62 }
 0x2e2   : > { %v2123_v57 = vsel %vm904_vm0, %v2023_v33, 0.0  ;;  %v2082_v50 = vrot.slane %v2081_v40, 2  ;;  %v2088_v5 = vrot.slane %v2087_v56, 2  ;;  %v2094_v44 = vrot.slane %v2093_v60, 2 }
 0x2e3   : > { %v2106_v38 = vadd.f32 %v2105_v1, %v2020_v39  ;;  %v2101_v48 = vrot.slane %v2100_v54, 2  ;;  %v2112_v21 = vadd.f32 %v2111_v45, %v2021_v27  ;;  %v2118_v10 = vadd.f32 %v2117_v0, %v2022_v9 }
 0x2e4   : > { %v1949_v22 = vpop.permute.xlu1 %1948  ;;  %v2124_v2 = vrot.slane %v2123_v57, 4  ;;  %v2083_v43 = vadd.f32 %v2082_v50, %v2081_v40  ;;  %v2095_v35 = vadd.f32 %v2094_v44, %v2093_v60  ;;  %v5241_v62 = vunpack.c.l.bf16 %v4387_v53 }
 0x2e5   : > { %v2024_v7 = vmul.f32 %v1949_v22, %v1880_v61  ;;  %v2025_v33 = vmul.f32 %v1949_v22, %v1881_v3  ;;  %v2026_v39 = vmul.f32 %v1949_v22, %v1882_v12  ;;  %v2107_v1 = vrot.slane %v2106_v38, 2 }
 0x2e6   : > { %v2113_v51 = vrot.slane %v2112_v21, 2  ;;  %v2119_v17 = vrot.slane %v2118_v10, 2  ;;  %v2027_v52 = vmul.f32 %v1949_v22, %v1883_v6  ;;  %v2089_v12 = vadd.f32 %v2088_v5, %v2087_v56 }
 0x2e7   : > { %v2130_v27 = vrot.slane %v2024_v7, 4  ;;  %v2136_v9 = vrot.slane %v2025_v33, 4  ;;  %v2142_v45 = vrot.slane %v2026_v39, 4  ;;  %v2125_v4 = vadd.f32 %v2124_v2, %v2123_v57 }
 0x2e8   : > { %v2148_v61 = vsel %vm904_vm0, %v2027_v52, 0.0  ;;  %v2102_v63 = vadd.f32 %v2101_v48, %v2100_v54  ;;  %v2108_v6 = vadd.f32 %v2107_v1, %v2106_v38  ;;  %v2114_v22 = vadd.f32 %v2113_v51, %v2112_v21  ;;  %v1954_v26 = vpop.permute.xlu1 %1953 }
 0x2e9   : > { %v2149_v30 = vrot.slane %v2148_v61, 4  ;;  %v4543_v8 = vadd.f32 %v2119_v17, %v2118_v10  ;;  %v2131_v0 = vadd.f32 %v2130_v27, %v2024_v7  ;;  %v2137_v40 = vadd.f32 %v2136_v9, %v2025_v33 }
 0x2ea   : > { %v2143_v50 = vadd.f32 %v2142_v45, %v2026_v39  ;;  %v2028_v29 = vmul.f32 %v1954_v26, %v5241_v62  ;;  %v2029_v3 = vmul.f32 %v1954_v26, %v5242_v59  ;;  %v5243_v56 = vunpack.c.l.bf16 %v4392_v16 }
 0x2eb   : > { %v2150_v52 = vadd.f32 %v2149_v30, %v2148_v61  ;;  %v5244_v54 = vunpack.c.h.bf16 %v4392_v16  ;;  %v2126_v21 = vrot.slane %v2125_v4, 2  ;;  %v2084_v17 = vrot.slane %v2083_v43, 1 }
 0x2ec   : > { %v2030_v60 = vmul.f32 %v1954_v26, %v5243_v56  ;;  %v2090_v10 = vrot.slane %v2089_v12, 1  ;;  %v2096_v57 = vrot.slane %v2095_v35, 1  ;;  %v2155_v7 = vrot.slane %v2028_v29, 4 }
 0x2ed   : > { %v2031_v2 = vmul.f32 %v1954_v26, %v5244_v54  ;;  %v2161_v51 = vrot.slane %v2029_v3, 4  ;;  %v2132_v38 = vrot.slane %v2131_v0, 2  ;;  %v2138_v62 = vrot.slane %v2137_v40, 2 }
 0x2ee   : > { %v2167_v5 = vrot.slane %v2030_v60, 4  ;;  %v2144_v44 = vrot.slane %v2143_v50, 2  ;;  %v2151_v48 = vrot.slane %v2150_v52, 2  ;;  %v2156_v33 = vadd.f32 %v2155_v7, %v2028_v29 }
 0x2ef   : > { %v2173_v30 = vsel %vm904_vm0, %v2031_v2, 0.0  ;;  %v2162_v39 = vadd.f32 %v2161_v51, %v2029_v3  ;;  %v2103_v16 = vrot.slane %v2102_v63, 1  ;;  %v2109_v26 = vrot.slane %v2108_v6, 1 }
 0x2f0   : > { %v2174_v53 = vrot.slane %v2173_v30, 4  ;;  %v2168_v1 = vadd.f32 %v2167_v5, %v2030_v60  ;;  %v2115_v9 = vrot.slane %v2114_v22, 1  ;;  %v4554_v45 = vadd.f32 %v2126_v21, %v2125_v4 }
 0x2f1   : > { %v2157_v61 = vrot.slane %v2156_v33, 2  ;;  %v2163_v59 = vrot.slane %v2162_v39, 2  ;;  %v4556_v54 = vadd.f32 %v2132_v38, %v2131_v0  ;;  %v4558_v2 = vadd.f32 %v2138_v62, %v2137_v40 }
 0x2f2   : > { %v2175_v27 = vadd.f32 %v2174_v53, %v2173_v30  ;;  %v2169_v56 = vrot.slane %v2168_v1, 2  ;;  %v4560_v25 = vadd.f32 %v2144_v44, %v2143_v50  ;;  %v2484_v23 = vpop.permute.xlu0 %2483  ;;  %v4562_v29 = vadd.f32 %v2151_v48, %v2150_v52 }
 0x2f3   : > { %v2085_v3 = vadd.f32 %v2084_v17, %v2083_v43  ;;  %v2091_v60 = vadd.f32 %v2090_v10, %v2089_v12  ;;  %v2097_v7 = vadd.f32 %v2096_v57, %v2095_v35  ;;  %v2104_v51 = vadd.f32 %v2103_v16, %v2102_v63 }
 0x2f4   : > { %v2176_v15 = vrot.slane %v2175_v27, 2  ;;  %v4564_v5 = vadd.f32 %v2109_v26, %v2108_v6  ;;  %v4566_v4 = vadd.f32 %v2115_v9, %v2114_v22  ;;  %v2121_v21 = vrot.slane %v4543_v8, 1 }
 0x2f5   : > { %v4569_v0 = vadd.f32 %v2157_v61, %v2156_v33  ;;  %v4571_v40 = vadd.f32 %v2163_v59, %v2162_v39  ;;  %v4573_v50 = vadd.f32 %v2169_v56, %v2168_v1  ;;  %v2582_v30 = vmul.f32 %v4397_v46, %v2484_v23 }
 0x2f6   : > { %v4576_v52 = vadd.f32 %v2176_v15, %v2175_v27  ;;  %v2583_v43 = vmul.f32 %v4400_v11, %v2484_v23  ;;  %v2584_v35 = vmul.f32 %v4402_v13, %v2484_v23  ;;  %v2585_v12 = vmul.f32 %v4404_v18, %v2484_v23  ;;  %v1959_v63 = vpop.permute.xlu0 %1958  ;;  %v1964_v6 = vpop.permute.xlu1 %1963 }
 0x2f7   : > { %v5245_v22 = vunpack.c.l.bf16 %v4407_v36  ;;  %v5246_v10 = vunpack.c.h.bf16 %v4407_v36  ;;  %v5247_v38 = vunpack.c.l.bf16 %v4412_v41  ;;  %v5248_v15 = vunpack.c.h.bf16 %v4412_v41 }
 0x2f8   : > { %v5249_v53 = vunpack.c.l.bf16 %v4417_v19  ;;  %v5250_v33 = vunpack.c.h.bf16 %v4417_v19  ;;  %v5251_v39 = vunpack.c.l.bf16 %v4422_v32  ;;  %v5252_v27 = vunpack.c.h.bf16 %v4422_v32 }
 0x2f9   : > { %v2032_v17 = vmul.f32 %v1959_v63, %v5245_v22  ;;  %v2033_v57 = vmul.f32 %v1959_v63, %v5246_v10  ;;  %v2034_v62 = vmul.f32 %v1959_v63, %v5247_v38  ;;  %v2035_v44 = vmul.f32 %v1959_v63, %v5248_v15 }
 0x2fa   : > { %v2036_v48 = vmul.f32 %v1964_v6, %v5249_v53  ;;  %v2037_v23 = vmul.f32 %v1964_v6, %v5250_v33  ;;  %v2038_v1 = vmul.f32 %v1964_v6, %v5251_v39  ;;  %v2039_v16 = vmul.f32 %v1964_v6, %v5252_v27  ;;  %v2489_v34 = vpop.permute.xlu0 %2488 }
 0x2fb   : > { %v2180_v36 = vrot.slane %v2032_v17, 4  ;;  %v2186_v26 = vrot.slane %v2033_v57, 4  ;;  %v2192_v9 = vrot.slane %v2034_v62, 4  ;;  %v2198_v61 = vsel %vm904_vm0, %v2035_v44, 0.0 }
 0x2fc   : > { %v2199_v59 = vrot.slane %v2198_v61, 4  ;;  %v2205_v41 = vrot.slane %v2036_v48, 4  ;;  %v2211_v56 = vrot.slane %v2037_v23, 4  ;;  %v2217_v63 = vrot.slane %v2038_v1, 4 }
 0x2fd   : > { %v2646_v22 = vadd.f32 %v2582_v30, %v2085_v3  ;;  %v2181_v10 = vadd.f32 %v2180_v36, %v2032_v17  ;;  %v2187_v38 = vadd.f32 %v2186_v26, %v2033_v57  ;;  %v2223_v19 = vsel %vm904_vm0, %v2039_v16, 0.0 }
 0x2fe   : > { %v2193_v15 = vadd.f32 %v2192_v9, %v2034_v62  ;;  %v2200_v53 = vadd.f32 %v2199_v59, %v2198_v61  ;;  %v2206_v33 = vadd.f32 %v2205_v41, %v2036_v48  ;;  %v2212_v39 = vadd.f32 %v2211_v56, %v2037_v23  ;;  %v2499_v59 = vpop.permute.xlu1 %2498 }
 0x2ff   : > { %v2182_v32 = vrot.slane %v2181_v10, 2  ;;  %v2218_v6 = vadd.f32 %v2217_v63, %v2038_v1  ;;  %v2224_v27 = vrot.slane %v2223_v19, 4  ;;  %v2122_v31 = vadd.f32 %v2121_v21, %v4543_v8 }
 0x300   : > { %v2647_v24 = vadd.f32 %v2583_v43, %v2091_v60  ;;  %v2188_v44 = vrot.slane %v2187_v38, 2  ;;  %v2128_v58 = vrot.slane %v4554_v45, 1  ;;  %v2159_v3 = vrot.slane %v4569_v0, 1 }
 0x301   : > { %v4602_v30 = vadd.f32 %v2584_v35, %v2097_v7  ;;  %v4604_v17 = vadd.f32 %v2585_v12, %v2104_v51  ;;  %v2225_v57 = vadd.f32 %v2224_v27, %v2223_v19  ;;  %v2165_v62 = vrot.slane %v4571_v40, 1 }
 0x302   : > { %v2194_v48 = vrot.slane %v2193_v15, 2  ;;  %v2201_v23 = vrot.slane %v2200_v53, 2  ;;  %v2207_v1 = vrot.slane %v2206_v33, 2  ;;  %v2213_v16 = vrot.slane %v2212_v39, 2 }
 0x303   : > { %v4607_v8 = vadd.f32 %v2182_v32, %v2181_v10  ;;  %v2219_v60 = vrot.slane %v2218_v6, 2  ;;  %v2586_v21 = vmul.f32 %v4397_v46, %v2489_v34  ;;  %v2587_v43 = vmul.f32 %v4400_v11, %v2489_v34 }
 0x304   : > { %v4611_v36 = vadd.f32 %v2188_v44, %v2187_v38  ;;  %v2129_v7 = vadd.f32 %v2128_v58, %v4554_v45  ;;  %v2588_v51 = vmul.f32 %v4402_v13, %v2489_v34  ;;  %v2589_v35 = vmul.f32 %v4404_v18, %v2489_v34 }
 0x305   : > { %v2226_v12 = vrot.slane %v2225_v57, 2  ;;  %v2650_v26 = vadd.f32 %v2586_v21, %v4564_v5  ;;  %v2651_v9 = vadd.f32 %v2587_v43, %v4566_v4  ;;  %v2171_v61 = vrot.slane %v4573_v50, 1 }
 0x306   : > { %v4619_v41 = vadd.f32 %v2194_v48, %v2193_v15  ;;  %v2652_v56 = vadd.f32 %v2588_v51, %v2122_v31  ;;  %v2653_v63 = vadd.f32 %v2589_v35, %v2129_v7  ;;  %v2178_v10 = vrot.slane %v4576_v52, 1  ;;  %v2494_v15 = vpop.permute.xlu0 %2493 }
 0x307   : > { %v4622_v38 = vadd.f32 %v2201_v23, %v2200_v53  ;;  %v4624_v58 = vadd.f32 %v2207_v1, %v2206_v33  ;;  %v2774_v45 = vrot.slane %v2650_v26, 7  ;;  %v2795_v34 = vrot.slane %v2651_v9, 7 }
 0x308   : > { %v4626_v19 = vadd.f32 %v2213_v16, %v2212_v39  ;;  %v4628_v5 = vadd.f32 %v2219_v60, %v2218_v6  ;;  %v2160_v4 = vadd.f32 %v2159_v3, %v4569_v0  ;;  %v2594_v32 = vmul.f32 %v4397_v46, %v2499_v59 }
 0x309   : > { %5253 = vst [vmem:[#allocation22_spill] sm:$0xff] %v4624_v58  ;;  %v4632_v27 = vadd.f32 %v2226_v12, %v2225_v57  ;;  %v2166_v31 = vadd.f32 %v2165_v62, %v4571_v40  ;;  %v2172_v53 = vadd.f32 %v2171_v61, %v4573_v50  ;;  %v2595_v33 = vmul.f32 %v4400_v11, %v2499_v59 }
 0x30a   : > { %5254 = vst [vmem:[#allocation23_spill] sm:$0xff] %v4626_v19  ;;  %5255 = vst [vmem:[#allocation24_spill] sm:$0xff] %v4628_v5  ;;  %v2809_v44 = vrot.slane %v2652_v56, 7  ;;  %v2823_v48 = vrot.slane %v2653_v63, 7  ;;  %v2179_v39 = vadd.f32 %v2178_v10, %v4576_v52  ;;  %v2596_v6 = vmul.f32 %v4402_v13, %v2499_v59  ;;  %v1969_v52 = vpop.permute.xlu0 %1968 }
 0x30b   : > { %5256 = vst [vmem:[#allocation25_spill] sm:$0xff] %v4632_v27  ;;  %v2776_v23 = vsel %vm2775_vm3, %v2774_v45, %v2646_v22  ;;  %v2796_v0 = vsel %vm2775_vm3, %v2795_v34, %v2647_v24  ;;  %v2134_v3 = vrot.slane %v4556_v54, 1  ;;  %v2140_v57 = vrot.slane %v4558_v2, 1 }
 0x30c   : > { %v2597_v40 = vmul.f32 %v4404_v18, %v2499_v59  ;;  %v4644_v62 = vadd.f32 %v2594_v32, %v2160_v4  ;;  %v2146_v50 = vrot.slane %v4560_v25, 1  ;;  %v2153_v1 = vrot.slane %v4562_v29, 1 }
 0x30d   : > { %v4648_v16 = vadd.f32 %v2595_v33, %v2166_v31  ;;  %v2135_v22 = vadd.f32 %v2134_v3, %v4556_v54  ;;  %v2141_v24 = vadd.f32 %v2140_v57, %v4558_v2  ;;  %v2590_v60 = vmul.f32 %v4397_v46, %v2494_v15  ;;  %v1974_v33 = vpop.permute.xlu1 %1973 }
 0x30e   : > { %v2147_v21 = vadd.f32 %v2146_v50, %v4560_v25  ;;  %v2154_v43 = vadd.f32 %v2153_v1, %v4562_v29  ;;  %v2591_v7 = vmul.f32 %v4400_v11, %v2494_v15  ;;  %v2592_v51 = vmul.f32 %v4402_v13, %v2494_v15 }
 0x30f   : > { %v2593_v35 = vmul.f32 %v4404_v18, %v2494_v15  ;;  %v2654_v12 = vadd.f32 %v2590_v60, %v2135_v22  ;;  %v5257_v26 = vunpack.c.l.bf16 %v4427_v37  ;;  %v5258_v54 = vunpack.c.h.bf16 %v4427_v37 }
 0x310   : > { %v2655_v2 = vadd.f32 %v2591_v7, %v2141_v24  ;;  %v2656_v59 = vadd.f32 %v2592_v51, %v2147_v21  ;;  %v5259_v56 = vunpack.c.l.bf16 %v4432_v47  ;;  %v5260_v29 = vunpack.c.h.bf16 %v4432_v47 }
 0x311   : > { %v2040_v9 = vmul.f32 %v1969_v52, %v5257_v26  ;;  %v2041_v61 = vmul.f32 %v1969_v52, %v5258_v54  ;;  %v4666_v10 = vadd.f32 %v2596_v6, %v2172_v53  ;;  %v2657_v45 = vadd.f32 %v2593_v35, %v2154_v43  ;;  %v1979_v43 = vpop.permute.xlu0 %1978 }
 0x312   : > { %v2042_v25 = vmul.f32 %v1969_v52, %v5259_v56  ;;  %v2043_v63 = vmul.f32 %v1969_v52, %v5260_v29  ;;  %v2810_v32 = vsel %vm2775_vm3, %v2809_v44, %v4602_v30  ;;  %v2824_v37 = vsel %vm2775_vm3, %v2823_v48, %v4604_v17 }
 0x313   : > { %v2230_v34 = vrot.slane %v2040_v9, 4  ;;  %v2236_v4 = vrot.slane %v2041_v61, 4  ;;  %v4673_v3 = vadd.f32 %v2597_v40, %v2179_v39  ;;  %v2777_v57 = vrot.slane %v2654_v12, 6 }
 0x314   : > { %v2242_v15 = vrot.slane %v2042_v25, 4  ;;  %v2248_v31 = vsel %vm904_vm0, %v2043_v63, 0.0  ;;  %v2797_v6 = vrot.slane %v2655_v2, 6  ;;  %v2811_v1 = vrot.slane %v2656_v59, 6 }
 0x315   : > { %v2231_v47 = vadd.f32 %v2230_v34, %v2040_v9  ;;  %v2237_v50 = vadd.f32 %v2236_v4, %v2041_v61  ;;  %v2249_v52 = vrot.slane %v2248_v31, 4  ;;  %v2825_v44 = vrot.slane %v2657_v45, 6  ;;  %v1984_v4 = vpop.permute.xlu1 %1983 }
 0x316   : > { %v5261_v17 = vunpack.c.l.bf16 %v4437_v42  ;;  %v2243_v39 = vadd.f32 %v2242_v15, %v2042_v25  ;;  %v5262_v40 = vunpack.c.h.bf16 %v4437_v42  ;;  %v4684_v51 = vsel %vm2778_vm4, %v2777_v57, %v2776_v23 }
 0x317   : > { %v2232_v24 = vrot.slane %v2231_v47, 2  ;;  %v2238_v60 = vrot.slane %v2237_v50, 2  ;;  %v5263_v35 = vunpack.c.l.bf16 %v4442_v49  ;;  %v5264_v26 = vunpack.c.h.bf16 %v4442_v49 }
 0x318   : > { %v2044_v48 = vmul.f32 %v1974_v33, %v5261_v17  ;;  %v2045_v21 = vmul.f32 %v1974_v33, %v5262_v40  ;;  %v4691_v54 = vsel %vm2778_vm4, %v2797_v6, %v2796_v0  ;;  %v4694_v61 = vsel %vm2778_vm4, %v2811_v1, %v2810_v32 }
 0x319   : > { %v2046_v12 = vmul.f32 %v1974_v33, %v5263_v35  ;;  %v2047_v9 = vmul.f32 %v1974_v33, %v5264_v26  ;;  %v2250_v42 = vadd.f32 %v2249_v52, %v2248_v31  ;;  %v4697_v59 = vsel %vm2778_vm4, %v2825_v44, %v2824_v37 }
 0x31a   : > { %v2255_v2 = vrot.slane %v2044_v48, 4  ;;  %v5265_v56 = vunpack.c.l.bf16 %v4447_v55  ;;  %v5266_v29 = vunpack.c.h.bf16 %v4447_v55  ;;  %v4704_v63 = vadd.f32 %v2232_v24, %v2231_v47 }
 0x31b   : > { %v2273_v23 = vsel %vm904_vm0, %v2047_v9, 0.0  ;;  %v4706_v0 = vadd.f32 %v2238_v60, %v2237_v50  ;;  %v2244_v45 = vrot.slane %v2243_v39, 2  ;;  %v2261_v34 = vrot.slane %v2045_v21, 4 }
 0x31c   : > { %v2048_v25 = vmul.f32 %v1979_v43, %v5265_v56  ;;  %v2049_v49 = vmul.f32 %v1979_v43, %v5266_v29  ;;  %5267 = vst [vmem:[#allocation26_spill] sm:$0xff] %v4704_v63  ;;  %v2267_v32 = vrot.slane %v2046_v12, 4  ;;  %v5269_v15 = vunpack.c.l.bf16 %v4452_v20 }
 0x31d   : > { %5268 = vst [vmem:[#allocation27_spill] sm:$0xff] %v4706_v0  ;;  %v5270_v31 = vunpack.c.h.bf16 %v4452_v20  ;;  %v2251_v6 = vrot.slane %v2250_v42, 2  ;;  %v4712_v1 = vadd.f32 %v2255_v2, %v2044_v48  ;;  %v2274_v55 = vrot.slane %v2273_v23, 4 }
 0x31e   : > { %v2050_v37 = vmul.f32 %v1979_v43, %v5269_v15  ;;  %v2280_v57 = vrot.slane %v2048_v25, 4  ;;  %v2286_v52 = vrot.slane %v2049_v49, 4  ;;  %v5272_v17 = vunpack.c.l.bf16 %v4457_v28 }
 0x31f   : > { %v2051_v33 = vmul.f32 %v1979_v43, %v5270_v31  ;;  %5271 = vst [vmem:[#allocation28_spill] sm:$0xff] %v4712_v1  ;;  %v4717_v60 = vadd.f32 %v2261_v34, %v2045_v21  ;;  %v5274_v20 = vunpack.c.h.bf16 %v4457_v28  ;;  %v4721_v26 = vadd.f32 %v2267_v32, %v2046_v12  ;;  %v1994_v32 = vpop.permute.xlu1 %1993 }
 0x320   : > { %v2281_v47 = vadd.f32 %v2280_v57, %v2048_v25  ;;  %v2292_v44 = vrot.slane %v2050_v37, 4  ;;  %v2052_v24 = vmul.f32 %v1984_v4, %v5272_v17  ;;  %v2287_v40 = vadd.f32 %v2286_v52, %v2049_v49  ;;  %v1989_v49 = vpop.permute.xlu0 %1988 }
 0x321   : > { %v2298_v50 = vsel %vm904_vm0, %v2051_v33, 0.0  ;;  %5273 = vst [vmem:[#allocation29_spill] sm:$0xff] %v4717_v60  ;;  %v2053_v43 = vmul.f32 %v1984_v4, %v5274_v20  ;;  %5275 = vst [vmem:[#allocation30_spill] sm:$0xff] %v4721_v26  ;;  %v5276_v9 = vunpack.c.l.bf16 %v4462_v14  ;;  %v5277_v56 = vunpack.c.h.bf16 %v4462_v14 }
 0x322   : > { %v2299_v35 = vrot.slane %v2298_v50, 4  ;;  %v2293_v48 = vadd.f32 %v2292_v44, %v2050_v37  ;;  %v4727_v29 = vadd.f32 %v2244_v45, %v2243_v39  ;;  %v4729_v15 = vadd.f32 %v2274_v55, %v2273_v23 }
 0x323   : > { %v2054_v2 = vmul.f32 %v1984_v4, %v5276_v9  ;;  %v2055_v25 = vmul.f32 %v1984_v4, %v5277_v56  ;;  %v2282_v21 = vrot.slane %v2281_v47, 2  ;;  %v2288_v34 = vrot.slane %v2287_v40, 2  ;;  %v5281_v4 = vld [vmem:[#allocation12_spill] sm:$0xff]  ;;  %v5284_v9 = vld [vmem:[#allocation13_spill] sm:$0xff] }
 0x324   : > { %5278 = vst [vmem:[#allocation31_spill] sm:$0xff] %v4727_v29  ;;  %5279 = vst [vmem:[#allocation32_spill] sm:$0xff] %v4729_v15  ;;  %v4731_v31 = vadd.f32 %v2251_v6, %v2250_v42  ;;  %v2300_v28 = vadd.f32 %v2299_v35, %v2298_v50  ;;  %v2305_v33 = vrot.slane %v2052_v24, 4  ;;  %v2294_v57 = vrot.slane %v2293_v48, 2 }
 0x325   : > { %v2323_v12 = vsel %vm904_vm0, %v2055_v25, 0.0  ;;  %v2311_v14 = vrot.slane %v2053_v43, 4  ;;  %v2317_v45 = vrot.slane %v2054_v2, 4  ;;  %v5282_v55 = vunpack.c.l.bf16 %v5281_v4 }
 0x326   : > { %5280 = vst [vmem:[#allocation33_spill] sm:$0xff] %v4731_v31  ;;  %v2324_v23 = vrot.slane %v2323_v12, 4  ;;  %v2283_v6 = vadd.f32 %v2282_v21, %v2281_v47  ;;  %v2289_v44 = vadd.f32 %v2288_v34, %v2287_v40  ;;  %v5283_v50 = vunpack.c.h.bf16 %v5281_v4 }
 0x327   : > { %v2056_v52 = vmul.f32 %v1989_v49, %v5282_v55  ;;  %v2301_v35 = vrot.slane %v2300_v28, 2  ;;  %v2306_v20 = vadd.f32 %v2305_v33, %v2052_v24  ;;  %v5285_v56 = vunpack.c.l.bf16 %v5284_v9  ;;  %v5287_v24 = vld [vmem:[#allocation14_spill] sm:$0xff] }
 0x328   : > { %v2057_v17 = vmul.f32 %v1989_v49, %v5283_v50  ;;  %v5286_v37 = vunpack.c.h.bf16 %v5284_v9  ;;  %v2295_v7 = vadd.f32 %v2294_v57, %v2293_v48  ;;  %v2312_v30 = vadd.f32 %v2311_v14, %v2053_v43  ;;  %v5290_v48 = vld [vmem:[#allocation15_spill] sm:$0xff] }
 0x329   : > { %v2058_v25 = vmul.f32 %v1989_v49, %v5285_v56  ;;  %v2330_v22 = vrot.slane %v2056_v52, 4  ;;  %v2318_v53 = vadd.f32 %v2317_v45, %v2054_v2  ;;  %v2325_v42 = vadd.f32 %v2324_v23, %v2323_v12 }
 0x32a   : > { %v2059_v39 = vmul.f32 %v1989_v49, %v5286_v37  ;;  %v2336_v55 = vrot.slane %v2057_v17, 4  ;;  %v5288_v33 = vunpack.c.l.bf16 %v5287_v24  ;;  %v2302_v56 = vadd.f32 %v2301_v35, %v2300_v28 }
 0x32b   : > { %v2342_v47 = vrot.slane %v2058_v25, 4  ;;  %v2331_v21 = vadd.f32 %v2330_v22, %v2056_v52  ;;  %v5289_v49 = vunpack.c.h.bf16 %v5287_v24  ;;  %v5291_v43 = vunpack.c.l.bf16 %v5290_v48 }
 0x32c   : > { %v2348_v40 = vsel %vm904_vm0, %v2059_v39, 0.0  ;;  %v2337_v34 = vadd.f32 %v2336_v55, %v2057_v17  ;;  %v2060_v50 = vmul.f32 %v1994_v32, %v5288_v33  ;;  %v2307_v14 = vrot.slane %v2306_v20, 2 }
 0x32d   : > { %v2349_v4 = vrot.slane %v2348_v40, 4  ;;  %v2343_v15 = vadd.f32 %v2342_v47, %v2058_v25  ;;  %v2061_v37 = vmul.f32 %v1994_v32, %v5289_v49  ;;  %v2062_v57 = vmul.f32 %v1994_v32, %v5291_v43 }
 0x32e   : > { %v2313_v2 = vrot.slane %v2312_v30, 2  ;;  %v5292_v45 = vunpack.c.h.bf16 %v5290_v48  ;;  %v2319_v22 = vrot.slane %v2318_v53, 2  ;;  %v2355_v23 = vrot.slane %v2060_v50, 4 }
 0x32f   : > { %v2350_v12 = vadd.f32 %v2349_v4, %v2348_v40  ;;  %v2361_v52 = vrot.slane %v2061_v37, 4  ;;  %v2367_v17 = vrot.slane %v2062_v57, 4  ;;  %v2326_v9 = vrot.slane %v2325_v42, 2  ;;  %v2524_v4 = vpop.permute.xlu0 %2523 }
 0x330   : > { %v2063_v39 = vmul.f32 %v1994_v32, %v5292_v45  ;;  %v2332_v55 = vrot.slane %v2331_v21, 2  ;;  %v2338_v28 = vrot.slane %v2337_v34, 2  ;;  %v2344_v25 = vrot.slane %v2343_v15, 2 }
 0x331   : > { %v2356_v47 = vadd.f32 %v2355_v23, %v2060_v50  ;;  %v2362_v24 = vadd.f32 %v2361_v52, %v2061_v37  ;;  %v2368_v33 = vadd.f32 %v2367_v17, %v2062_v57  ;;  %v2351_v49 = vrot.slane %v2350_v12, 2 }
 0x332   : > { %v2373_v35 = vsel %vm904_vm0, %v2063_v39, 0.0  ;;  %v2284_v26 = vrot.slane %v2283_v6, 1  ;;  %v2290_v40 = vrot.slane %v2289_v44, 1  ;;  %v2308_v48 = vadd.f32 %v2307_v14, %v2306_v20 }
 0x333   : > { %v2374_v43 = vrot.slane %v2373_v35, 4  ;;  %v2314_v32 = vadd.f32 %v2313_v2, %v2312_v30  ;;  %v2357_v45 = vrot.slane %v2356_v47, 2  ;;  %v2363_v60 = vrot.slane %v2362_v24, 2  ;;  %v2529_v2 = vpop.permute.xlu1 %2528  ;;  %v1999_v17 = vpop.permute.xlu0 %1998 }
 0x334   : > { %v2320_v1 = vadd.f32 %v2319_v22, %v2318_v53  ;;  %v2369_v31 = vrot.slane %v2368_v33, 2  ;;  %v2296_v0 = vrot.slane %v2295_v7, 1  ;;  %v2327_v63 = vadd.f32 %v2326_v9, %v2325_v42 }
 0x335   : > { %v2375_v29 = vadd.f32 %v2374_v43, %v2373_v35  ;;  %v4756_v27 = vadd.f32 %v2332_v55, %v2331_v21  ;;  %v4758_v39 = vadd.f32 %v2338_v28, %v2337_v34  ;;  %v2303_v50 = vrot.slane %v2302_v56, 1  ;;  %v5293_v35 = vld [vmem:[#allocation16_spill] sm:$0xff] }
 0x336   : > { %v4760_v37 = vadd.f32 %v2344_v25, %v2343_v15  ;;  %v4762_v57 = vadd.f32 %v2351_v49, %v2350_v12  ;;  %v2285_v23 = vadd.f32 %v2284_v26, %v2283_v6  ;;  %v2291_v52 = vadd.f32 %v2290_v40, %v2289_v44  ;;  %v5296_v49 = vld [vmem:[#allocation17_spill] sm:$0xff] }
 0x337   : > { %v4764_v20 = vadd.f32 %v2357_v45, %v2356_v47  ;;  %v4766_v30 = vadd.f32 %v2363_v60, %v2362_v24  ;;  %v2309_v53 = vrot.slane %v2308_v48, 1  ;;  %v2315_v14 = vrot.slane %v2314_v32, 1 }
 0x338   : > { %v4768_v22 = vadd.f32 %v2369_v31, %v2368_v33  ;;  %v2376_v42 = vrot.slane %v2375_v29, 2  ;;  %v2297_v21 = vadd.f32 %v2296_v0, %v2295_v7  ;;  %v2321_v34 = vrot.slane %v2320_v1, 1 }
 0x339   : > { %v2304_v9 = vadd.f32 %v2303_v50, %v2302_v56  ;;  %v2614_v15 = vmul.f32 %v4397_v46, %v2524_v4  ;;  %v2310_v12 = vadd.f32 %v2309_v53, %v2308_v48  ;;  %v2316_v55 = vadd.f32 %v2315_v14, %v2314_v32 }
 0x33a   : > { %v2322_v26 = vadd.f32 %v2321_v34, %v2320_v1  ;;  %v2328_v6 = vrot.slane %v2327_v63, 1  ;;  %v2618_v44 = vmul.f32 %v4397_v46, %v2529_v2  ;;  %v2619_v60 = vmul.f32 %v4400_v11, %v2529_v2 }
 0x33b   : > { %v2615_v28 = vmul.f32 %v4400_v11, %v2524_v4  ;;  %v2620_v31 = vmul.f32 %v4402_v13, %v2529_v2  ;;  %v5294_v25 = vunpack.c.l.bf16 %v5293_v35  ;;  %v5295_v0 = vunpack.c.h.bf16 %v5293_v35 }
 0x33c   : > { %v2329_v47 = vadd.f32 %v2328_v6, %v2327_v63  ;;  %v2682_v24 = vadd.f32 %v2618_v44, %v2310_v12  ;;  %v2683_v33 = vadd.f32 %v2619_v60, %v2316_v55  ;;  %v5297_v1 = vunpack.c.l.bf16 %v5296_v49  ;;  %v2004_v6 = vpop.permute.xlu1 %2003 }
 0x33d   : > { %v2064_v7 = vmul.f32 %v1999_v17, %v5294_v25  ;;  %v2065_v56 = vmul.f32 %v1999_v17, %v5295_v0  ;;  %v2621_v40 = vmul.f32 %v4404_v18, %v2529_v2  ;;  %v2684_v48 = vadd.f32 %v2620_v31, %v2322_v26 }
 0x33e   : > { %v2066_v43 = vmul.f32 %v1999_v17, %v5297_v1  ;;  %v5298_v32 = vunpack.c.h.bf16 %v5296_v49  ;;  %v2616_v53 = vmul.f32 %v4402_v13, %v2524_v4  ;;  %v2617_v14 = vmul.f32 %v4404_v18, %v2524_v4 }
 0x33f   : > { %v2380_v50 = vrot.slane %v2064_v7, 4  ;;  %v2837_v34 = vrot.slane %v2682_v24, 7  ;;  %v2386_v35 = vrot.slane %v2065_v56, 4  ;;  %v2685_v25 = vadd.f32 %v2621_v40, %v2329_v47  ;;  %v5299_v24 = vld [vmem:[#allocation18_spill] sm:$0xff] }
 0x340   : > { %v2067_v45 = vmul.f32 %v1999_v17, %v5298_v32  ;;  %v2851_v63 = vrot.slane %v2683_v33, 7  ;;  %v2392_v12 = vrot.slane %v2066_v43, 4  ;;  %v4787_v44 = vadd.f32 %v2376_v42, %v2375_v29  ;;  %v5302_v42 = vld [vmem:[#allocation19_spill] sm:$0xff] }
 0x341   : > { %v2678_v2 = vadd.f32 %v2614_v15, %v2285_v23  ;;  %v2679_v26 = vadd.f32 %v2615_v28, %v2291_v52  ;;  %v2865_v60 = vrot.slane %v2684_v48, 7  ;;  %v2680_v31 = vadd.f32 %v2616_v53, %v2297_v21 }
 0x342   : > { %v2398_v55 = vsel %vm904_vm0, %v2067_v45, 0.0  ;;  %v2681_v17 = vadd.f32 %v2617_v14, %v2304_v9  ;;  %v2381_v0 = vadd.f32 %v2380_v50, %v2064_v7  ;;  %v2387_v4 = vadd.f32 %v2386_v35, %v2065_v56  ;;  %v2009_v45 = vpop.permute.xlu0 %2008  ;;  %v5305_v14 = vld [vmem:[#allocation20_spill] sm:$0xff] }
 0x343   : > { %v2399_v49 = vrot.slane %v2398_v55, 4  ;;  %v4790_v1 = vsel %vm2775_vm3, %v2837_v34, %v2678_v2  ;;  %v5300_v47 = vunpack.c.l.bf16 %v5299_v24  ;;  %v5301_v40 = vunpack.c.h.bf16 %v5299_v24 }
 0x344   : > { %v4797_v29 = vsel %vm2775_vm3, %v2851_v63, %v2679_v26  ;;  %v2879_v23 = vrot.slane %v2685_v25, 7  ;;  %v2393_v52 = vadd.f32 %v2392_v12, %v2066_v43  ;;  %v5303_v21 = vunpack.c.l.bf16 %v5302_v42  ;;  %v5308_v26 = vld [vmem:[#allocation21_spill] sm:$0xff] }
 0x345   : > { %v2068_v33 = vmul.f32 %v2004_v6, %v5300_v47  ;;  %v2069_v32 = vmul.f32 %v2004_v6, %v5301_v40  ;;  %v4802_v15 = vsel %vm2775_vm3, %v2865_v60, %v2680_v31  ;;  %v2400_v28 = vadd.f32 %v2399_v49, %v2398_v55 }
 0x346   : > { %v2070_v9 = vmul.f32 %v2004_v6, %v5303_v21  ;;  %v5304_v7 = vunpack.c.h.bf16 %v5302_v42  ;;  %v5306_v34 = vunpack.c.l.bf16 %v5305_v14  ;;  %v5307_v63 = vunpack.c.h.bf16 %v5305_v14 }
 0x347   : > { %v2405_v48 = vrot.slane %v2068_v33, 4  ;;  %v2411_v50 = vrot.slane %v2069_v32, 4  ;;  %v2382_v43 = vrot.slane %v2381_v0, 2  ;;  %v2388_v12 = vrot.slane %v2387_v4, 2 }
 0x348   : > { %v2071_v56 = vmul.f32 %v2004_v6, %v5304_v7  ;;  %v2417_v53 = vrot.slane %v2070_v9, 4  ;;  %v2072_v35 = vmul.f32 %v2009_v45, %v5306_v34  ;;  %v2073_v25 = vmul.f32 %v2009_v45, %v5307_v63 }
 0x349   : > { %v5309_v60 = vunpack.c.l.bf16 %v5308_v26  ;;  %v4814_v55 = vsel %vm2775_vm3, %v2879_v23, %v2681_v17  ;;  %v2394_v6 = vrot.slane %v2393_v52, 2  ;;  %v5310_v24 = vunpack.c.h.bf16 %v5308_v26 }
 0x34a   : > { %v2423_v2 = vsel %vm904_vm0, %v2071_v56, 0.0  ;;  %v2401_v40 = vrot.slane %v2400_v28, 2  ;;  %v2406_v42 = vadd.f32 %v2405_v48, %v2068_v33  ;;  %v2430_v21 = vrot.slane %v2072_v35, 4 }
 0x34b   : > { %v2074_v31 = vmul.f32 %v2009_v45, %v5309_v60  ;;  %v2424_v49 = vrot.slane %v2423_v2, 4  ;;  %v2075_v47 = vmul.f32 %v2009_v45, %v5310_v24  ;;  %v2436_v7 = vrot.slane %v2073_v25, 4 }
 0x34c   : > { %v2412_v14 = vadd.f32 %v2411_v50, %v2069_v32  ;;  %v2418_v34 = vadd.f32 %v2417_v53, %v2070_v9  ;;  %v4819_v5 = vadd.f32 %v2382_v43, %v2381_v0  ;;  %v2431_v19 = vadd.f32 %v2430_v21, %v2072_v35  ;;  %v2534_v53 = vpop.permute.xlu1 %2533 }
 0x34d   : > { %v2442_v63 = vrot.slane %v2074_v31, 4  ;;  %v2448_v56 = vsel %vm904_vm0, %v2075_v47, 0.0  ;;  %v2425_v60 = vadd.f32 %v2424_v49, %v2423_v2  ;;  %v2437_v17 = vadd.f32 %v2436_v7, %v2073_v25 }
 0x34e   : > { %v4821_v23 = vadd.f32 %v2388_v12, %v2387_v4  ;;  %v4823_v58 = vadd.f32 %v2394_v6, %v2393_v52  ;;  %v2449_v45 = vrot.slane %v2448_v56, 4  ;;  %v4825_v24 = vadd.f32 %v2401_v40, %v2400_v28 }
 0x34f   : > { %v2443_v26 = vadd.f32 %v2442_v63, %v2074_v31  ;;  %v2407_v33 = vrot.slane %v2406_v42, 2  ;;  %v2334_v32 = vrot.slane %v4756_v27, 1  ;;  %v2340_v9 = vrot.slane %v4758_v39, 1 }
 0x350   : > { %5311 = vst [vmem:[#allocation12_spill] sm:$0xff] %v4823_v58  ;;  %5312 = vst [vmem:[#allocation13_spill] sm:$0xff] %v4825_v24  ;;  %v2413_v48 = vrot.slane %v2412_v14, 2  ;;  %v2419_v50 = vrot.slane %v2418_v34, 2  ;;  %v2450_v0 = vadd.f32 %v2449_v45, %v2448_v56  ;;  %v2346_v35 = vrot.slane %v4760_v37, 1 }
 0x351   : > { %v2426_v25 = vrot.slane %v2425_v60, 2  ;;  %v2432_v4 = vrot.slane %v2431_v19, 2  ;;  %v2438_v43 = vrot.slane %v2437_v17, 2  ;;  %v2444_v52 = vrot.slane %v2443_v26, 2 }
 0x352   : > { %v2335_v12 = vadd.f32 %v2334_v32, %v4756_v27  ;;  %v2341_v28 = vadd.f32 %v2340_v9, %v4758_v39  ;;  %v2347_v2 = vadd.f32 %v2346_v35, %v4760_v37  ;;  %v2353_v31 = vrot.slane %v4762_v57, 1 }
 0x353   : > { %v2622_v6 = vmul.f32 %v4397_v46, %v2534_v53  ;;  %v2623_v49 = vmul.f32 %v4400_v11, %v2534_v53  ;;  %v2624_v47 = vmul.f32 %v4402_v13, %v2534_v53  ;;  %v2625_v40 = vmul.f32 %v4404_v18, %v2534_v53 }
 0x354   : > { %v2451_v21 = vrot.slane %v2450_v0, 2  ;;  %v2354_v7 = vadd.f32 %v2353_v31, %v4762_v57  ;;  %v2184_v63 = vrot.slane %v4607_v8, 1  ;;  %v2190_v27 = vrot.slane %v4611_v36, 1 }
 0x355   : > { %v2686_v39 = vadd.f32 %v2622_v6, %v2335_v12  ;;  %v2687_v56 = vadd.f32 %v2623_v49, %v2341_v28  ;;  %v2688_v37 = vadd.f32 %v2624_v47, %v2347_v2  ;;  %v2196_v45 = vrot.slane %v4619_v41, 1  ;;  %v2504_v12 = vpop.permute.xlu0 %2503 }
 0x356   : > { %v4842_v32 = vadd.f32 %v2407_v33, %v2406_v42  ;;  %v4844_v9 = vadd.f32 %v2413_v48, %v2412_v14  ;;  %v2689_v35 = vadd.f32 %v2625_v40, %v2354_v7  ;;  %v2203_v24 = vrot.slane %v4622_v38, 1 }
 0x357   : > { %v4847_v53 = vadd.f32 %v2419_v50, %v2418_v34  ;;  %v4849_v58 = vadd.f32 %v2426_v25, %v2425_v60  ;;  %v4851_v57 = vadd.f32 %v2432_v4, %v2431_v19  ;;  %v4853_v31 = vadd.f32 %v2438_v43, %v2437_v17 }
 0x358   : > { %v4855_v28 = vadd.f32 %v2444_v52, %v2443_v26  ;;  %v4857_v2 = vadd.f32 %v2451_v21, %v2450_v0  ;;  %v2185_v42 = vadd.f32 %v2184_v63, %v4607_v8  ;;  %v2191_v14 = vadd.f32 %v2190_v27, %v4611_v36  ;;  %v2539_v52 = vpop.permute.xlu1 %2538 }
 0x359   : > { %v2839_v33 = vrot.slane %v2686_v39, 6  ;;  %v2853_v48 = vrot.slane %v2687_v56, 6  ;;  %v2867_v6 = vrot.slane %v2688_v37, 6  ;;  %v2197_v34 = vadd.f32 %v2196_v45, %v4619_v41 }
 0x35a   : > { %v2881_v60 = vrot.slane %v2689_v35, 6  ;;  %v2204_v19 = vadd.f32 %v2203_v24, %v4622_v38  ;;  %v2598_v17 = vmul.f32 %v4397_v46, %v2504_v12  ;;  %v2599_v26 = vmul.f32 %v4400_v11, %v2504_v12 }
 0x35b   : > { %v2600_v50 = vmul.f32 %v4402_v13, %v2504_v12  ;;  %v2601_v0 = vmul.f32 %v4404_v18, %v2504_v12  ;;  %v2359_v8 = vrot.slane %v4764_v20, 1  ;;  %v2365_v36 = vrot.slane %v4766_v30, 1 }
 0x35c   : > { %v5313_v25 = vrot.slane %v4644_v62, 5  ;;  %v5314_v38 = vrot.slane %v4648_v16, 5  ;;  %v2662_v4 = vadd.f32 %v2598_v17, %v2185_v42  ;;  %v2371_v43 = vrot.slane %v4768_v22, 1  ;;  %v5317_v42 = vld [vmem:[#allocation22_spill] sm:$0xff]  ;;  %v5320_v17 = vld [vmem:[#allocation25_spill] sm:$0xff] }
 0x35d   : > { %v4880_v49 = vsel %vm2778_vm4, %v2839_v33, %v4790_v1  ;;  %v4884_v47 = vsel %vm2778_vm4, %v2853_v48, %v4797_v29  ;;  %v4888_v62 = vsel %vm2778_vm4, %v2867_v6, %v4802_v15  ;;  %v5315_v16 = vrot.slane %v4666_v10, 5 }
 0x35e   : > { %v2782_v41 = vsel %vm2781_vm5, %v5313_v25, %v4684_v51  ;;  %v2800_v24 = vsel %vm2781_vm5, %v5314_v38, %v4691_v54  ;;  %v2663_v54 = vadd.f32 %v2599_v26, %v2191_v14  ;;  %v2664_v40 = vadd.f32 %v2600_v50, %v2197_v34  ;;  %v5319_v34 = vld [vmem:[#allocation24_spill] sm:$0xff] }
 0x35f   : > { %v2814_v51 = vsel %vm2781_vm5, %v5315_v16, %v4694_v61  ;;  %v2665_v21 = vadd.f32 %v2601_v0, %v2204_v19  ;;  %v2378_v7 = vrot.slane %v4787_v44, 1  ;;  %v2360_v1 = vadd.f32 %v2359_v8, %v4764_v20 }
 0x360   : > { %v2366_v63 = vadd.f32 %v2365_v36, %v4766_v30  ;;  %v2626_v29 = vmul.f32 %v4397_v46, %v2539_v52  ;;  %v2627_v27 = vmul.f32 %v4400_v11, %v2539_v52  ;;  %v2783_v15 = vrot.slane %v2662_v4, 4 }
 0x361   : > { %v2372_v39 = vadd.f32 %v2371_v43, %v4768_v22  ;;  %v2628_v10 = vmul.f32 %v4402_v13, %v2539_v52  ;;  %v2629_v61 = vmul.f32 %v4404_v18, %v2539_v52  ;;  %v2882_v56 = vsel %vm2778_vm4, %v2881_v60, %v4814_v55  ;;  %v5318_v22 = vld [vmem:[#allocation23_spill] sm:$0xff]  ;;  %v2509_v60 = vpop.permute.xlu0 %2508  ;;  %v2014_v52 = vpop.permute.xlu1 %2013 }
 0x362   : > { %v5316_v37 = vrot.slane %v4673_v3, 5  ;;  %v2690_v30 = vadd.f32 %v2626_v29, %v2360_v1  ;;  %v2691_v45 = vadd.f32 %v2627_v27, %v2366_v63  ;;  %v2379_v35 = vadd.f32 %v2378_v7, %v4787_v44  ;;  %v3526_v63 = vld [vmem:[%s3855_s21 + $0xf8] sm:$0xff] }
 0x363   : > { %v2692_v12 = vadd.f32 %v2628_v10, %v2372_v39  ;;  %v2209_v14 = vrot.slane %v5317_v42, 1  ;;  %v2215_v33 = vrot.slane %v5318_v22, 1  ;;  %v2801_v48 = vrot.slane %v2663_v54, 4  ;;  %v3525_v54 = vld [vmem:[%s3855_s21 + $0xf0] sm:$0xff]  ;;  %s3042_s21 = sshll.u32 %s3851_s13, 6 }
 0x364   : > { %v2828_v20 = vsel %vm2781_vm5, %v5316_v37, %v4697_v59  ;;  %v2815_v6 = vrot.slane %v2664_v40, 4  ;;  %v2221_v19 = vrot.slane %v5319_v34, 1  ;;  %v2228_v55 = vrot.slane %v5320_v17, 1  ;;  %s5040_s20 = scalar_lea.vmem [#allocation8], %s3042_s21 }
 0x365   : > { %v2785_v3 = vsel %vm2784_vm6, %v2783_v15, %v2782_v41  ;;  %v2829_v59 = vrot.slane %v2665_v21, 4  ;;  %v2693_v26 = vadd.f32 %v2629_v61, %v2379_v35  ;;  %v2841_v50 = vrot.slane %v2690_v30, 5 }
 0x366   : > { %v2855_v44 = vrot.slane %v2691_v45, 5  ;;  %v2869_v0 = vrot.slane %v2692_v12, 5  ;;  %v2210_v8 = vadd.f32 %v2209_v14, %v5317_v42  ;;  %v2216_v36 = vadd.f32 %v2215_v33, %v5318_v22 }
 0x367   : > { %v2222_v25 = vadd.f32 %v2221_v19, %v5319_v34  ;;  %v2229_v38 = vadd.f32 %v2228_v55, %v5320_v17  ;;  %v2602_v4 = vmul.f32 %v4397_v46, %v2509_v60  ;;  %v2603_v43 = vmul.f32 %v4400_v11, %v2509_v60 }
 0x368   : > { %v2604_v41 = vmul.f32 %v4402_v13, %v2509_v60  ;;  %v2605_v16 = vmul.f32 %v4404_v18, %v2509_v60  ;;  %v1932_v40 = vunpack.c.l.bf16 %v3525_v54  ;;  %v1933_v21 = vunpack.c.h.bf16 %v3525_v54 }
 0x369   : > { %v2666_v7 = vadd.f32 %v2602_v4, %v2210_v8  ;;  %v2667_v1 = vadd.f32 %v2603_v43, %v2216_v36  ;;  %v1934_v29 = vunpack.c.l.bf16 %v3526_v63  ;;  %v1935_v27 = vunpack.c.h.bf16 %v3526_v63  ;;  %v5324_v8 = vld [vmem:[#allocation33_spill] sm:$0xff]  ;;  %v2544_v63 = vpop.permute.xlu1 %2543 }
 0x36a   : > { %v2668_v15 = vadd.f32 %v2604_v41, %v2222_v25  ;;  %v2669_v39 = vadd.f32 %v2605_v16, %v2229_v38  ;;  %v2076_v10 = vmul.f32 %v2014_v52, %v1932_v40  ;;  %v2077_v61 = vmul.f32 %v2014_v52, %v1933_v21 }
 0x36b   : > { %v2802_v37 = vsel %vm2784_vm6, %v2801_v48, %v2800_v24  ;;  %v2883_v30 = vrot.slane %v2693_v26, 5  ;;  %v2786_v45 = vrot.slane %v2666_v7, 3  ;;  %v2079_v35 = vmul.f32 %v2014_v52, %v1935_v27  ;;  %v5325_v27 = vld [vmem:[#allocation12_spill] sm:$0xff] }
 0x36c   : > { %v2816_v12 = vsel %vm2784_vm6, %v2815_v6, %v2814_v51  ;;  %v2830_v42 = vsel %vm2784_vm6, %v2829_v59, %v2828_v20  ;;  %v2803_v14 = vrot.slane %v2667_v1, 3  ;;  %v2078_v22 = vmul.f32 %v2014_v52, %v1934_v29  ;;  %v5321_v6 = vld [vmem:[#allocation26_spill] sm:$0xff]  ;;  %v5322_v59 = vld [vmem:[#allocation27_spill] sm:$0xff] }
 0x36d   : > { %v4929_v33 = vsel %vm2781_vm5, %v2841_v50, %v4880_v49  ;;  %v2817_v34 = vrot.slane %v2668_v15, 3  ;;  %v2831_v19 = vrot.slane %v2669_v39, 3  ;;  %v2455_v17 = vrot.slane %v2076_v10, 4  ;;  %v2514_v50 = vpop.permute.xlu0 %2513 }
 0x36e   : > { %v4933_v55 = vsel %vm2781_vm5, %v2855_v44, %v4884_v47  ;;  %v4937_v24 = vsel %vm2781_vm5, %v2869_v0, %v4888_v62  ;;  %v2461_v51 = vrot.slane %v2077_v61, 4  ;;  %v2473_v20 = vsel %vm904_vm0, %v2079_v35, 0.0  ;;  %v5323_v62 = vld [vmem:[#allocation31_spill] sm:$0xff] }
 0x36f   : > { %v4941_v48 = vsel %vm2781_vm5, %v2883_v30, %v2882_v56  ;;  %v4944_v49 = vsel %vm2787_vm7, %v2786_v45, %v2785_v3  ;;  %v2234_v60 = vrot.slane %v5321_v6, 1  ;;  %v2240_v26 = vrot.slane %v5322_v59, 1 }
 0x370   : > { %v4949_v47 = vsel %vm2787_vm7, %v2803_v14, %v2802_v37  ;;  %v2467_v44 = vrot.slane %v2078_v22, 4  ;;  %v2246_v0 = vrot.slane %v5323_v62, 1  ;;  %v2253_v36 = vrot.slane %v5324_v8, 1  ;;  %v5326_v37 = vld [vmem:[#allocation13_spill] sm:$0xff] }
 0x371   : > { %v4954_v25 = vsel %vm2787_vm7, %v2817_v34, %v2816_v12  ;;  %v4957_v56 = vsel %vm2787_vm7, %v2831_v19, %v2830_v42  ;;  %v4959_v3 = vadd.f32 %v2455_v17, %v2076_v10  ;;  %v2474_v38 = vrot.slane %v2473_v20, 4 }
 0x372   : > { %v4961_v4 = vadd.f32 %v2461_v51, %v2077_v61  ;;  %v2235_v43 = vadd.f32 %v2234_v60, %v5321_v6  ;;  %v2606_v52 = vmul.f32 %v4397_v46, %v2514_v50  ;;  %v2607_v41 = vmul.f32 %v4400_v11, %v2514_v50  ;;  %v5327_v6 = vld [vmem:[#allocation28_spill] sm:$0xff] }
 0x373   : > { %v2241_v16 = vadd.f32 %v2240_v26, %v5322_v59  ;;  %v2608_v54 = vmul.f32 %v4402_v13, %v2514_v50  ;;  %v2609_v40 = vmul.f32 %v4404_v18, %v2514_v50  ;;  %v2384_v21 = vrot.slane %v4819_v5, 1 }
 0x374   : > { %v2247_v7 = vadd.f32 %v2246_v0, %v5323_v62  ;;  %v2254_v1 = vadd.f32 %v2253_v36, %v5324_v8  ;;  %v2390_v29 = vrot.slane %v4821_v23, 1  ;;  %v2396_v15 = vrot.slane %v5325_v27, 1  ;;  %v5333_v8 = vld [vmem:[#allocation32_spill] sm:$0xff] }
 0x375   : > { %v4974_v39 = vadd.f32 %v2467_v44, %v2078_v22  ;;  %v4976_v10 = vadd.f32 %v2474_v38, %v2473_v20  ;;  %v2670_v61 = vadd.f32 %v2606_v52, %v2235_v43  ;;  %v2403_v30 = vrot.slane %v5326_v37, 1  ;;  %v5331_v44 = vld [vmem:[#allocation30_spill] sm:$0xff] }
 0x376   : > { %v2671_v45 = vadd.f32 %v2607_v41, %v2241_v16  ;;  %v2672_v35 = vadd.f32 %v2608_v54, %v2247_v7  ;;  %v2673_v12 = vadd.f32 %v2609_v40, %v2254_v1  ;;  %v2385_v42 = vadd.f32 %v2384_v21, %v4819_v5  ;;  %v5329_v5 = vld [vmem:[#allocation29_spill] sm:$0xff] }
 0x377   : > { %v2391_v14 = vadd.f32 %v2390_v29, %v4821_v23  ;;  %v2397_v34 = vadd.f32 %v2396_v15, %v5325_v27  ;;  %v2404_v19 = vadd.f32 %v2403_v30, %v5326_v37  ;;  %v2630_v17 = vmul.f32 %v4397_v46, %v2544_v63 }
 0x378   : > { %v2631_v22 = vmul.f32 %v4400_v11, %v2544_v63  ;;  %v2632_v51 = vmul.f32 %v4402_v13, %v2544_v63  ;;  %v2633_v20 = vmul.f32 %v4404_v18, %v2544_v63  ;;  %v5328_v60 = vrot.slane %v5327_v6, 2 }
 0x379   : > { %v4990_v26 = vadd.f32 %v2630_v17, %v2385_v42  ;;  %v5330_v23 = vrot.slane %v5329_v5, 2  ;;  %v5332_v62 = vrot.slane %v5331_v44, 2  ;;  %v5334_v36 = vrot.slane %v5333_v8, 2 }
 0x37a   : > { %v2258_v59 = vadd.f32 %v5328_v60, %v5327_v6  ;;  %v2457_v43 = vrot.slane %v4959_v3, 2  ;;  %v5002_v52 = vadd.f32 %v2631_v22, %v2391_v14  ;;  %v5004_v41 = vadd.f32 %v2632_v51, %v2397_v34  ;;  %v2519_v14 = vpop.permute.xlu0 %2518 }
 0x37b   : > { %v2264_v50 = vadd.f32 %v5330_v23, %v5329_v5  ;;  %v2270_v0 = vadd.f32 %v5332_v62, %v5331_v44  ;;  %v2277_v38 = vadd.f32 %v5334_v36, %v5333_v8  ;;  %v5006_v16 = vadd.f32 %v2633_v20, %v2404_v19  ;;  %v2549_v44 = vpop.permute.xlu1 %2548 }
 0x37c   : > { %v2259_v54 = vrot.slane %v2258_v59, 1  ;;  %v2463_v1 = vrot.slane %v4961_v4, 2  ;;  %v2469_v63 = vrot.slane %v4974_v39, 2  ;;  %v2476_v29 = vrot.slane %v4976_v10, 2 }
 0x37d   : > { %v2265_v40 = vrot.slane %v2264_v50, 1  ;;  %v2271_v21 = vrot.slane %v2270_v0, 1  ;;  %v2278_v7 = vrot.slane %v2277_v38, 1  ;;  %v2789_v27 = vrot.slane %v2670_v61, 2 }
 0x37e   : > { %v2805_v15 = vrot.slane %v2671_v45, 2  ;;  %v2819_v37 = vrot.slane %v2672_v35, 2  ;;  %v2833_v30 = vrot.slane %v2673_v12, 2  ;;  %v2843_v42 = vrot.slane %v4990_v26, 4 }
 0x37f   : > { %v2857_v34 = vrot.slane %v5002_v52, 4  ;;  %v2871_v19 = vrot.slane %v5004_v41, 4  ;;  %v2885_v17 = vrot.slane %v5006_v16, 4  ;;  %v2260_v22 = vadd.f32 %v2259_v54, %v2258_v59 }
 0x380   : > { %v2266_v51 = vadd.f32 %v2265_v40, %v2264_v50  ;;  %v2272_v20 = vadd.f32 %v2271_v21, %v2270_v0  ;;  %v2279_v6 = vadd.f32 %v2278_v7, %v2277_v38  ;;  %v2791_v61 = vsel %vm2790_vm8, %v2789_v27, %v4944_v49 }
 0x381   : > { %v2610_v45 = vmul.f32 %v4397_v46, %v2519_v14  ;;  %v2611_v35 = vmul.f32 %v4400_v11, %v2519_v14  ;;  %v2612_v12 = vmul.f32 %v4402_v13, %v2519_v14  ;;  %v2806_v60 = vsel %vm2790_vm8, %v2805_v15, %v4949_v47 }
 0x382   : > { %v2613_v26 = vmul.f32 %v4404_v18, %v2519_v14  ;;  %v2409_v59 = vrot.slane %v4842_v32, 1  ;;  %v2820_v5 = vsel %vm2790_vm8, %v2819_v37, %v4954_v25  ;;  %v2834_v62 = vsel %vm2790_vm8, %v2833_v30, %v4957_v56 }
 0x383   : > { %v2674_v23 = vadd.f32 %v2610_v45, %v2260_v22  ;;  %v2675_v49 = vadd.f32 %v2611_v35, %v2266_v51  ;;  %v2676_v50 = vadd.f32 %v2612_v12, %v2272_v20  ;;  %v2415_v8 = vrot.slane %v4844_v9, 1  ;;  %v2554_v35 = vpop.permute.xlu1 %2553 }
 0x384   : > { %v2677_v0 = vadd.f32 %v2613_v26, %v2279_v6  ;;  %v2421_v36 = vrot.slane %v4847_v53, 1  ;;  %v2428_v41 = vrot.slane %v4849_v58, 1  ;;  %v2410_v25 = vadd.f32 %v2409_v59, %v4842_v32 }
 0x385   : > { %v2792_v47 = vrot.slane %v2674_v23, 1  ;;  %v2807_v38 = vrot.slane %v2675_v49, 1  ;;  %v2821_v52 = vrot.slane %v2676_v50, 1  ;;  %v2634_v54 = vmul.f32 %v4397_v46, %v2549_v44 }
 0x386   : > { %v2835_v16 = vrot.slane %v2677_v0, 1  ;;  %v2635_v40 = vmul.f32 %v4400_v11, %v2549_v44  ;;  %v2636_v27 = vmul.f32 %v4402_v13, %v2549_v44  ;;  %v2416_v32 = vadd.f32 %v2415_v8, %v4844_v9 }
 0x387   : > { %v2794_v21 = vsel %vm2793_vm9, %v2792_v47, %v2791_v61  ;;  %v2808_v56 = vsel %vm2793_vm9, %v2807_v38, %v2806_v60  ;;  %v2822_v7 = vsel %vm2793_vm9, %v2821_v52, %v2820_v5  ;;  %v2637_v37 = vmul.f32 %v4404_v18, %v2549_v44 }
 0x388   : > { %v2836_v15 = vsel %vm2793_vm9, %v2835_v16, %v2834_v62  ;;  %2901 = vst [vmem:[%s5040_s20] sm:$0xff] %v2794_v21  ;;  %2902 = vst [vmem:[%s5040_s20 + $0x8] sm:$0xff] %v2808_v56  ;;  %v2698_v30 = vadd.f32 %v2634_v54, %v2410_v25  ;;  %v2422_v14 = vadd.f32 %v2421_v36, %v4847_v53  ;;  %v2434_v22 = vrot.slane %v4851_v57, 1 }
 0x389   : > { %2903 = vst [vmem:[%s5040_s20 + $0x10] sm:$0xff] %v2822_v7  ;;  %2904 = vst.msk [vmem:[%s5040_s20 + $0x18] sm:$0xff] %vm904_vm0, %v2836_v15  ;;  %v2440_v51 = vrot.slane %v4853_v31, 1  ;;  %v2446_v20 = vrot.slane %v4855_v28, 1  ;;  %v2844_v6 = vsel %vm2784_vm6, %v2843_v42, %v4929_v33  ;;  %v2858_v61 = vsel %vm2784_vm6, %v2857_v34, %v4933_v55 }
 0x38a   : > { %v2872_v9 = vsel %vm2784_vm6, %v2871_v19, %v4937_v24  ;;  %v2429_v45 = vadd.f32 %v2428_v41, %v4849_v58  ;;  %v2886_v53 = vsel %vm2784_vm6, %v2885_v17, %v4941_v48  ;;  %v2699_v12 = vadd.f32 %v2635_v40, %v2416_v32 }
 0x38b   : > { %v2700_v60 = vadd.f32 %v2636_v27, %v2422_v14  ;;  %v2453_v26 = vrot.slane %v4857_v2, 1  ;;  %v2845_v5 = vrot.slane %v2698_v30, 3  ;;  %v2435_v33 = vadd.f32 %v2434_v22, %v4851_v57 }
 0x38c   : > { %v2701_v59 = vadd.f32 %v2637_v37, %v2429_v45  ;;  %v2441_v42 = vadd.f32 %v2440_v51, %v4853_v31  ;;  %v2447_v55 = vadd.f32 %v2446_v20, %v4855_v28  ;;  %v2638_v24 = vmul.f32 %v4397_v46, %v2554_v35 }
 0x38d   : > { %v2639_v58 = vmul.f32 %v4400_v11, %v2554_v35  ;;  %v2640_v34 = vmul.f32 %v4402_v13, %v2554_v35  ;;  %v2641_v48 = vmul.f32 %v4404_v18, %v2554_v35  ;;  %v2458_v19 = vadd.f32 %v2457_v43, %v4959_v3  ;;  %v2559_v43 = vpop.permute.xlu1 %2558 }
 0x38e   : > { %v2464_v57 = vadd.f32 %v2463_v1, %v4961_v4  ;;  %v2470_v31 = vadd.f32 %v2469_v63, %v4974_v39  ;;  %v2454_v28 = vadd.f32 %v2453_v26, %v4857_v2  ;;  %v2702_v17 = vadd.f32 %v2638_v24, %v2435_v33 }
 0x38f   : > { %v2703_v23 = vadd.f32 %v2639_v58, %v2441_v42  ;;  %v2477_v49 = vadd.f32 %v2476_v29, %v4976_v10  ;;  %v2704_v50 = vadd.f32 %v2640_v34, %v2447_v55  ;;  %v2459_v44 = vrot.slane %v2458_v19, 1 }
 0x390   : > { %v2465_v62 = vrot.slane %v2464_v57, 1  ;;  %v2471_v3 = vrot.slane %v2470_v31, 1  ;;  %v2859_v0 = vrot.slane %v2699_v12, 3  ;;  %v2873_v8 = vrot.slane %v2700_v60, 3 }
 0x391   : > { %v2705_v4 = vadd.f32 %v2641_v48, %v2454_v28  ;;  %v2478_v1 = vrot.slane %v2477_v49, 1  ;;  %v2887_v36 = vrot.slane %v2701_v59, 3  ;;  %v2847_v47 = vrot.slane %v2702_v17, 2 }
 0x392   : > { %v2460_v39 = vadd.f32 %v2459_v44, %v2458_v19  ;;  %v2466_v63 = vadd.f32 %v2465_v62, %v2464_v57  ;;  %v2472_v2 = vadd.f32 %v2471_v3, %v2470_v31  ;;  %v2642_v38 = vmul.f32 %v4397_v46, %v2559_v43 }
 0x393   : > { %v2643_v52 = vmul.f32 %v4400_v11, %v2559_v43  ;;  %v2644_v10 = vmul.f32 %v4402_v13, %v2559_v43  ;;  %v2861_v29 = vrot.slane %v2703_v23, 2  ;;  %v2875_v41 = vrot.slane %v2704_v50, 2 }
 0x394   : > { %v2479_v16 = vadd.f32 %v2478_v1, %v2477_v49  ;;  %v2645_v25 = vmul.f32 %v4404_v18, %v2559_v43  ;;  %v2889_v54 = vrot.slane %v2705_v4, 2  ;;  %v2706_v40 = vadd.f32 %v2642_v38, %v2460_v39 }
 0x395   : > { %v2707_v21 = vadd.f32 %v2643_v52, %v2466_v63  ;;  %v2708_v56 = vadd.f32 %v2644_v10, %v2472_v2  ;;  %v2846_v7 = vsel %vm2787_vm7, %v2845_v5, %v2844_v6  ;;  %v2860_v27 = vsel %vm2787_vm7, %v2859_v0, %v2858_v61  ;;  %2916 = sbr.rel (!%p5335_p10) target bundleno = 952 (0x3b8), region = 64 }
 0x396   : > { %v2874_v46 = vsel %vm2787_vm7, %v2873_v8, %v2872_v9  ;;  %v2709_v11 = vadd.f32 %v2645_v25, %v2479_v16  ;;  %v2888_v13 = vsel %vm2787_vm7, %v2887_v36, %v2886_v53  ;;  %v2849_v15 = vrot.slane %v2706_v40, 1 }
 0x397   : > { %v2863_v18 = vrot.slane %v2707_v21, 1  ;;  %v2877_v32 = vrot.slane %v2708_v56, 1  ;;  %v2848_v37 = vsel %vm2790_vm8, %v2847_v47, %v2846_v7  ;;  %v2862_v30 = vsel %vm2790_vm8, %v2861_v29, %v2860_v27 }
 0x398   : > { %v2876_v14 = vsel %vm2790_vm8, %v2875_v41, %v2874_v46  ;;  %v2891_v22 = vrot.slane %v2709_v11, 1  ;;  %v2850_v51 = vsel %vm2793_vm9, %v2849_v15, %v2848_v37  ;;  %v2890_v61 = vsel %vm2790_vm8, %v2889_v54, %v2888_v13 }
 0x399   : > { %v2864_v20 = vsel %vm2793_vm9, %v2863_v18, %v2862_v30  ;;  %v2878_v6 = vsel %vm2793_vm9, %v2877_v32, %v2876_v14  ;;  %2905 = vst [vmem:[%s5040_s20 + $0x20] sm:$0xff] %v2850_v51 }
 0x39a   : > { %v2892_v9 = vsel %vm2793_vm9, %v2891_v22, %v2890_v61  ;;  %2906 = vst [vmem:[%s5040_s20 + $0x28] sm:$0xff] %v2864_v20  ;;  %2907 = vst [vmem:[%s5040_s20 + $0x30] sm:$0xff] %v2878_v6 }
 0x39b   : > { %2908 = vst.msk [vmem:[%s5040_s20 + $0x38] sm:$0xff] %vm904_vm0, %v2892_v9 }
 0x39c   : > { %s5346_s27 = smov (!%p2919_p1, %s2918_s27), 2 }
 0x39d   : > { %s5108_s26 = sshll.u32 %s5346_s27, 9 }
 0x39e   : > { %s2924_s16 = ssub.s32 1024, %s5108_s26 }
 0x39f   : > { %2925 = vsyncadd %s2910_s23, %s2924_s16  ;;  %p3140_p4 = scmp.ne.s32.totalorder %s5108_s26, 0  ;;  %s3152_s18 = sshll.u32 %s3734_s7, 10 }
 0x3a0   : > { %s5118_s28 = scalar_lea.hbm %s5175_s8, %s3152_s18  ;;  %s2931_s11 = sshll.u32 %s5040_s20, 4  ;;  %s5121_s11 = int_to_ptr.vmem [resolvable:$true] %s2931_s11 }
 0x3a1   : > { %s3583_s22 = scalar_lea.vmem %s5121_s11, %s5108_s26  ;;  %s3662_s24 = smov [#allocation8]  }
 0x3a2   : > { %p3584_p5 = scmp.ne.s32.totalorder %s5121_s11, %s3583_s22  ;;  %s3587_s17 = sshll.u32 %s3662_s24, 4  ;;  %s3588_s17 = int_to_ptr.vmem [resolvable:$false] %s3587_s17 }
 0x3a3   : > { %s3589_s7 = scalar_lea.vmem %s3588_s17, 2048  ;;  %p3590_p2 = scmp.lt.s32.totalorder %s5121_s11, %s3588_s17 }
 0x3a4   : > { %p3585_p11 = pnand %p3584_p5, %p3140_p4  ;;  %p3591_p3 = scmp.lt.s32.totalorder %s3589_s7, %s3583_s22 }
 0x3a6   : > { %p3586_p12 = pneg %p3585_p11  ;;  %p3592_p13 = por %p3591_p3, %p3590_p2 }
 0x3a8   : > { %p3593_p7 = pnand %p3592_p13, %p3586_p12 }
 0x3aa   : > { %3596 = shalt.err (!%p3593_p7)
}
 0x3ab   : > { %s3597_s21 = scalar_lea.hbm %s5118_s28, %s5108_s26  ;;  %s3601_s27 = scalar_lea.hbm %s5175_s8, 1536 }
 0x3ac   : > { %p3598_p6 = scmp.ne.s32.totalorder %s5118_s28, %s3597_s21  ;;  %p3602_p10 = scmp.lt.u32.totalorder %s5118_s28, %s5175_s8 }
 0x3ad   : > { %p3603_p1 = scmp.lt.u32.totalorder %s3601_s27, %s3597_s21  ;;  %p3605_p11 = scmp.lt.u32.totalorder %s3597_s21, %s5118_s28 }
 0x3ae   : > { %p3599_p8 = pnand %p3598_p6, %p3140_p4 }
 0x3af   : > { %p3604_p5 = por %p3603_p1, %p3602_p10 }
 0x3b0   : > { %p3600_p9 = pneg %p3599_p8 }
 0x3b1   : > { %p3606_p12 = por %p3605_p11, %p3604_p5 }
 0x3b3   : > { %p3607_p2 = pnand %p3606_p12, %p3600_p9 }
 0x3b5   : > { %3610 = shalt.err (!%p3607_p2)
}
 0x3b6   : > { %s3663_s25 = smov 512   ;;  %s3664_s3 = smov 32  }
 0x3b7   : > { %2937 = dma.vmem_to_hbm [thread:$0]  (%p3140_p4), %s5121_s11, %s5108_s26, %s5118_s28, %s2910_s23, %s3663_s25, %s3663_s25, %s3664_s3  }
 0x3b8 PF: > { %s2946_s22 = sand.u32 1, %s3641_s29   ;;  %p5336_p3 = scmp.ne.s32.totalorder %s5221_s19, 0 }
 0x3b9   : > { %s2947_s24 = scalar_lea.sflag [#allocation5], %s2946_s22 }
 0x3ba   : > { %p3196_p13 = pnand %p3029_p0, %p5336_p3 }
 0x3bc   : > { %3636 = dma.done.wait (!%p3196_p13), %s2947_s24, 1024  }
 0x3bd   : > { %3638 = vsyncadd (!%p3196_p13), %s2947_s24, 4294966272  ;;  %p24_p7 = scmp.ge.s32.totalorder %s3738_s12, 4   ;;  %s5337_s29 = smov %s3645_s30 }
 0x3be   : > { %s5338_s30 = smov %s3649_s9  ;;  %s5339_s9 = smov %s3750_s15 }
 0x3bf   : > { %s5340_s10 = smov %s3738_s12  ;;  %26 = sbr.rel (!%p24_p7) target bundleno = 9 (0x9), region = 104 }
 0x3c6   :  { %2952 = vsyncpa [#allocation4], 1 }
 0x3c7   :  { %2954 = vsyncpa [#allocation4 + $0x1], 1 }
 0x3c8   :  { %2955 = vsyncpa [#allocation7], 1 }
 0x3c9   :  { %2956 = vsyncpa [#allocation5], 1 }
 0x3ca   :  { %2958 = vsyncpa [#allocation5 + $0x1], 1 }

</bundles_post_ra>
